<compile_context>
chip_gen: v6e
topology: v6e:2x2x1
jax: 0.10.0
libtpu: 0.0.40
codegen_flags: <defaults>
</compile_context>

<pallas_src>
import jax
import jax.numpy as jnp
import numpy as np
from jax import lax
from jax.experimental import pallas as pl
from jax.experimental.pallas import tpu as pltpu

# ---- model dimensions (small, consistent with the module's __init__) ----
EMBED = 32          # embed_dim
HEADS = 8           # num_heads
HEAD_DIM = EMBED // HEADS
IMG_DIM = 16        # img_dim
TXT_DIM = 24        # text_dim
ENT_DIM = 16        # ne_dim
FF_DIM = 64         # ff_dim
LN_EPS = 1e-5
NEG_INF = -1e9
N_PARAMS = 34

E3 = 3 * EMBED                         # fused query / attention-output feature width (96)
DSUM = IMG_DIM + TXT_DIM + ENT_DIM     # packed context feature width (56)
CTX_IN = DSUM + 3                      # + one-hot context indicator cols (bias injection)
V_OFF = 128                            # V block starts 128-lane aligned in the KV output
KV_W = 2 * V_OFF                       # fused K|V projection output width
BTAB_W = max(E3, FF_DIM)               # lane width of the bias/LN table


# ----------------------------------------------------------------------------
# Small helpers (usable both inside the kernel and in plain JAX).
# ----------------------------------------------------------------------------
def _mxu_dot(a, b):
    """bf16-in / f32-accumulate matmul (single-pass MXU on all generations)."""
    return jnp.dot(a.astype(jnp.bfloat16), b.astype(jnp.bfloat16),
                   preferred_element_type=jnp.float32)


def _mxu_einsum(eq, a, b):
    return jnp.einsum(eq, a.astype(jnp.bfloat16), b.astype(jnp.bfloat16),
                      preferred_element_type=jnp.float32)


def _layer_norm(x, g, b):
    mu = jnp.mean(x, axis=-1, keepdims=True)
    var = jnp.mean((x - mu) ** 2, axis=-1, keepdims=True)
    return (x - mu) * lax.rsqrt(var + LN_EPS) * g + b


# ----------------------------------------------------------------------------
# Pallas kernel: one grid step = block_b whole examples, everything in VMEM.
# ----------------------------------------------------------------------------
def decoder_block_kernel(x_ref, ctx_ref, kbias_ref,
                         wq_ref, wkv_ref, sel_ref, gsum_ref,
                         wop_ref, fw1_ref, fw2_ref, btab_ref,
                         out_ref):
    M, E = x_ref.shape                    # M = block_b * Tq
    Bt, J = kbias_ref.shape               # J = HEADS * (Ti + Tt + Te)
    Tq = M // Bt
    Tk = ctx_ref.shape[0] // Bt           # total keys per example (all contexts)
    H = J // Tk
    F = fw1_ref.shape[1]

    btab = btab_ref[...]                  # [8, BTAB_W] f32 bias / LN table
    ln1_g, ln1_b = btab[0:1, :E], btab[1:2, :E]
    ln2_g, ln2_b = btab[2:3, :E], btab[3:4, :E]
    bq = btab[4:5, :E3]
    b_op = btab[5:6, :E]
    fb1 = btab[6:7, :F]
    fb2 = btab[7:8, :E]

    x = x_ref[...]                                        # [M, E] f32
    q = _layer_norm(x, ln1_g, ln1_b)
    q_all = _mxu_dot(q, wq_ref[...]) + bq                 # fused img|txt|ent queries [M,3E]

    # Fused K|V projection for all three contexts in ONE matmul.  Each packed context
    # row carries its features in its own column block plus a one-hot indicator column,
    # so K lands in cols [0,3E) and V in cols [V_OFF,V_OFF+3E) with the per-context
    # K/V biases already injected via the indicator rows of wkv.
    kv = _mxu_dot(ctx_ref[...], wkv_ref[...])             # [Bt*Tk, KV_W]
    kv3 = kv.reshape(Bt, Tk, KV_W)
    k_full = kv3[:, :, :E3]                               # [Bt, Tk, 3E]
    v_full = kv3[:, :, V_OFF:V_OFF + E3]                  # [Bt, Tk, 3E]

    # Head expansion: j = h*Tk + k.  sel (host-precomputed constant) keeps only head
    # j//Tk's HEAD_DIM feature slice inside each context block, so the two batched
    # matmuls below cover ALL heads and ALL contexts at once.
    sel = sel_ref[...]                                    # [J, 3E] 0/1 f32

    def tile_heads(a):
        return jnp.broadcast_to(a[:, None], (Bt, H, Tk, E3)).reshape(Bt, J, E3)

    kb = tile_heads(k_full) * sel                         # [Bt, J, 3E]
    vb = tile_heads(v_full) * sel                         # [Bt, J, 3E]

    s = _mxu_einsum('bqf,bjf->bqj', q_all.reshape(Bt, Tq, E3), kb)   # [Bt, Tq, J]
    s = s + kbias_ref[...][:, None, :]                    # additive key-padding bias
    # Global row max (over every head/context) keeps exp() bounded; padded keys
    # (-1e9) collapse to exp()==0.  Assumes per-group score spread stays < ~80.
    s = s - jnp.max(s, axis=-1, keepdims=True)
    p = jnp.exp(s)

    # Per-(head, context) softmax denominator via one group-sum matmul.  A group whose
    # keys are ALL padded gets denom==0 -> clamped -> zero output for that head slice
    # (PyTorch's -inf masking would yield NaN there).
    denom = _mxu_dot(p.reshape(M, J), gsum_ref[...]).reshape(Bt, Tq, J)
    p = p * pl.reciprocal(jnp.maximum(denom, 1e-20), approx=True)

    out3 = _mxu_einsum('bqj,bje->bqe', p, vb)             # [Bt, Tq, 3E] = [o_img|o_txt|o_ent]
    attn = _mxu_dot(out3.reshape(M, E3), wop_ref[...]) + b_op        # fused concat proj

    x = x + attn                                          # dropout = identity (eval mode)
    x = _layer_norm(x, ln2_g, ln2_b)
    h = jnp.maximum(_mxu_dot(x, fw1_ref[...]) + fb1, 0.0)
    y = x + _mxu_dot(h, fw2_ref[...]) + fb2               # dropout = identity (eval mode)

    # Lane-dense output: merge (Tq, E) -> Tq*E lanes with a lane concat so the writeback
    # uses dense stores / dense DMA instead of 32-lane masked partial stores.
    y3 = y.reshape(Bt, Tq, E)
    out_ref[...] = jnp.concatenate([y3[:, qi, :] for qi in range(Tq)],
                                   axis=-1).astype(out_ref.dtype)


# ----------------------------------------------------------------------------
# Host-side packing of parameters, constant masks and activations.
# ----------------------------------------------------------------------------
def pack_params(params):
    (ln1_g, ln1_b,
     iWq, ibq, iWk, ibk, iWv, ibv, iWo, ibo,
     tWq, tbq, tWk, tbk, tWv, tbv, tWo, tbo,
     eWq, ebq, eWk, ebk, eWv, ebv, eWo, ebo,
     pW, pb, ln2_g, ln2_b, fW1, fb1, fW2, fb2) = params

    E = EMBED
    scaling = float(HEAD_DIM) ** -0.5
    hp = lax.Precision.HIGHEST
    wdt = jnp.bfloat16   # MXU-native weight storage (halves weight DMA)

    # fused (and pre-scaled) query projection
    Wq_all = (jnp.concatenate([iWq, tWq, eWq], axis=1) * scaling).astype(wdt)   # [E, 3E]
    bq_all = jnp.concatenate([ibq, tbq, ebq]) * scaling                          # [3E]

    # fused block-placed K|V projection over packed context rows; the 3 indicator rows
    # inject each context's K/V biases (exact, since indicator cols are exactly 1.0).
    Wkv = jnp.zeros((CTX_IN, KV_W), jnp.float32)
    blocks = [(iWk, ibk, iWv, ibv, 0, IMG_DIM),
              (tWk, tbk, tWv, tbv, IMG_DIM, TXT_DIM),
              (eWk, ebk, eWv, ebv, IMG_DIM + TXT_DIM, ENT_DIM)]
    for c, (Wk, bk_, Wv, bv_, off, D) in enumerate(blocks):
        Wkv = Wkv.at[off:off + D, c * E:(c + 1) * E].set(Wk)
        Wkv = Wkv.at[off:off + D, V_OFF + c * E:V_OFF + (c + 1) * E].set(Wv)
        Wkv = Wkv.at[DSUM + c, c * E:(c + 1) * E].set(bk_)
        Wkv = Wkv.at[DSUM + c, V_OFF + c * E:V_OFF + (c + 1) * E].set(bv_)
    Wkv = Wkv.astype(wdt)

    # fold each attention's output projection Wo into its slice of the concat projection
    W_op = jnp.concatenate([
        jnp.dot(iWo, pW[:E], precision=hp),
        jnp.dot(tWo, pW[E:2 * E], precision=hp),
        jnp.dot(eWo, pW[2 * E:], precision=hp)], axis=0).astype(wdt)             # [3E, E]
    b_op = (pb
            + jnp.dot(ibo, pW[:E], precision=hp)
            + jnp.dot(tbo, pW[E:2 * E], precision=hp)
            + jnp.dot(ebo, pW[2 * E:], precision=hp))                            # [E]

    # all LN / bias vectors in one f32 table (fewer resident params / DMA descriptors)
    def row(v):
        v = v.astype(jnp.float32)
        return jnp.pad(v, (0, BTAB_W - v.shape[0]))
    btab = jnp.stack([row(ln1_g), row(ln1_b), row(ln2_g), row(ln2_b),
                      row(bq_all), row(b_op), row(fb1), row(fb2)])               # [8, BTAB_W]

    return dict(wq=Wq_all, wkv=Wkv, wop=W_op,
                fw1=fW1.astype(wdt), fw2=fW2.astype(wdt), btab=btab)


def _build_masks(Ti, Tt, Te):
    """Constant head-selection mask and (head, context) group-sum matrix (hoisted out of
    the kernel; they depend only on HEADS and the context lengths)."""
    Tk = Ti + Tt + Te
    J = HEADS * Tk
    j = np.arange(J)
    head_of_j = j // Tk
    key_of_j = j % Tk
    ctx_id = np.concatenate([np.full(Ti, 0), np.full(Tt, 1), np.full(Te, 2)])
    ctx_of_j = ctx_id[key_of_j]
    e = np.arange(E3)
    head_of_e = (e // HEAD_DIM) % HEADS
    sel = (head_of_e[None, :] == head_of_j[:, None]).astype(np.float32)          # [J, 3E]
    same = ((head_of_j[:, None] == head_of_j[None, :]) &
            (ctx_of_j[:, None] == ctx_of_j[None, :]))
    gsum = same.astype(np.float32)                                                # [J, J]
    return jnp.asarray(sel), jnp.asarray(gsum, dtype=jnp.bfloat16)


def _pack_contexts(img, txt, ent, b_pad):
    """Stack all context rows per example into [B_pad*Tk, CTX_IN]: each context's
    features in its own column block + its one-hot indicator column."""
    B = img.shape[0]
    Tk = img.shape[1] + txt.shape[1] + ent.shape[1]

    def place(c, col, ind):
        T, D = c.shape[1], c.shape[2]
        r = jnp.zeros((B, T, CTX_IN), jnp.float32)
        r = r.at[:, :, col:col + D].set(c.astype(jnp.float32))
        r = r.at[:, :, DSUM + ind].set(1.0)
        return r

    rows = jnp.concatenate([place(img, 0, 0),
                            place(txt, IMG_DIM, 1),
                            place(ent, IMG_DIM + TXT_DIM, 2)], axis=1)   # [B, Tk, CTX_IN]
    rows = jnp.pad(rows, ((0, b_pad - B), (0, 0), (0, 0)))
    return rows.reshape(b_pad * Tk, CTX_IN)


def _pack_key_bias(img_mask, txt_mask, ent_mask, b_pad):
    """key_padding_mask (True = padded) -> additive bias [B_pad, H*Tk], j = h*Tk + k."""
    B = img_mask.shape[0]
    m = jnp.concatenate([img_mask, txt_mask, ent_mask], axis=1)          # [B, Tk]
    bias = jnp.where(m, NEG_INF, 0.0).astype(jnp.float32)
    bias = jnp.tile(bias, (1, HEADS))                                    # head-major tiling
    return jnp.pad(bias, ((0, b_pad - B), (0, 0)))


def _choose_blocking(B, max_block=64):
    """Sublane-aligned batch blocking: pad B up (never collapse to block_b=1), use >=2
    grid steps when the padded batch allows it (v7x has two TensorCores)."""
    bp = ((B + 7) // 8) * 8
    if bp <= 8:
        block_b = 8
    elif bp <= 2 * max_block:
        block_b = ((bp // 2 + 7) // 8) * 8
    else:
        block_b = max_block
    b_pad = ((bp + block_b - 1) // block_b) * block_b
    return block_b, b_pad


def decoder_block(x, img, txt, ent, img_mask, txt_mask, ent_mask, params, *, block_b=None):
    B, Tq, E = x.shape
    Ti, Tt, Te = img.shape[1], txt.shape[1], ent.shape[1]
    Tk = Ti + Tt + Te
    J = HEADS * Tk

    if block_b is None:
        block_b, b_pad = _choose_blocking(B)
    else:
        block_b = max(8, ((block_b + 7) // 8) * 8)
        b_pad = ((B + block_b - 1) // block_b) * block_b
    nb = b_pad // block_b

    packed = pack_params(params)
    sel, gsum = _build_masks(Ti, Tt, Te)

    # lane-dense / contiguous-DMA activation packing
    x_rows = jnp.pad(x.astype(jnp.float32),
                     ((0, b_pad - B), (0, 0), (0, 0))).reshape(b_pad * Tq, E)
    ctx_rows = _pack_contexts(img, txt, ent, b_pad)
    kbias = _pack_key_bias(img_mask, txt_mask, ent_mask, b_pad)

    param_list = [packed['wq'], packed['wkv'], sel, gsum,
                  packed['wop'], packed['fw1'], packed['fw2'], packed['btab']]

    def full_spec(a):
        nd = a.ndim
        return pl.BlockSpec(a.shape, lambda b, _nd=nd: (0,) * _nd)

    grid_spec = pltpu.PrefetchScalarGridSpec(
        num_scalar_prefetch=0,
        grid=(nb,),
        in_specs=[pl.BlockSpec((block_b * Tq, E), lambda b: (b, 0)),
                  pl.BlockSpec((block_b * Tk, CTX_IN), lambda b: (b, 0)),
                  pl.BlockSpec((block_b, J), lambda b: (b, 0))]
                 + [full_spec(p) for p in param_list],
        out_specs=pl.BlockSpec((block_b, Tq * E), lambda b: (b, 0)),
    )

    # TODO(synk): output could be emitted as bf16 to halve writeback DMA if downstream
    # tolerates it; kept f32 here to preserve the module's output dtype.
    out = pl.pallas_call(
        decoder_block_kernel,
        out_shape=jax.ShapeDtypeStruct((b_pad, Tq * E), jnp.float32),
        grid_spec=grid_spec,
        compiler_params=pltpu.CompilerParams(
            dimension_semantics=("parallel",),
            vmem_limit_bytes=48 * 1024 * 1024),
    )(x_rows, ctx_rows, kbias, *param_list)

    return out[:B].reshape(B, Tq, E)


# ----------------------------------------------------------------------------
# Deterministic parameter init (synthetic; matches the module's shapes).
# ----------------------------------------------------------------------------
def init_params(key):
    def lin(k, din, dout):
        kw, kb = jax.random.split(k)
        W = jax.random.normal(kw, (din, dout), jnp.float32) * 0.02
        b = jax.random.normal(kb, (dout,), jnp.float32) * 0.01
        return W, b

    keys = jax.random.split(key, 8)
    params = []
    params += [jnp.ones((EMBED,), jnp.float32), jnp.zeros((EMBED,), jnp.float32)]   # ln1
    for i, kdim in enumerate((IMG_DIM, TXT_DIM, ENT_DIM)):
        kq, kk, kv, ko = jax.random.split(keys[i], 4)
        params += [*lin(kq, EMBED, EMBED), *lin(kk, kdim, EMBED),
                   *lin(kv, kdim, EMBED), *lin(ko, EMBED, EMBED)]
    params += [*lin(keys[3], 3 * EMBED, EMBED)]                                      # proj
    params += [jnp.ones((EMBED,), jnp.float32), jnp.zeros((EMBED,), jnp.float32)]    # ln2
    params += [*lin(keys[4], EMBED, FF_DIM), *lin(keys[5], FF_DIM, EMBED)]           # ff
    assert len(params) == N_PARAMS
    return params


# ----------------------------------------------------------------------------
# Pure-JAX reference: faithful, unfused per-head math of the original module.
# ----------------------------------------------------------------------------
def _ref_mha(q, ctx, kbias, Wq, bq, Wk, bk, Wv, bv, Wo, bo):
    scaling = float(HEAD_DIM) ** -0.5
    Tq, Tk = q.shape[0], ctx.shape[0]
    Q = ((q @ Wq + bq) * scaling).reshape(Tq, HEADS, HEAD_DIM)
    K = (ctx @ Wk + bk).reshape(Tk, HEADS, HEAD_DIM)
    V = (ctx @ Wv + bv).reshape(Tk, HEADS, HEAD_DIM)
    s = jnp.einsum('qhd,khd->hqk', Q, K) + kbias[None, None, :]
    p = jax.nn.softmax(s, axis=-1)
    o = jnp.einsum('hqk,khd->qhd', p, V).reshape(Tq, EMBED)
    return o @ Wo + bo


def _ref_forward_one(x, img, txt, ent, ib, tb, eb, params):
    (ln1_g, ln1_b,
     iWq, ibq, iWk, ibk, iWv, ibv, iWo, ibo,
     tWq, tbq, tWk, tbk, tWv, tbv, tWo, tbo,
     eWq, ebq, eWk, ebk, eWv, ebv, eWo, ebo,
     pW, pb, ln2_g, ln2_b, fW1, fb1, fW2, fb2) = params
    q = _layer_norm(x, ln1_g, ln1_b)
    o_img = _ref_mha(q, img, ib, iWq, ibq, iWk, ibk, iWv, ibv, iWo, ibo)
    o_txt = _ref_mha(q, txt, tb, tWq, tbq, tWk, tbk, tWv, tbv, tWo, tbo)
    o_ent = _ref_mha(q, ent, eb, eWq, ebq, eWk, ebk, eWv, ebv, eWo, ebo)
    cat = jnp.concatenate([o_img, o_txt, o_ent], axis=-1)
    x = x + (cat @ pW + pb)
    x = _layer_norm(x, ln2_g, ln2_b)
    h = jnp.maximum(x @ fW1 + fb1, 0.0)
    return x + (h @ fW2 + fb2)


def reference(x, img, txt, ent, img_mask, txt_mask, ent_mask, params):
    ib = jnp.where(img_mask, NEG_INF, 0.0).astype(jnp.float32)
    tb = jnp.where(txt_mask, NEG_INF, 0.0).astype(jnp.float32)
    eb = jnp.where(ent_mask, NEG_INF, 0.0).astype(jnp.float32)
    p = tuple(params)
    return jax.vmap(
        lambda a, b_, c, d, e, f, g: _ref_forward_one(a, b_, c, d, e, f, g, p)
    )(x, img, txt, ent, ib, tb, eb)


if __name__ == "__main__":
    B, Tq, Ti, Tt, Te = 2, 8, 4, 8, 4
    key = jax.random.PRNGKey(0)
    kx, ki, kt, ke, kp = jax.random.split(key, 5)

    x = jax.random.normal(kx, (B, Tq, EMBED), jnp.float32)
    img = jax.random.normal(ki, (B, Ti, IMG_DIM), jnp.float32)
    txt = jax.random.normal(kt, (B, Tt, TXT_DIM), jnp.float32)
    ent = jax.random.normal(ke, (B, Te, ENT_DIM), jnp.float32)

    # key padding masks: True = padded position (ignored by attention)
    img_mask = jnp.zeros((B, Ti), bool).at[1, -1].set(True)
    txt_mask = jnp.zeros((B, Tt), bool).at[1, -2:].set(True)
    ent_mask = jnp.zeros((B, Te), bool)

    params = init_params(kp)

    y = decoder_block(x, img, txt, ent, img_mask, txt_mask, ent_mask, params)
    y = jax.block_until_ready(y)

    y_ref = reference(x, img, txt, ent, img_mask, txt_mask, ent_mask, params)
    # bf16-fed MXU + approx reciprocal vs f32 reference -> slightly looser tolerance.
    np.testing.assert_allclose(np.asarray(y), np.asarray(y_ref), rtol=2e-2, atol=2e-2)
    print("KERNEL_OK")
</pallas_src>

<mosaic_0001>
module attributes {stable_mosaic.version = 11 : i64} {
  func.func @decoder_block_kernel(%arg0: i32, %arg1: memref<64x32xf32, #tpu.memory_space<vmem>>, %arg2: memref<128x59xf32, #tpu.memory_space<vmem>>, %arg3: memref<8x128xf32, #tpu.memory_space<vmem>>, %arg4: memref<32x96xbf16, #tpu.memory_space<vmem>>, %arg5: memref<59x256xbf16, #tpu.memory_space<vmem>>, %arg6: memref<128x96xf32, #tpu.memory_space<vmem>>, %arg7: memref<128x128xbf16, #tpu.memory_space<vmem>>, %arg8: memref<96x32xbf16, #tpu.memory_space<vmem>>, %arg9: memref<32x64xbf16, #tpu.memory_space<vmem>>, %arg10: memref<64x32xbf16, #tpu.memory_space<vmem>>, %arg11: memref<8x96xf32, #tpu.memory_space<vmem>>, %arg12: memref<8x256xf32, #tpu.memory_space<vmem>>) attributes {dimension_semantics = [#tpu.dimension_semantics<parallel>], iteration_bounds = array<i64: 1>, scalar_prefetch = 0 : i64, scratch_operands = 0 : i64, tpu.core_type = #tpu.core_type<tc>, window_params = [{transform_indices = @transform_0, window_bounds = array<i64: 64, 32>}, {transform_indices = @transform_1, window_bounds = array<i64: 128, 59>}, {transform_indices = @transform_2, window_bounds = array<i64: 8, 128>}, {pipeline_mode = #tpu.pipeline_mode<synchronous>, transform_indices = @transform_3, window_bounds = array<i64: 32, 96>}, {pipeline_mode = #tpu.pipeline_mode<synchronous>, transform_indices = @transform_4, window_bounds = array<i64: 59, 256>}, {pipeline_mode = #tpu.pipeline_mode<synchronous>, transform_indices = @transform_5, window_bounds = array<i64: 128, 96>}, {pipeline_mode = #tpu.pipeline_mode<synchronous>, transform_indices = @transform_6, window_bounds = array<i64: 128, 128>}, {pipeline_mode = #tpu.pipeline_mode<synchronous>, transform_indices = @transform_7, window_bounds = array<i64: 96, 32>}, {pipeline_mode = #tpu.pipeline_mode<synchronous>, transform_indices = @transform_8, window_bounds = array<i64: 32, 64>}, {pipeline_mode = #tpu.pipeline_mode<synchronous>, transform_indices = @transform_9, window_bounds = array<i64: 64, 32>}, {pipeline_mode = #tpu.pipeline_mode<synchronous>, transform_indices = @transform_10, window_bounds = array<i64: 8, 96>}, {transform_indices = @transform_11, window_bounds = array<i64: 8, 256>}]} {
    %c0 = arith.constant 0 : index
    %c0_0 = arith.constant 0 : index
    %0 = vector.load %arg11[%c0, %c0_0] : memref<8x96xf32, #tpu.memory_space<vmem>>, vector<8x96xf32>
    %1 = vector.extract_strided_slice %0 {offsets = [0, 0], sizes = [1, 32], strides = [1, 1]} : vector<8x96xf32> to vector<1x32xf32>
    %2 = vector.extract_strided_slice %0 {offsets = [1, 0], sizes = [1, 32], strides = [1, 1]} : vector<8x96xf32> to vector<1x32xf32>
    %3 = vector.extract_strided_slice %0 {offsets = [2, 0], sizes = [1, 32], strides = [1, 1]} : vector<8x96xf32> to vector<1x32xf32>
    %4 = vector.extract_strided_slice %0 {offsets = [3, 0], sizes = [1, 32], strides = [1, 1]} : vector<8x96xf32> to vector<1x32xf32>
    %5 = vector.extract_strided_slice %0 {offsets = [4, 0], sizes = [1, 96], strides = [1, 1]} : vector<8x96xf32> to vector<1x96xf32>
    %6 = vector.extract_strided_slice %0 {offsets = [5, 0], sizes = [1, 32], strides = [1, 1]} : vector<8x96xf32> to vector<1x32xf32>
    %7 = vector.extract_strided_slice %0 {offsets = [6, 0], sizes = [1, 64], strides = [1, 1]} : vector<8x96xf32> to vector<1x64xf32>
    %8 = vector.extract_strided_slice %0 {offsets = [7, 0], sizes = [1, 32], strides = [1, 1]} : vector<8x96xf32> to vector<1x32xf32>
    %c0_1 = arith.constant 0 : index
    %c0_2 = arith.constant 0 : index
    %9 = vector.load %arg1[%c0_1, %c0_2] : memref<64x32xf32, #tpu.memory_space<vmem>>, vector<64x32xf32>
    %cst = arith.constant dense<0.000000e+00> : vector<64xf32>
    %10 = vector.multi_reduction <add>, %9, %cst [1] : vector<64x32xf32> to vector<64xf32>
    %11 = vector.shape_cast %10 : vector<64xf32> to vector<64x1xf32>
    %cst_3 = arith.constant 3.200000e+01 : f32
    %12 = vector.broadcast %cst_3 : f32 to vector<64x1xf32>
    %13 = arith.divf %11, %12 : vector<64x1xf32>
    %14 = vector.broadcast %13 : vector<64x1xf32> to vector<64x32xf32>
    %15 = arith.subf %9, %14 : vector<64x32xf32>
    %16 = arith.mulf %15, %15 : vector<64x32xf32>
    %cst_4 = arith.constant dense<0.000000e+00> : vector<64xf32>
    %17 = vector.multi_reduction <add>, %16, %cst_4 [1] : vector<64x32xf32> to vector<64xf32>
    %18 = vector.shape_cast %17 : vector<64xf32> to vector<64x1xf32>
    %cst_5 = arith.constant 3.200000e+01 : f32
    %19 = vector.broadcast %cst_5 : f32 to vector<64x1xf32>
    %20 = arith.divf %18, %19 : vector<64x1xf32>
    %21 = vector.broadcast %13 : vector<64x1xf32> to vector<64x32xf32>
    %22 = arith.subf %9, %21 : vector<64x32xf32>
    %cst_6 = arith.constant 9.99999974E-6 : f32
    %23 = vector.broadcast %cst_6 : f32 to vector<64x1xf32>
    %24 = arith.addf %20, %23 : vector<64x1xf32>
    %25 = math.rsqrt %24 : vector<64x1xf32>
    %26 = vector.broadcast %25 : vector<64x1xf32> to vector<64x32xf32>
    %27 = arith.mulf %22, %26 : vector<64x32xf32>
    %28 = vector.broadcast %1 : vector<1x32xf32> to vector<64x32xf32>
    %29 = arith.mulf %27, %28 : vector<64x32xf32>
    %30 = vector.broadcast %2 : vector<1x32xf32> to vector<64x32xf32>
    %31 = arith.addf %29, %30 : vector<64x32xf32>
    %c0_7 = arith.constant 0 : index
    %c0_8 = arith.constant 0 : index
    %32 = vector.load %arg4[%c0_7, %c0_8] : memref<32x96xbf16, #tpu.memory_space<vmem>>, vector<32x96xbf16>
    %33 = arith.truncf %31 : vector<64x32xf32> to vector<64x32xbf16>
    %cst_9 = arith.constant dense<0.000000e+00> : vector<64x96xf32>
    %34 = tpu.matmul %33, %32, %cst_9 {dimension_numbers = #tpu.dot_dimension_numbers<[1], [0], [0], [1], [0, 0, 1, 1], [], []>} : vector<64x32xbf16>, vector<32x96xbf16>, vector<64x96xf32> -> vector<64x96xf32>
    %35 = vector.broadcast %5 : vector<1x96xf32> to vector<64x96xf32>
    %36 = arith.addf %34, %35 : vector<64x96xf32>
    %c0_10 = arith.constant 0 : index
    %c0_11 = arith.constant 0 : index
    %37 = vector.load %arg2[%c0_10, %c0_11] : memref<128x59xf32, #tpu.memory_space<vmem>>, vector<128x59xf32>
    %c0_12 = arith.constant 0 : index
    %c0_13 = arith.constant 0 : index
    %38 = vector.load %arg5[%c0_12, %c0_13] : memref<59x256xbf16, #tpu.memory_space<vmem>>, vector<59x256xbf16>
    %39 = arith.truncf %37 : vector<128x59xf32> to vector<128x59xbf16>
    %cst_14 = arith.constant dense<0.000000e+00> : vector<128x256xf32>
    %40 = tpu.matmul %39, %38, %cst_14 {dimension_numbers = #tpu.dot_dimension_numbers<[1], [0], [0], [1], [0, 0, 1, 1], [], []>} : vector<128x59xbf16>, vector<59x256xbf16>, vector<128x256xf32> -> vector<128x256xf32>
    %41 = vector.shape_cast %40 : vector<128x256xf32> to vector<8x16x256xf32>
    %42 = vector.extract_strided_slice %41 {offsets = [0, 0, 0], sizes = [8, 16, 96], strides = [1, 1, 1]} : vector<8x16x256xf32> to vector<8x16x96xf32>
    %43 = vector.extract_strided_slice %41 {offsets = [0, 0, 128], sizes = [8, 16, 96], strides = [1, 1, 1]} : vector<8x16x256xf32> to vector<8x16x96xf32>
    %c0_15 = arith.constant 0 : index
    %c0_16 = arith.constant 0 : index
    %44 = vector.load %arg6[%c0_15, %c0_16] : memref<128x96xf32, #tpu.memory_space<vmem>>, vector<128x96xf32>
    %45 = vector.shape_cast %42 : vector<8x16x96xf32> to vector<8x1x16x96xf32>
    %46 = vector.shape_cast %45 : vector<8x1x16x96xf32> to vector<8x1x16x96xf32>
    %47 = vector.broadcast %46 : vector<8x1x16x96xf32> to vector<8x8x16x96xf32>
    %48 = vector.shape_cast %47 : vector<8x8x16x96xf32> to vector<8x128x96xf32>
    %49 = vector.shape_cast %44 : vector<128x96xf32> to vector<1x128x96xf32>
    %50 = vector.broadcast %49 : vector<1x128x96xf32> to vector<8x128x96xf32>
    %51 = arith.mulf %48, %50 : vector<8x128x96xf32>
    %52 = vector.shape_cast %43 : vector<8x16x96xf32> to vector<8x1x16x96xf32>
    %53 = vector.shape_cast %52 : vector<8x1x16x96xf32> to vector<8x1x16x96xf32>
    %54 = vector.broadcast %53 : vector<8x1x16x96xf32> to vector<8x8x16x96xf32>
    %55 = vector.shape_cast %54 : vector<8x8x16x96xf32> to vector<8x128x96xf32>
    %56 = vector.shape_cast %44 : vector<128x96xf32> to vector<1x128x96xf32>
    %57 = vector.broadcast %56 : vector<1x128x96xf32> to vector<8x128x96xf32>
    %58 = arith.mulf %55, %57 : vector<8x128x96xf32>
    %59 = vector.shape_cast %36 : vector<64x96xf32> to vector<8x8x96xf32>
    %60 = arith.truncf %59 : vector<8x8x96xf32> to vector<8x8x96xbf16>
    %61 = arith.truncf %51 : vector<8x128x96xf32> to vector<8x128x96xbf16>
    "tpu.trace_start"() <{level = 10 : i32, message = "bqf,bjf->bqj"}> : () -> ()
    %cst_17 = arith.constant dense<0.000000e+00> : vector<8x8x128xf32>
    %62 = tpu.matmul %60, %61, %cst_17 {dimension_numbers = #tpu.dot_dimension_numbers<[2], [2], [1], [1], [0, 0, 0, 1, 1, 1], [0], [0]>} : vector<8x8x96xbf16>, vector<8x128x96xbf16>, vector<8x8x128xf32> -> vector<8x8x128xf32>
    "tpu.trace_stop"() : () -> ()
    %c0_18 = arith.constant 0 : index
    %c0_19 = arith.constant 0 : index
    %63 = vector.load %arg3[%c0_18, %c0_19] : memref<8x128xf32, #tpu.memory_space<vmem>>, vector<8x128xf32>
    %64 = vector.shape_cast %63 : vector<8x128xf32> to vector<8x1x128xf32>
    %65 = vector.broadcast %64 : vector<8x1x128xf32> to vector<8x8x128xf32>
    %66 = arith.addf %62, %65 : vector<8x8x128xf32>
    %cst_20 = arith.constant dense<0xFF800000> : vector<8x8xf32>
    %67 = vector.multi_reduction <maximumf>, %66, %cst_20 [2] : vector<8x8x128xf32> to vector<8x8xf32>
    %68 = vector.shape_cast %67 : vector<8x8xf32> to vector<8x8x1xf32>
    %69 = vector.broadcast %68 : vector<8x8x1xf32> to vector<8x8x128xf32>
    %70 = arith.subf %66, %69 : vector<8x8x128xf32>
    %71 = math.exp %70 : vector<8x8x128xf32>
    %72 = vector.shape_cast %71 : vector<8x8x128xf32> to vector<64x128xf32>
    %c0_21 = arith.constant 0 : index
    %c0_22 = arith.constant 0 : index
    %73 = vector.load %arg7[%c0_21, %c0_22] : memref<128x128xbf16, #tpu.memory_space<vmem>>, vector<128x128xbf16>
    %74 = arith.truncf %72 : vector<64x128xf32> to vector<64x128xbf16>
    %cst_23 = arith.constant dense<0.000000e+00> : vector<64x128xf32>
    %75 = tpu.matmul %74, %73, %cst_23 {dimension_numbers = #tpu.dot_dimension_numbers<[1], [0], [0], [1], [0, 0, 1, 1], [], []>} : vector<64x128xbf16>, vector<128x128xbf16>, vector<64x128xf32> -> vector<64x128xf32>
    %76 = vector.shape_cast %75 : vector<64x128xf32> to vector<8x8x128xf32>
    %cst_24 = arith.constant 9.99999968E-21 : f32
    %77 = vector.broadcast %cst_24 : f32 to vector<8x8x128xf32>
    %78 = arith.maximumf %76, %77 : vector<8x8x128xf32>
    %79 = tpu.reciprocal %78 {approx = true} : vector<8x8x128xf32> -> vector<8x8x128xf32>
    %80 = arith.mulf %71, %79 : vector<8x8x128xf32>
    %81 = arith.truncf %80 : vector<8x8x128xf32> to vector<8x8x128xbf16>
    %82 = arith.truncf %58 : vector<8x128x96xf32> to vector<8x128x96xbf16>
    "tpu.trace_start"() <{level = 10 : i32, message = "bqj,bje->bqe"}> : () -> ()
    %cst_25 = arith.constant dense<0.000000e+00> : vector<8x8x96xf32>
    %83 = tpu.matmul %81, %82, %cst_25 {dimension_numbers = #tpu.dot_dimension_numbers<[2], [1], [1], [2], [0, 0, 0, 1, 1, 2], [0], [0]>} : vector<8x8x128xbf16>, vector<8x128x96xbf16>, vector<8x8x96xf32> -> vector<8x8x96xf32>
    "tpu.trace_stop"() : () -> ()
    %84 = vector.shape_cast %83 : vector<8x8x96xf32> to vector<64x96xf32>
    %c0_26 = arith.constant 0 : index
    %c0_27 = arith.constant 0 : index
    %85 = vector.load %arg8[%c0_26, %c0_27] : memref<96x32xbf16, #tpu.memory_space<vmem>>, vector<96x32xbf16>
    %86 = arith.truncf %84 : vector<64x96xf32> to vector<64x96xbf16>
    %cst_28 = arith.constant dense<0.000000e+00> : vector<64x32xf32>
    %87 = tpu.matmul %86, %85, %cst_28 {dimension_numbers = #tpu.dot_dimension_numbers<[1], [0], [0], [1], [0, 0, 1, 1], [], []>} : vector<64x96xbf16>, vector<96x32xbf16>, vector<64x32xf32> -> vector<64x32xf32>
    %88 = vector.broadcast %6 : vector<1x32xf32> to vector<64x32xf32>
    %89 = arith.addf %87, %88 : vector<64x32xf32>
    %90 = arith.addf %9, %89 : vector<64x32xf32>
    %cst_29 = arith.constant dense<0.000000e+00> : vector<64xf32>
    %91 = vector.multi_reduction <add>, %90, %cst_29 [1] : vector<64x32xf32> to vector<64xf32>
    %92 = vector.shape_cast %91 : vector<64xf32> to vector<64x1xf32>
    %cst_30 = arith.constant 3.200000e+01 : f32
    %93 = vector.broadcast %cst_30 : f32 to vector<64x1xf32>
    %94 = arith.divf %92, %93 : vector<64x1xf32>
    %95 = vector.broadcast %94 : vector<64x1xf32> to vector<64x32xf32>
    %96 = arith.subf %90, %95 : vector<64x32xf32>
    %97 = arith.mulf %96, %96 : vector<64x32xf32>
    %cst_31 = arith.constant dense<0.000000e+00> : vector<64xf32>
    %98 = vector.multi_reduction <add>, %97, %cst_31 [1] : vector<64x32xf32> to vector<64xf32>
    %99 = vector.shape_cast %98 : vector<64xf32> to vector<64x1xf32>
    %cst_32 = arith.constant 3.200000e+01 : f32
    %100 = vector.broadcast %cst_32 : f32 to vector<64x1xf32>
    %101 = arith.divf %99, %100 : vector<64x1xf32>
    %102 = vector.broadcast %94 : vector<64x1xf32> to vector<64x32xf32>
    %103 = arith.subf %90, %102 : vector<64x32xf32>
    %cst_33 = arith.constant 9.99999974E-6 : f32
    %104 = vector.broadcast %cst_33 : f32 to vector<64x1xf32>
    %105 = arith.addf %101, %104 : vector<64x1xf32>
    %106 = math.rsqrt %105 : vector<64x1xf32>
    %107 = vector.broadcast %106 : vector<64x1xf32> to vector<64x32xf32>
    %108 = arith.mulf %103, %107 : vector<64x32xf32>
    %109 = vector.broadcast %3 : vector<1x32xf32> to vector<64x32xf32>
    %110 = arith.mulf %108, %109 : vector<64x32xf32>
    %111 = vector.broadcast %4 : vector<1x32xf32> to vector<64x32xf32>
    %112 = arith.addf %110, %111 : vector<64x32xf32>
    %c0_34 = arith.constant 0 : index
    %c0_35 = arith.constant 0 : index
    %113 = vector.load %arg9[%c0_34, %c0_35] : memref<32x64xbf16, #tpu.memory_space<vmem>>, vector<32x64xbf16>
    %114 = arith.truncf %112 : vector<64x32xf32> to vector<64x32xbf16>
    %cst_36 = arith.constant dense<0.000000e+00> : vector<64x64xf32>
    %115 = tpu.matmul %114, %113, %cst_36 {dimension_numbers = #tpu.dot_dimension_numbers<[1], [0], [0], [1], [0, 0, 1, 1], [], []>} : vector<64x32xbf16>, vector<32x64xbf16>, vector<64x64xf32> -> vector<64x64xf32>
    %116 = vector.broadcast %7 : vector<1x64xf32> to vector<64x64xf32>
    %117 = arith.addf %115, %116 : vector<64x64xf32>
    %cst_37 = arith.constant 0.000000e+00 : f32
    %118 = vector.broadcast %cst_37 : f32 to vector<64x64xf32>
    %119 = arith.maximumf %117, %118 : vector<64x64xf32>
    %c0_38 = arith.constant 0 : index
    %c0_39 = arith.constant 0 : index
    %120 = vector.load %arg10[%c0_38, %c0_39] : memref<64x32xbf16, #tpu.memory_space<vmem>>, vector<64x32xbf16>
    %121 = arith.truncf %119 : vector<64x64xf32> to vector<64x64xbf16>
    %cst_40 = arith.constant dense<0.000000e+00> : vector<64x32xf32>
    %122 = tpu.matmul %121, %120, %cst_40 {dimension_numbers = #tpu.dot_dimension_numbers<[1], [0], [0], [1], [0, 0, 1, 1], [], []>} : vector<64x64xbf16>, vector<64x32xbf16>, vector<64x32xf32> -> vector<64x32xf32>
    %123 = arith.addf %112, %122 : vector<64x32xf32>
    %124 = vector.broadcast %8 : vector<1x32xf32> to vector<64x32xf32>
    %125 = arith.addf %123, %124 : vector<64x32xf32>
    %126 = vector.shape_cast %125 : vector<64x32xf32> to vector<8x8x32xf32>
    %127 = vector.extract_strided_slice %126 {offsets = [0, 0, 0], sizes = [8, 1, 32], strides = [1, 1, 1]} : vector<8x8x32xf32> to vector<8x1x32xf32>
    %128 = vector.shape_cast %127 : vector<8x1x32xf32> to vector<8x32xf32>
    %129 = vector.extract_strided_slice %126 {offsets = [0, 1, 0], sizes = [8, 1, 32], strides = [1, 1, 1]} : vector<8x8x32xf32> to vector<8x1x32xf32>
    %130 = vector.shape_cast %129 : vector<8x1x32xf32> to vector<8x32xf32>
    %131 = vector.extract_strided_slice %126 {offsets = [0, 2, 0], sizes = [8, 1, 32], strides = [1, 1, 1]} : vector<8x8x32xf32> to vector<8x1x32xf32>
    %132 = vector.shape_cast %131 : vector<8x1x32xf32> to vector<8x32xf32>
    %133 = vector.extract_strided_slice %126 {offsets = [0, 3, 0], sizes = [8, 1, 32], strides = [1, 1, 1]} : vector<8x8x32xf32> to vector<8x1x32xf32>
    %134 = vector.shape_cast %133 : vector<8x1x32xf32> to vector<8x32xf32>
    %135 = vector.extract_strided_slice %126 {offsets = [0, 4, 0], sizes = [8, 1, 32], strides = [1, 1, 1]} : vector<8x8x32xf32> to vector<8x1x32xf32>
    %136 = vector.shape_cast %135 : vector<8x1x32xf32> to vector<8x32xf32>
    %137 = vector.extract_strided_slice %126 {offsets = [0, 5, 0], sizes = [8, 1, 32], strides = [1, 1, 1]} : vector<8x8x32xf32> to vector<8x1x32xf32>
    %138 = vector.shape_cast %137 : vector<8x1x32xf32> to vector<8x32xf32>
    %139 = vector.extract_strided_slice %126 {offsets = [0, 6, 0], sizes = [8, 1, 32], strides = [1, 1, 1]} : vector<8x8x32xf32> to vector<8x1x32xf32>
    %140 = vector.shape_cast %139 : vector<8x1x32xf32> to vector<8x32xf32>
    %141 = vector.extract_strided_slice %126 {offsets = [0, 7, 0], sizes = [8, 1, 32], strides = [1, 1, 1]} : vector<8x8x32xf32> to vector<8x1x32xf32>
    %142 = vector.shape_cast %141 : vector<8x1x32xf32> to vector<8x32xf32>
    %143 = tpu.concatenate %128, %130, %132, %134, %136, %138, %140, %142 in 1 : vector<8x32xf32>, vector<8x32xf32>, vector<8x32xf32>, vector<8x32xf32>, vector<8x32xf32>, vector<8x32xf32>, vector<8x32xf32>, vector<8x32xf32> -> vector<8x256xf32>
    %c0_41 = arith.constant 0 : index
    %c0_42 = arith.constant 0 : index
    %144 = vector.load %arg12[%c0_41, %c0_42] : memref<8x256xf32, #tpu.memory_space<vmem>>, vector<8x256xf32>
    tpu.vector_store %arg12[%c0_41, %c0_42], %143 {strides = array<i32>} : memref<8x256xf32, #tpu.memory_space<vmem>>, vector<8x256xf32>,
    return
  }
  func.func @transform_0(%arg0: i32) -> (i32, i32) {
    %c0_i32 = arith.constant 0 : i32
    %c0_i32_0 = arith.constant 0 : i32
    return %arg0, %c0_i32 : i32, i32
  }
  func.func @transform_1(%arg0: i32) -> (i32, i32) {
    %c0_i32 = arith.constant 0 : i32
    %c0_i32_0 = arith.constant 0 : i32
    return %arg0, %c0_i32 : i32, i32
  }
  func.func @transform_2(%arg0: i32) -> (i32, i32) {
    %c0_i32 = arith.constant 0 : i32
    %c0_i32_0 = arith.constant 0 : i32
    return %arg0, %c0_i32 : i32, i32
  }
  func.func @transform_3(%arg0: i32) -> (i32, i32) {
    %c0_i32 = arith.constant 0 : i32
    %c0_i32_0 = arith.constant 0 : i32
    %c0_i32_1 = arith.constant 0 : i32
    return %c0_i32, %c0_i32_0 : i32, i32
  }
  func.func @transform_4(%arg0: i32) -> (i32, i32) {
    %c0_i32 = arith.constant 0 : i32
    %c0_i32_0 = arith.constant 0 : i32
    %c0_i32_1 = arith.constant 0 : i32
    return %c0_i32, %c0_i32_0 : i32, i32
  }
  func.func @transform_5(%arg0: i32) -> (i32, i32) {
    %c0_i32 = arith.constant 0 : i32
    %c0_i32_0 = arith.constant 0 : i32
    %c0_i32_1 = arith.constant 0 : i32
    return %c0_i32, %c0_i32_0 : i32, i32
  }
  func.func @transform_6(%arg0: i32) -> (i32, i32) {
    %c0_i32 = arith.constant 0 : i32
    %c0_i32_0 = arith.constant 0 : i32
    %c0_i32_1 = arith.constant 0 : i32
    return %c0_i32, %c0_i32_0 : i32, i32
  }
  func.func @transform_7(%arg0: i32) -> (i32, i32) {
    %c0_i32 = arith.constant 0 : i32
    %c0_i32_0 = arith.constant 0 : i32
    %c0_i32_1 = arith.constant 0 : i32
    return %c0_i32, %c0_i32_0 : i32, i32
  }
  func.func @transform_8(%arg0: i32) -> (i32, i32) {
    %c0_i32 = arith.constant 0 : i32
    %c0_i32_0 = arith.constant 0 : i32
    %c0_i32_1 = arith.constant 0 : i32
    return %c0_i32, %c0_i32_0 : i32, i32
  }
  func.func @transform_9(%arg0: i32) -> (i32, i32) {
    %c0_i32 = arith.constant 0 : i32
    %c0_i32_0 = arith.constant 0 : i32
    %c0_i32_1 = arith.constant 0 : i32
    return %c0_i32, %c0_i32_0 : i32, i32
  }
  func.func @transform_10(%arg0: i32) -> (i32, i32) {
    %c0_i32 = arith.constant 0 : i32
    %c0_i32_0 = arith.constant 0 : i32
    %c0_i32_1 = arith.constant 0 : i32
    return %c0_i32, %c0_i32_0 : i32, i32
  }
  func.func @transform_11(%arg0: i32) -> (i32, i32) {
    %c0_i32 = arith.constant 0 : i32
    %c0_i32_0 = arith.constant 0 : i32
    return %arg0, %c0_i32 : i32, i32
  }
}

</mosaic_0001>

<bundles_post_ra>
// kernel: tpu_custom_call.1
= control target key start
LH: loop header
LB: loop body
LE: loop exit
PB: predicated region body
PF: predicated region fallthrough
CT: control target
= control target key end

     0   :  { %vm49_vm0 = vcmask 261120   ;;  %s5537_s0 = inlined_call_operand.vmem [shape: f32[64,32], index: 0, kind: input, shape index: {}]   ;;  %s5538_s1 = inlined_call_operand.vmem [shape: f32[128,59], index: 1, kind: input, shape index: {}]   ;;  %s5539_s2 = inlined_call_operand.vmem [shape: f32[8,128], index: 2, kind: input, shape index: {}]   ;;  %s5540_s3 = inlined_call_operand.vmem [shape: bf16[32,96], index: 3, kind: input, shape index: {}]   ;;  %s5541_s4 = inlined_call_operand.vmem [shape: bf16[59,256], index: 4, kind: input, shape index: {}]   ;;  %s5542_s5 = inlined_call_operand.vmem [shape: f32[128,96], index: 5, kind: input, shape index: {}]   ;;  %s5543_s6 = inlined_call_operand.vmem [shape: bf16[128,128], index: 6, kind: input, shape index: {}]   ;;  %s5544_s7 = inlined_call_operand.vmem [shape: bf16[96,32], index: 7, kind: input, shape index: {}]   ;;  %s5545_s8 = inlined_call_operand.vmem [shape: bf16[32,64], index: 8, kind: input, shape index: {}]   ;;  %s5546_s9 = inlined_call_operand.vmem [shape: bf16[64,32], index: 9, kind: input, shape index: {}]   ;;  %s5547_s10 = inlined_call_operand.vmem [shape: f32[8,96], index: 10, kind: input, shape index: {}]   ;;  %s5548_s11 = inlined_call_operand.hbm [shape: f32[8,256], index: 11, kind: output, shape index: {}]  }
   0x1   :  { %v41_v0 = vld [vmem:[%s5537_s0] sm:$0xff]  ;;  %v43_v1 = vld [vmem:[%s5537_s0 + $0x10] sm:$0xff]  ;;  %v42_v2 = vld [vmem:[%s5537_s0 + $0x8] sm:$0xff] }
   0x2   :  { %v50_v3 = vsel %vm49_vm0, %v41_v0, 0.0  ;;  %v56_v4 = vsel %vm49_vm0, %v43_v1, 0.0  ;;  %v44_v5 = vld [vmem:[%s5537_s0 + $0x18] sm:$0xff]  ;;  %v53_v6 = vsel %vm49_vm0, %v42_v2, 0.0 }
   0x3   :  { %51 = vadd.xlane.f32.xlu0 %v50_v3  ;;  %57 = vadd.xlane.f32.xlu1 %v56_v4  ;;  %v59_v7 = vsel %vm49_vm0, %v44_v5, 0.0 }
   0x7   :  { %54 = vadd.xlane.f32.xlu0 %v53_v6  ;;  %60 = vadd.xlane.f32.xlu1 %v59_v7 }
   0x8   :  { %16 = vsyncpa [#allocation3], 0  ;;  %v3401_v8 = vld [vmem:[%s5541_s4 + $0x34] ss:$8 sps:$4 sm:$0x3f]   ;;  %vm375_vm1 = vcmask 1044480  }
   0x9   :  { %vm376_vm2 = vcmask 1045504   ;;  %v3547_v9 = vmov 65535   ;;  %v3403_v11 = vld [vmem:[%s5541_s4 + $0x30] ss:$8 sps:$4 sm:$0x3f]   ;;  %v3548_v16 = vmov 0  }
   0xa   :  { %v377_v10 = vsel %vm375_vm1, 4294967295, %v3547_v9  ;;  %v3404_v15 = vld [vmem:[%s5541_s4 + $0x24] ss:$8 sps:$4 sm:$0xff]   ;;  %417 = vmatprep.mubr.bf16.mxu1 %v3548_v16  ;;  %v3406_v17 = vld [vmem:[%s5541_s4 + $0x20] ss:$8 sps:$4 sm:$0xff]   ;;  %vm350_vm3 = vcmask 482304  }
   0xb   :  { %v378_v12 = vsel %vm376_vm2, %v377_v10, 0  ;;  %v3407_v18 = vld [vmem:[%s5541_s4 + $0x14] ss:$8 sps:$4 sm:$0xff]   ;;  %v3409_v19 = vld [vmem:[%s5541_s4 + $0x10] ss:$8 sps:$4 sm:$0xff]   ;;  %v280_v22 = vld [vmem:[%s5538_s1] sm:$0xff] }
   0xc   :  { %v383_v13 = vand.u32 %v3401_v8, %v378_v12  ;;  %v380_v14 = vand.u32 %v3403_v11, %v378_v12  ;;  %v3410_v20 = vld [vmem:[%s5541_s4 + $0x4] ss:$8 sps:$4 sm:$0xff]   ;;  %v3412_v21 = vld [vmem:[%s5541_s4] ss:$8 sps:$4 sm:$0xff]   ;;  %v282_v25 = vld [vmem:[%s5538_s1 + $0x10] sm:$0xff]  ;;  %vm933_vm4 = vcmask 785408  }
   0xd   :  { %v281_v23 = vld [vmem:[%s5538_s1 + $0x8] sm:$0xff]  ;;  %v283_v26 = vld [vmem:[%s5538_s1 + $0x18] sm:$0xff]  ;;  %v3694_v46 = vld [vmem:[%s5537_s0 + $0x20] sm:$0xff]  ;;  %vm3550_vm5 = vmmov 0   ;;  %vm2473_vm6 = vcmask 523264   ;;  %vm2580_vm7 = vcmask 1041409  }
   0xe   :  { %393 = vmatprep.subr.bf16.mxu1 %v383_v13  ;;  %v304_v24 = vpack.c.bf16 %v281_v23, %v280_v22  ;;  %v305_v27 = vpack.c.bf16 %v283_v26, %v282_v25  ;;  %v62_v48 = vsel %vm49_vm0, %v3694_v46, 0.0  ;;  %v3703_v50 = vld [vmem:[%s5537_s0 + $0x30] sm:$0xff]  ;;  %v3708_v51 = vld [vmem:[%s5537_s0 + $0x28] sm:$0xff]  ;;  %v3717_v54 = vld [vmem:[%s5537_s0 + $0x38] sm:$0xff]  ;;  %vm2583_vm8 = vcmask 1042434   ;;  %s3553_s28 = smov 64  }
   0xf   :  { %394 = vmatpush1.bf16.msra.mxu1 %v380_v14  ;;  %v68_v52 = vsel %vm49_vm0, %v3703_v50, 0.0  ;;  %v65_v53 = vsel %vm49_vm0, %v3708_v51, 0.0  ;;  %v71_v55 = vsel %vm49_vm0, %v3717_v54, 0.0  ;;  %v3413_v56 = vld [vmem:[%s5540_s3 + $0x8] sm:$0xff]   ;;  %v284_v57 = vld [vmem:[%s5538_s1 + $0x20] sm:$0xff]  ;;  %v286_v61 = vld [vmem:[%s5538_s1 + $0x30] sm:$0xff] }
  0x10   :  { %395 = vmatprep.subr.bf16.mxu1 %v3404_v15  ;;  %v285_v58 = vld [vmem:[%s5538_s1 + $0x28] sm:$0xff]  ;;  %v3414_v60 = vld [vmem:[%s5540_s3] sm:$0xff]   ;;  %2988 = vmatprep.subr.bf16.mxu0 %v3413_v56  ;;  %v287_v62 = vld [vmem:[%s5538_s1 + $0x38] sm:$0xff]  ;;  %vm2586_vm9 = vcmask 1043459   ;;  %vm2589_vm10 = vcmask 1044484   ;;  %vm2592_vm11 = vcmask 1045509  }
  0x11   :  { %v306_v59 = vpack.c.bf16 %v285_v58, %v284_v57  ;;  %2989 = vmatpush3.bf16.msra.mxu0 %v3413_v56  ;;  %v307_v63 = vpack.c.bf16 %v287_v62, %v286_v61  ;;  %v290_v4 = vld [vmem:[%s5538_s1 + $0x50] sm:$0xff]  ;;  %v3783_v15 = vld [vmem:[%s5542_s5 + $0x78] sm:$0xff]  ;;  %vm2595_vm12 = vcmask 1046534   ;;  %vm2598_vm13 = vcmask 1047559   ;;  %s3555_s3 = smov [#allocation2]  }
  0x12   :  { %2990 = vmatprep.subr.bf16.mxu0 %v3414_v60  ;;  %v3776_v13 = vld [vmem:[%s5542_s5 + $0x70] sm:$0xff]  ;;  %s2732_s29 = sshll.u32 %s3555_s3, 4  ;;  %s2733_s29 = int_to_ptr.vmem [resolvable:$true] %s2732_s29 }
  0x13   :  { %396 = vmatpush1.bf16.msra.mxu1 %v3406_v17  ;;  %p3530_p1 = scmp.lt.s32.totalorder %s2733_s29, %s2733_s29 }
  0x14   :  { %397 = vmatprep.subr.bf16.mxu1 %v3407_v18 }
  0x15   :  { %2991 = vmatpush3.bf16.msra.mxu0 %v3414_v60  ;;  %v3827_v60 = vld [vmem:[%s5547_s10] sm:$0xff] }
  0x17   :  { %398 = vmatpush1.bf16.msra.mxu1 %v3409_v19  ;;  %v3792_v19 = vld [vmem:[%s5542_s5 + $0x60] sm:$0xff] }
  0x18   :  { %399 = vmatprep.subr.bf16.mxu1 %v3410_v20  ;;  %v3797_v20 = vld [vmem:[%s5542_s5 + $0x68] sm:$0xff] }
  0x1b   :  { %400 = vmatpush1.bf16.msra.mxu1 %v3412_v21 }
  0x1e   :  { %2754 = vmatmul.mubr.msk.bf16.vlgmr.msra.gmra.mxu1 %vm350_vm3, %v304_v24 }
  0x1f   :  { %427 = vmatprep.mubr.bf16.mxu1 %v3548_v16 }
  0x26   :  { %2755 = vmatmul.mubr.msk.bf16.gmra.mxu1 %vm350_vm3, %v305_v27 }
  0x27   :  { %437 = vmatprep.mubr.bf16.mxu1 %v3548_v16 }
  0x2e   :  { %2756 = vmatmul.mubr.msk.bf16.gmra.mxu1 %vm350_vm3, %v306_v59 }
  0x2f   :  { %447 = vmatprep.mubr.bf16.mxu1 %v3548_v16 }
  0x36   :  { %2757 = vmatmul.mubr.msk.bf16.gmra.mxu1 %vm350_vm3, %v307_v63 }
  0x37   :  { %457 = vmatprep.mubr.bf16.mxu1 %v3548_v16 }
  0x8c   :  { %v52_v28 = vpop.xlane.xlu0 %51  ;;  %v58_v29 = vpop.xlane.xlu1 %57 }
  0x8d   :  { %v75_v30 = vmul.f32 0.03125, %v52_v28  ;;  %v77_v31 = vmul.f32 0.03125, %v58_v29 }
  0x8f   :  { %v3673_v32 = vsub.f32 %v41_v0, %v75_v30  ;;  %v3675_v33 = vsub.f32 %v43_v1, %v77_v31  ;;  %v5549_v0 = vmov 0.0   ;;  %v288_v1 = vld [vmem:[%s5538_s1 + $0x40] sm:$0xff] }
  0x90   :  { %v55_v34 = vpop.xlane.xlu0 %54  ;;  %v61_v35 = vpop.xlane.xlu1 %60  ;;  %3000 = vmatprep.subr.bf16.mxu0 %v5549_v0  ;;  %3020 = vmatprep.subr.bf16.mxu1 %v5549_v0 }
  0x91   :  { %v76_v36 = vmul.f32 0.03125, %v55_v34  ;;  %v78_v37 = vmul.f32 0.03125, %v61_v35  ;;  %v91_v38 = vmul.f32 %v3673_v32, %v3673_v32  ;;  %v93_v39 = vmul.f32 %v3675_v33, %v3675_v33 }
  0x93   :  { %v3681_v40 = vsub.f32 %v42_v2, %v76_v36  ;;  %v3683_v41 = vsub.f32 %v44_v5, %v78_v37  ;;  %v99_v42 = vsel %vm49_vm0, %v91_v38, 0.0  ;;  %v105_v43 = vsel %vm49_vm0, %v93_v39, 0.0  ;;  %v289_v2 = vld [vmem:[%s5538_s1 + $0x48] sm:$0xff]  ;;  %v291_v5 = vld [vmem:[%s5538_s1 + $0x58] sm:$0xff] }
  0x94   :  { %100 = vadd.xlane.f32.xlu0 %v99_v42  ;;  %v308_v3 = vpack.c.bf16 %v289_v2, %v288_v1  ;;  %v309_v6 = vpack.c.bf16 %v291_v5, %v290_v4  ;;  %v155_v36 = vlaneseq }
  0x95   :  { %v92_v44 = vmul.f32 %v3681_v40, %v3681_v40  ;;  %v94_v45 = vmul.f32 %v3683_v41, %v3683_v41 }
  0x96   :  { %2758 = vmatmul.mubr.msk.bf16.gmra.mxu1 %vm350_vm3, %v308_v3 }
  0x97   :  { %v102_v47 = vsel %vm49_vm0, %v92_v44, 0.0  ;;  %v108_v49 = vsel %vm49_vm0, %v94_v45, 0.0  ;;  %467 = vmatprep.mubr.bf16.mxu1 %v3548_v16  ;;  %v3807_v45 = vshrl.u32 %v155_v36, 7 }
  0x98   :  { %106 = vadd.xlane.f32.xlu0 %v105_v43  ;;  %103 = vadd.xlane.f32.xlu1 %v102_v47 }
  0x99   :  { %5618 = vst [vmem:[#allocation5_spill] sm:$0xff] %v3807_v45  ;;  %v3815_v57 = vsub.s32 0, %v3807_v45  ;;  %v169_v2 = vsub.s32 1, %v3807_v45 }
  0x9c   :  { %63 = vadd.xlane.f32.xlu0 %v62_v48  ;;  %109 = vadd.xlane.f32.xlu1 %v108_v49 }
  0x9e   :  { %2759 = vmatmul.mubr.msk.bf16.gmra.mxu1 %vm350_vm3, %v309_v6 }
  0x9f   :  { %477 = vmatprep.mubr.bf16.mxu1 %v3548_v16 }
  0xa0   :  { %69 = vadd.xlane.f32.xlu0 %v68_v52  ;;  %66 = vadd.xlane.f32.xlu1 %v65_v53 }
  0xa4   :  { %72 = vadd.xlane.f32.xlu1 %v71_v55 }
  0xde   :  { %v3761_v7 = vpop.f32.mrf.mxu1 }
  0xe0   :  { %v3763_v8 = vpop.f32.mrf.mxu1 }
  0xe2   :  { %v3765_v9 = vpop.f32.mrf.mxu1 }
  0xe4   :  { %v3767_v10 = vpop.f32.mrf.mxu1 }
  0xe6   :  { %v3769_v11 = vpop.f32.mrf.mxu1 }
  0xe7   :  { %v544_v14 = vmul.f32 %v3776_v13, %v3769_v11  ;;  %v542_v22 = vmul.f32 %v3792_v19, %v3769_v11 }
  0xe8   :  { %v3771_v12 = vpop.f32.mrf.mxu1 }
  0xea   :  { %v3785_v17 = vpop.f32.mrf.mxu1 }
  0xeb   :  { %v545_v18 = vmul.f32 %v3783_v15, %v3785_v17  ;;  %v543_v23 = vmul.f32 %v3797_v20, %v3785_v17 }
  0xed   :  { %v793_v21 = vpack.c.bf16 %v545_v18, %v544_v14  ;;  %v792_v25 = vpack.c.bf16 %v543_v23, %v542_v22 }
  0xef   :  { %v1026_v24 = vsel %vm933_vm4, %v793_v21, 0  ;;  %v1023_v26 = vsel %vm933_vm4, %v792_v25, 0  ;;  %v3860_v25 = vld [vmem:[%s5542_s5 + $0x58] sm:$0xff] }
  0xf0   :  { %3021 = vmatpush3.bf16.xpose.msra.mxu1 %v1026_v24  ;;  %v3850_v24 = vrot.slane %v3827_v60, %v169_v2  ;;  %v3912_v2 = vld [vmem:[%s5542_s5 + $0x38] sm:$0xff] }
  0xf1   :  { %3022 = vmatprep.subr.bf16.mxu1 %v5549_v0 }
  0xf8   :  { %3023 = vmatpush3.bf16.xpose.msra.mxu1 %v1023_v26 }
  0xf9   :  { %3024 = vmatprep.subr.bf16.mxu1 %v5549_v0 }
 0x11d   :  { %v101_v27 = vpop.xlane.xlu0 %100 }
 0x11e   :  { %v123_v28 = vmul.f32 0.03125, %v101_v27  ;;  %v541_v27 = vmul.f32 %v3860_v25, %v3785_v17 }
 0x120   :  { %v131_v29 = vadd.f32 1e-05, %v123_v28 }
 0x121   :  { %v104_v30 = vpop.xlane.xlu1 %103  ;;  %v107_v31 = vpop.xlane.xlu0 %106 }
 0x122   :  { %3436 = vrsqrt.f32 %v131_v29  ;;  %v124_v34 = vmul.f32 0.03125, %v104_v30  ;;  %v125_v35 = vmul.f32 0.03125, %v107_v31  ;;  %v528_v29 = vmul.f32 %v3776_v13, %v3761_v7 }
 0x123   :  { %v529_v30 = vmul.f32 %v3783_v15, %v3765_v9 }
 0x124   :  { %v132_v37 = vadd.f32 1e-05, %v124_v34  ;;  %v133_v38 = vadd.f32 1e-05, %v125_v35 }
 0x125   :  { %v110_v39 = vpop.xlane.xlu1 %109  ;;  %v64_v42 = vpop.xlane.xlu0 %63 }
 0x126   :  { %3438 = vrsqrt.f32 %v132_v37  ;;  %v126_v43 = vmul.f32 0.03125, %v110_v39  ;;  %v79_v44 = vmul.f32 0.03125, %v64_v42 }
 0x127   :  { %3440 = vrsqrt.f32 %v133_v38 }
 0x128   :  { %v134_v47 = vadd.f32 1e-05, %v126_v43  ;;  %v3810_v48 = vsub.f32 %v3694_v46, %v79_v44  ;;  %v785_v43 = vpack.c.bf16 %v529_v30, %v528_v29  ;;  %v3881_v44 = vld [vmem:[%s5542_s5 + $0x40] sm:$0xff]  ;;  %v294_v30 = vld [vmem:[%s5538_s1 + $0x70] sm:$0xff] }
 0x129   :  { %v67_v49 = vpop.xlane.xlu1 %66  ;;  %v70_v52 = vpop.xlane.xlu0 %69 }
 0x12a   :  { %3442 = vrsqrt.f32 %v134_v47  ;;  %v80_v53 = vmul.f32 0.03125, %v67_v49  ;;  %v81_v55 = vmul.f32 0.03125, %v70_v52  ;;  %v95_v56 = vmul.f32 %v3810_v48, %v3810_v48  ;;  %v3890_v49 = vld [vmem:[%s5542_s5 + $0x48] sm:$0xff] }
 0x12b   :  { %v538_v52 = vmul.f32 %v3881_v44, %v3769_v11 }
 0x12c   :  { %v3818_v58 = vsub.f32 %v3708_v51, %v80_v53  ;;  %v3821_v59 = vsub.f32 %v3703_v50, %v81_v55  ;;  %v111_v46 = vsel %vm49_vm0, %v95_v56, 0.0  ;;  %v3835_v50 = vrot.slane %v3827_v60, %v3815_v57 }
 0x12d   :  { %v73_v61 = vpop.xlane.xlu1 %72  ;;  %112 = vadd.xlane.f32.xlu0 %v111_v46  ;;  %v539_v53 = vmul.f32 %v3890_v49, %v3785_v17  ;;  %v959_v56 = vsel %vm933_vm4, %v785_v43, 0  ;;  %v526_v46 = vmul.f32 %v3792_v19, %v3761_v7  ;;  %v3971_v43 = vld [vmem:[%s5542_s5 + $0x18] sm:$0xff] }
 0x12e   :  { %v82_v62 = vmul.f32 0.03125, %v73_v61  ;;  %v96_v63 = vmul.f32 %v3818_v58, %v3818_v58  ;;  %v97_v51 = vmul.f32 %v3821_v59, %v3821_v59  ;;  %v527_v61 = vmul.f32 %v3797_v20, %v3765_v9 }
 0x12f   :  { %v3437_v1 = vpop.eup %3436 }
 0x130   :  { %v3839_v3 = vsub.f32 %v3717_v54, %v82_v62  ;;  %v114_v4 = vsel %vm49_vm0, %v96_v63, 0.0  ;;  %v117_v5 = vsel %vm49_vm0, %v97_v51, 0.0  ;;  %v147_v6 = vmul.f32 %v3437_v1, %v3673_v32  ;;  %v3855_v32 = vld [vmem:[%s5542_s5 + $0x50] sm:$0xff] }
 0x131   :  { %115 = vadd.xlane.f32.xlu1 %v114_v4  ;;  %118 = vadd.xlane.f32.xlu0 %v117_v5  ;;  %v790_v62 = vpack.c.bf16 %v539_v53, %v538_v52  ;;  %v784_v51 = vpack.c.bf16 %v527_v61, %v526_v46  ;;  %v3907_v1 = vld [vmem:[%s5542_s5 + $0x30] sm:$0xff]  ;;  %v537_v5 = vmul.f32 %v3912_v2, %v3785_v17  ;;  %v3986_v46 = vld [vmem:[%s5542_s5] sm:$0xff]  ;;  %v3991_v61 = vld [vmem:[%s5542_s5 + $0x8] sm:$0xff] }
 0x132   :  { %v98_v14 = vmul.f32 %v3839_v3, %v3839_v3  ;;  %v159_v54 = vmul.f32 %v3835_v50, %v147_v6  ;;  %v536_v4 = vmul.f32 %v3907_v1, %v3769_v11  ;;  %v292_v6 = vld [vmem:[%s5538_s1 + $0x60] sm:$0xff]  ;;  %v520_v53 = vmul.f32 %v3907_v1, %v3761_v7 }
 0x133   :  { %v3439_v18 = vpop.eup %3438  ;;  %v1017_v63 = vsel %vm933_vm4, %v790_v62, 0 }
 0x134   :  { %v3441_v21 = vpop.eup %3440  ;;  %v120_v22 = vsel %vm49_vm0, %v98_v14, 0.0  ;;  %v148_v23 = vmul.f32 %v3439_v18, %v3681_v40  ;;  %v540_v40 = vmul.f32 %v3855_v32, %v3769_v11  ;;  %v171_v35 = vadd.f32 %v3850_v24, %v159_v54  ;;  %v293_v14 = vld [vmem:[%s5538_s1 + $0x68] sm:$0xff] }
 0x135   :  { %121 = vadd.xlane.f32.xlu1 %v120_v22  ;;  %v149_v26 = vmul.f32 %v3441_v21, %v3675_v33  ;;  %v789_v18 = vpack.c.bf16 %v537_v5, %v536_v4  ;;  %v310_v21 = vpack.c.bf16 %v293_v14, %v292_v6  ;;  %v956_v22 = vsel %vm933_vm4, %v784_v51, 0 }
 0x136   :  { %v160_v28 = vmul.f32 %v3835_v50, %v148_v23  ;;  %v791_v34 = vpack.c.bf16 %v541_v27, %v540_v40  ;;  %v524_v23 = vmul.f32 %v3855_v32, %v3761_v7  ;;  %v525_v54 = vmul.f32 %v3860_v25, %v3765_v9  ;;  %v3938_v40 = vld [vmem:[%s5542_s5 + $0x28] sm:$0xff] }
 0x137   :  { %v3443_v31 = vpop.eup %3442  ;;  %v161_v37 = vmul.f32 %v3835_v50, %v149_v26  ;;  %v3933_v26 = vld [vmem:[%s5542_s5 + $0x20] sm:$0xff]  ;;  %v1014_v27 = vsel %vm933_vm4, %v789_v18, 0  ;;  %2760 = vmatmul.mubr.msk.bf16.gmra.mxu1 %vm350_vm3, %v310_v21  ;;  %v535_v29 = vmul.f32 %v3938_v40, %v3785_v17  ;;  %v531_v51 = vmul.f32 %v3991_v61, %v3785_v17 }
 0x138   :  { %v172_v33 = vadd.f32 %v3850_v24, %v160_v28  ;;  %v150_v36 = vmul.f32 %v3443_v31, %v3683_v41  ;;  %v1020_v38 = vsel %vm933_vm4, %v791_v34, 0  ;;  %v534_v28 = vmul.f32 %v3933_v26, %v3769_v11  ;;  %487 = vmatprep.mubr.bf16.mxu1 %v3548_v16  ;;  %v295_v31 = vld [vmem:[%s5538_s1 + $0x78] sm:$0xff]  ;;  %s3554_s1 = smov 96  }
 0x139   :  { %3025 = vmatpush3.bf16.xpose.msra.mxu1 %v1020_v38  ;;  %v173_v41 = vadd.f32 %v3850_v24, %v161_v37  ;;  %v783_v34 = vpack.c.bf16 %v525_v54, %v524_v23  ;;  %v522_v16 = vmul.f32 %v3881_v44, %v3761_v7  ;;  %v523_v37 = vmul.f32 %v3890_v49, %v3765_v9 }
 0x13a   :  { %v183_v39 = vpack.c.bf16 %v172_v33, %v171_v35  ;;  %v162_v42 = vmul.f32 %v3835_v50, %v150_v36  ;;  %3026 = vmatprep.subr.bf16.mxu1 %v5549_v0  ;;  %v788_v35 = vpack.c.bf16 %v535_v29, %v534_v28  ;;  %v311_v33 = vpack.c.bf16 %v295_v31, %v294_v30 }
 0x13b   :  { %v953_v36 = vsel %vm933_vm4, %v783_v34, 0  ;;  %v518_v14 = vmul.f32 %v3933_v26, %v3761_v7  ;;  %v519_v18 = vmul.f32 %v3938_v40, %v3765_v9  ;;  %v517_v23 = vmul.f32 %v3971_v43, %v3765_v9  ;;  %v4022_v34 = vpop.f32.mrf.mxu1 }
 0x13c   :  { %2992 = vmatprep.mubr.msk.bf16.mxu0 %vm49_vm0, %v183_v39  ;;  %v174_v47 = vadd.f32 %v3850_v24, %v162_v42  ;;  %v1011_v38 = vsel %vm933_vm4, %v788_v35, 0  ;;  %v782_v39 = vpack.c.bf16 %v523_v37, %v522_v16  ;;  %v3966_v42 = vld [vmem:[%s5542_s5 + $0x10] sm:$0xff]  ;;  %v514_v28 = vmul.f32 %v3986_v46, %v3761_v7 }
 0x13d   :  { %v515_v29 = vmul.f32 %v3991_v61, %v3765_v9  ;;  %v4024_v35 = vpop.f32.mrf.mxu1 }
 0x13e   :  { %v184_v55 = vpack.c.bf16 %v174_v47, %v173_v41  ;;  %v532_v41 = vmul.f32 %v3966_v42, %v3769_v11  ;;  %v533_v47 = vmul.f32 %v3971_v43, %v3785_v17  ;;  %v950_v52 = vsel %vm933_vm4, %v782_v39, 0 }
 0x13f   :  { %2761 = vmatmul.mubr.msk.bf16.gmra.mxu1 %vm350_vm3, %v311_v33  ;;  %v780_v17 = vpack.c.bf16 %v519_v18, %v518_v14  ;;  %v778_v30 = vpack.c.bf16 %v515_v29, %v514_v28  ;;  %v441_v33 = vpop.f32.mrf.mxu1 }
 0x140   :  { %2993 = vmatmul.mubr.msk.bf16.vlgmr.msra.gmra.mxu0 %vm49_vm0, %v184_v55  ;;  %v521_v55 = vmul.f32 %v3912_v2, %v3765_v9  ;;  %3036 = vmatprep.mubr.msk.bf16.mxu1 %vm3550_vm5, %v5549_v0  ;;  %v4033_v37 = vmul.f32 %v3776_v13, %v441_v33  ;;  %v4073_v18 = vmul.f32 %v3881_v44, %v441_v33 }
 0x141   :  { %3001 = vmatpush3.bf16.xpose.msra.mxu0 %v959_v56  ;;  %3027 = vmatpush3.bf16.xpose.msra.mxu1 %v1017_v63  ;;  %v787_v56 = vpack.c.bf16 %v533_v47, %v532_v41  ;;  %v530_v63 = vmul.f32 %v3986_v46, %v3769_v11  ;;  %v944_v21 = vsel %vm933_vm4, %v780_v17, 0  ;;  %v938_v31 = vsel %vm933_vm4, %v778_v30, 0 }
 0x142   :  { %3002 = vmatprep.subr.bf16.mxu0 %v5549_v0  ;;  %3028 = vmatprep.subr.bf16.mxu1 %v5549_v0  ;;  %v781_v4 = vpack.c.bf16 %v521_v55, %v520_v53  ;;  %v4043_v47 = vmul.f32 %v3792_v19, %v441_v33  ;;  %v4049_v55 = vmul.f32 %v3855_v32, %v441_v33 }
 0x143   :  { %v1008_v62 = vsel %vm933_vm4, %v787_v56, 0  ;;  %v786_v5 = vpack.c.bf16 %v531_v51, %v530_v63  ;;  %5619 = vst [vmem:[#allocation6_spill] sm:$0xff] %v4073_v18  ;;  %v4135_v29 = vmul.f32 %v3986_v46, %v441_v33 }
 0x144   :  { %v947_v6 = vsel %vm933_vm4, %v781_v4, 0 }
 0x145   :  { %v1005_v11 = vsel %vm933_vm4, %v786_v5, 0  ;;  %5634 = vst [vmem:[#allocation21_spill] sm:$0xff] %v4135_v29 }
 0x149   :  { %3003 = vmatpush3.bf16.xpose.msra.mxu0 %v956_v22  ;;  %3029 = vmatpush3.bf16.xpose.msra.mxu1 %v1014_v27  ;;  %v516_v22 = vmul.f32 %v3966_v42, %v3761_v7  ;;  %v4028_v7 = vpop.f32.mrf.mxu1 }
 0x14a   :  { %3004 = vmatprep.subr.bf16.mxu0 %v5549_v0  ;;  %3030 = vmatprep.subr.bf16.mxu1 %v5549_v0 }
 0x14b   :  { %v779_v54 = vpack.c.bf16 %v517_v23, %v516_v22  ;;  %v445_v9 = vpop.f32.mrf.mxu1  ;;  %v4087_v23 = vmul.f32 %v3907_v1, %v441_v33 }
 0x14c   :  { %v4052_v56 = vmul.f32 %v3860_v25, %v445_v9  ;;  %v4108_v4 = vmul.f32 %v3938_v40, %v445_v9  ;;  %v4122_v41 = vmul.f32 %v3971_v43, %v445_v9 }
 0x14d   :  { %v941_v27 = vsel %vm933_vm4, %v779_v54, 0  ;;  %5622 = vst [vmem:[#allocation9_spill] sm:$0xff] %v4087_v23  ;;  %v4090_v54 = vmul.f32 %v3912_v2, %v445_v9 }
 0x14e   :  { %5627 = vst [vmem:[#allocation14_spill] sm:$0xff] %v4108_v4  ;;  %5631 = vst [vmem:[#allocation18_spill] sm:$0xff] %v4122_v41 }
 0x14f   :  { %5623 = vst [vmem:[#allocation10_spill] sm:$0xff] %v4090_v54 }
 0x151   :  { %3005 = vmatpush3.bf16.xpose.msra.mxu0 %v953_v36  ;;  %3031 = vmatpush3.bf16.xpose.msra.mxu1 %v1011_v38  ;;  %v4030_v36 = vpop.f32.mrf.mxu1  ;;  %v4036_v38 = vmul.f32 %v3783_v15, %v445_v9 }
 0x152   :  { %3006 = vmatprep.subr.bf16.mxu0 %v5549_v0  ;;  %3032 = vmatprep.subr.bf16.mxu1 %v5549_v0 }
 0x153   :  { %v451_v16 = vpop.f32.mrf.mxu1 }
 0x154   :  { %v4057_v63 = vmul.f32 %v3776_v13, %v451_v16  ;;  %v4079_v17 = vmul.f32 %v3855_v32, %v451_v16  ;;  %v4111_v5 = vmul.f32 %v3907_v1, %v451_v16  ;;  %v4125_v22 = vmul.f32 %v3933_v26, %v451_v16 }
 0x155   :  { %v4038_v39 = vpop.f32.mrf.mxu1 }
 0x156   :  { %5620 = vst [vmem:[#allocation7_spill] sm:$0xff] %v4079_v17  ;;  %5628 = vst [vmem:[#allocation15_spill] sm:$0xff] %v4111_v5  ;;  %v4143_v17 = vmul.f32 %v3966_v42, %v451_v16  ;;  %v4151_v5 = vmul.f32 %v3986_v46, %v451_v16  ;;  %v567_v29 = vmul.f32 %v3938_v40, %v4038_v39 }
 0x157   :  { %v455_v53 = vpop.f32.mrf.mxu1  ;;  %5632 = vst [vmem:[#allocation19_spill] sm:$0xff] %v4125_v22 }
 0x158   :  { %v4060_v51 = vmul.f32 %v3783_v15, %v455_v53  ;;  %v4070_v14 = vmul.f32 %v3797_v20, %v455_v53  ;;  %v4100_v30 = vmul.f32 %v3890_v49, %v455_v53  ;;  %v4114_v28 = vmul.f32 %v3912_v2, %v455_v53  ;;  %5635 = vst [vmem:[#allocation22_spill] sm:$0xff] %v4143_v17 }
 0x159   :  { %3007 = vmatpush3.bf16.xpose.msra.mxu0 %v950_v52  ;;  %3033 = vmatpush3.bf16.xpose.msra.mxu1 %v1008_v62  ;;  %v4046_v52 = vmul.f32 %v3797_v20, %v445_v9  ;;  %v4119_v62 = vmul.f32 %v3966_v42, %v441_v33  ;;  %v4132_v54 = vmul.f32 %v3938_v40, %v455_v53 }
 0x15a   :  { %3008 = vmatprep.subr.bf16.mxu0 %v5549_v0  ;;  %3034 = vmatprep.subr.bf16.mxu1 %v5549_v0  ;;  %5625 = vst [vmem:[#allocation12_spill] sm:$0xff] %v4100_v30  ;;  %5629 = vst [vmem:[#allocation16_spill] sm:$0xff] %v4114_v28  ;;  %v4140_v30 = vmul.f32 %v3991_v61, %v445_v9 }
 0x15b   :  { %5630 = vst [vmem:[#allocation17_spill] sm:$0xff] %v4119_v62  ;;  %5633 = vst [vmem:[#allocation20_spill] sm:$0xff] %v4132_v54 }
 0x15c   :  { %5637 = vst [vmem:[#allocation24_spill] sm:$0xff] %v4151_v5 }
 0x161   :  { %3009 = vmatpush3.bf16.xpose.msra.mxu0 %v947_v6  ;;  %3035 = vmatpush3.bf16.xpose.msra.mxu1 %v1005_v11  ;;  %v4067_v6 = vmul.f32 %v3792_v19, %v451_v16  ;;  %v4076_v11 = vmul.f32 %v3890_v49, %v445_v9  ;;  %v4162_v9 = vpop.f32.mrf.mxu1 }
 0x162   :  { %3010 = vmatprep.subr.bf16.mxu0 %v5549_v0  ;;  %3060 = vmatprep.subr.bf16.mxu1 %v5549_v0 }
 0x163   :  { %v4164_v62 = vpop.f32.mrf.mxu1 }
 0x165   :  { %v4167_v5 = vpop.f32.mrf.mxu1 }
 0x169   :  { %3011 = vmatpush3.bf16.xpose.msra.mxu0 %v944_v21  ;;  %v4082_v21 = vmul.f32 %v3860_v25, %v455_v53 }
 0x16a   :  { %3012 = vmatprep.subr.bf16.mxu0 %v5549_v0 }
 0x16b   :  { %5621 = vst [vmem:[#allocation8_spill] sm:$0xff] %v4082_v21 }
 0x171   :  { %3013 = vmatpush3.bf16.xpose.msra.mxu0 %v941_v27  ;;  %v4093_v27 = vmul.f32 %v3881_v44, %v451_v16 }
 0x172   :  { %3014 = vmatprep.subr.bf16.mxu0 %v5549_v0 }
 0x173   :  { %5624 = vst [vmem:[#allocation11_spill] sm:$0xff] %v4093_v27 }
 0x179   :  { %3015 = vmatpush3.bf16.xpose.msra.mxu0 %v938_v31  ;;  %v4103_v31 = vmul.f32 %v3933_v26, %v441_v33  ;;  %v4154_v33 = vmul.f32 %v3991_v61, %v455_v53 }
 0x17a   :  { %3040 = vmatprep.subr.bf16.mxu0 %v5549_v0  ;;  %v4146_v0 = vmul.f32 %v3971_v43, %v455_v53 }
 0x17b   :  { %5626 = vst [vmem:[#allocation13_spill] sm:$0xff] %v4103_v31  ;;  %5638 = vst [vmem:[#allocation25_spill] sm:$0xff] %v4154_v33 }
 0x17c   :  { %5636 = vst [vmem:[#allocation23_spill] sm:$0xff] %v4146_v0 }
 0x1b6   :  { %v113_v41 = vpop.xlane.xlu0 %112 }
 0x1b7   :  { %v127_v28 = vmul.f32 0.03125, %v113_v41 }
 0x1b9   :  { %v135_v31 = vadd.f32 1e-05, %v127_v28 }
 0x1ba   :  { %v116_v4 = vpop.xlane.xlu1 %115  ;;  %v119_v23 = vpop.xlane.xlu0 %118 }
 0x1bb   :  { %3444 = vrsqrt.f32 %v135_v31  ;;  %v128_v16 = vmul.f32 0.03125, %v116_v4  ;;  %v129_v22 = vmul.f32 0.03125, %v119_v23 }
 0x1bd   :  { %v136_v54 = vadd.f32 1e-05, %v128_v16  ;;  %v137_v53 = vadd.f32 1e-05, %v129_v22 }
 0x1be   :  { %v122_v21 = vpop.xlane.xlu1 %121 }
 0x1bf   :  { %3446 = vrsqrt.f32 %v136_v54  ;;  %v130_v18 = vmul.f32 0.03125, %v122_v21 }
 0x1c0   :  { %3448 = vrsqrt.f32 %v137_v53 }
 0x1c1   :  { %v138_v27 = vadd.f32 1e-05, %v130_v18 }
 0x1c3   :  { %3450 = vrsqrt.f32 %v138_v27  ;;  %v465_v27 = vpop.f32.mrf.mxu1 }
 0x1c8   :  { %v3445_v17 = vpop.eup %3444 }
 0x1c9   :  { %v151_v41 = vmul.f32 %v3445_v17, %v3810_v48 }
 0x1cb   :  { %v163_v22 = vmul.f32 %v3835_v50, %v151_v41 }
 0x1cc   :  { %v3447_v28 = vpop.eup %3446 }
 0x1cd   :  { %v3449_v4 = vpop.eup %3448  ;;  %v152_v23 = vmul.f32 %v3447_v28, %v3818_v58  ;;  %v175_v31 = vadd.f32 %v3850_v24, %v163_v22  ;;  %v4178_v58 = vpop.f32.mrf.mxu1 }
 0x1ce   :  { %v153_v21 = vmul.f32 %v3449_v4, %v3821_v59 }
 0x1cf   :  { %v164_v18 = vmul.f32 %v3835_v50, %v152_v23  ;;  %v471_v4 = vpop.f32.mrf.mxu1  ;;  %v5639_v23 = vmov 0.0  }
 0x1d0   :  { %v3451_v54 = vpop.eup %3450  ;;  %v165_v17 = vmul.f32 %v3835_v50, %v153_v21  ;;  %v4197_v21 = vmul.f32 %v3792_v19, %v4164_v62 }
 0x1d1   :  { %v176_v16 = vadd.f32 %v3850_v24, %v164_v18  ;;  %v154_v48 = vmul.f32 %v3451_v54, %v3839_v3  ;;  %v4188_v3 = vmul.f32 %v3776_v13, %v4164_v62  ;;  %v4193_v22 = vpop.f32.mrf.mxu1  ;;  %v4232_v54 = vmul.f32 %v3890_v49, %v465_v27 }
 0x1d2   :  { %v177_v59 = vadd.f32 %v3850_v24, %v165_v17  ;;  %5642 = vst [vmem:[#allocation28_spill] sm:$0xff] %v4197_v21  ;;  %v4217_v17 = vmul.f32 %v3860_v25, %v465_v27  ;;  %v4254_v18 = vmul.f32 %v3881_v44, %v471_v4  ;;  %v4278_v21 = vmul.f32 %v3966_v42, %v4164_v62 }
 0x1d3   :  { %v185_v53 = vpack.c.bf16 %v176_v16, %v175_v31  ;;  %v166_v33 = vmul.f32 %v3835_v50, %v154_v48  ;;  %5640 = vst [vmem:[#allocation26_spill] sm:$0xff] %v4188_v3  ;;  %v4191_v50 = vmul.f32 %v3783_v15, %v465_v27  ;;  %v4207_v31 = vmul.f32 %v3776_v13, %v471_v4 }
 0x1d4   :  { %v4214_v48 = vmul.f32 %v3855_v32, %v4164_v62  ;;  %5647 = vst [vmem:[#allocation33_spill] sm:$0xff] %v4217_v17  ;;  %5651 = vst [vmem:[#allocation37_spill] sm:$0xff] %v4232_v54  ;;  %v4271_v54 = vmul.f32 %v3907_v1, %v471_v4  ;;  %v4285_v17 = vmul.f32 %v3971_v43, %v465_v27 }
 0x1d5   :  { %2996 = vmatprep.mubr.msk.bf16.mxu0 %vm49_vm0, %v185_v53  ;;  %v178_v41 = vadd.f32 %v3850_v24, %v166_v33  ;;  %5641 = vst [vmem:[#allocation27_spill] sm:$0xff] %v4191_v50  ;;  %v4200_v24 = vmul.f32 %v3797_v20, %v465_v27  ;;  %v475_v33 = vpop.f32.mrf.mxu1  ;;  %5644 = vst [vmem:[#allocation30_spill] sm:$0xff] %v4207_v31  ;;  %v4220_v53 = vmul.f32 %v3792_v19, %v471_v4 }
 0x1d6   :  { %v4210_v16 = vmul.f32 %v3783_v15, %v475_v33  ;;  %5646 = vst [vmem:[#allocation32_spill] sm:$0xff] %v4214_v48  ;;  %v4242_v3 = vmul.f32 %v3860_v25, %v475_v33  ;;  %v4248_v31 = vmul.f32 %v3907_v1, %v4164_v62  ;;  %5656 = vst [vmem:[#allocation42_spill] sm:$0xff] %v4254_v18 }
 0x1d7   :  { %v186_v28 = vpack.c.bf16 %v178_v41, %v177_v59  ;;  %5643 = vst [vmem:[#allocation29_spill] sm:$0xff] %v4200_v24  ;;  %5648 = vst [vmem:[#allocation34_spill] sm:$0xff] %v4220_v53  ;;  %v4223_v59 = vmul.f32 %v3797_v20, %v475_v33  ;;  %v4239_v24 = vmul.f32 %v3855_v32, %v471_v4 }
 0x1d8   :  { %5645 = vst [vmem:[#allocation31_spill] sm:$0xff] %v4210_v16  ;;  %5653 = vst [vmem:[#allocation39_spill] sm:$0xff] %v4242_v3  ;;  %v4251_v16 = vmul.f32 %v3912_v2, %v465_v27  ;;  %v4259_v53 = vmul.f32 %v3890_v49, %v475_v33  ;;  %v4266_v41 = vmul.f32 %v3938_v40, %v465_v27 }
 0x1d9   :  { %2997 = vmatmul.mubr.msk.bf16.gmra.mxu0 %vm49_vm0, %v186_v28  ;;  %5649 = vst [vmem:[#allocation35_spill] sm:$0xff] %v4223_v59  ;;  %v4229_v28 = vmul.f32 %v3881_v44, %v4164_v62  ;;  %5652 = vst [vmem:[#allocation38_spill] sm:$0xff] %v4239_v24  ;;  %v4263_v59 = vmul.f32 %v3933_v26, %v4164_v62  ;;  %v4274_v48 = vmul.f32 %v3912_v2, %v475_v33 }
 0x1da   :  { %3016 = vmatprep.mubr.msk.bf16.mxu0 %vm3550_vm5, %v5639_v23  ;;  %5654 = vst [vmem:[#allocation40_spill] sm:$0xff] %v4248_v31  ;;  %5655 = vst [vmem:[#allocation41_spill] sm:$0xff] %v4251_v16  ;;  %v4293_v16 = vmul.f32 %v3938_v40, %v475_v33  ;;  %v4297_v50 = vmul.f32 %v3986_v46, %v4164_v62  ;;  %v4300_v24 = vmul.f32 %v3991_v61, %v465_v27 }
 0x1db   :  { %5650 = vst [vmem:[#allocation36_spill] sm:$0xff] %v4229_v28  ;;  %5657 = vst [vmem:[#allocation43_spill] sm:$0xff] %v4259_v53  ;;  %v4288_v28 = vmul.f32 %v3933_v26, %v471_v4  ;;  %v4311_v31 = vmul.f32 %v3986_v46, %v471_v4  ;;  %v4318_v27 = vmul.f32 %v3991_v61, %v475_v33 }
 0x1dc   :  { %5658 = vst [vmem:[#allocation44_spill] sm:$0xff] %v4263_v59  ;;  %5659 = vst [vmem:[#allocation45_spill] sm:$0xff] %v4266_v41  ;;  %v4305_v59 = vmul.f32 %v3966_v42, %v471_v4  ;;  %v4308_v41 = vmul.f32 %v3971_v43, %v475_v33  ;;  %v560_v4 = vmul.f32 %v3776_v13, %v4024_v35 }
 0x1dd   :  { %5660 = vst [vmem:[#allocation46_spill] sm:$0xff] %v4271_v54  ;;  %5661 = vst [vmem:[#allocation47_spill] sm:$0xff] %v4274_v48  ;;  %v561_v54 = vmul.f32 %v3783_v15, %v4028_v7  ;;  %v576_v33 = vmul.f32 %v3776_v13, %v4030_v36  ;;  %v577_v62 = vmul.f32 %v3783_v15, %v4038_v39 }
 0x1de   :  { %5662 = vst [vmem:[#allocation48_spill] sm:$0xff] %v4278_v21  ;;  %5663 = vst [vmem:[#allocation49_spill] sm:$0xff] %v4285_v17  ;;  %v189_v17 = vsub.s32 4, %v3807_v45  ;;  %v559_v48 = vmul.f32 %v3797_v20, %v4028_v7  ;;  %v568_v53 = vmul.f32 %v3907_v1, %v4030_v36 }
 0x1df   :  { %5664 = vst [vmem:[#allocation50_spill] sm:$0xff] %v4288_v28  ;;  %5665 = vst [vmem:[#allocation51_spill] sm:$0xff] %v4293_v16  ;;  %v801_v21 = vpack.c.bf16 %v561_v54, %v560_v4  ;;  %v558_v16 = vmul.f32 %v3792_v19, %v4024_v35  ;;  %v572_v4 = vmul.f32 %v3855_v32, %v4030_v36 }
 0x1e0   :  { %5666 = vst [vmem:[#allocation52_spill] sm:$0xff] %v4297_v50  ;;  %5667 = vst [vmem:[#allocation53_spill] sm:$0xff] %v4300_v24  ;;  %v4336_v3 = vrot.slane %v3827_v60, %v189_v17  ;;  %v574_v17 = vmul.f32 %v3792_v19, %v4030_v36 }
 0x1e1   :  { %5668 = vst [vmem:[#allocation54_spill] sm:$0xff] %v4305_v59  ;;  %5669 = vst [vmem:[#allocation55_spill] sm:$0xff] %v4308_v41  ;;  %v809_v41 = vpack.c.bf16 %v577_v62, %v576_v33  ;;  %v1093_v24 = vsel %vm933_vm4, %v801_v21, 0  ;;  %v800_v21 = vpack.c.bf16 %v559_v48, %v558_v16  ;;  %v575_v62 = vmul.f32 %v3797_v20, %v4038_v39 }
 0x1e2   :  { %5670 = vst [vmem:[#allocation56_spill] sm:$0xff] %v4311_v31  ;;  %5671 = vst [vmem:[#allocation57_spill] sm:$0xff] %v4318_v27  ;;  %v557_v16 = vmul.f32 %v3860_v25, %v4028_v7  ;;  %v573_v33 = vmul.f32 %v3860_v25, %v4038_v39 }
 0x1e3   :  { %v1160_v54 = vsel %vm933_vm4, %v809_v41, 0 }
 0x1f7   :  { %v4365_v48 = vpop.f32.mrf.mxu1 }
 0x200   :  { %v4329_v28 = vpop.f32.mrf.mxu0 }
 0x202   :  { %v249_v31 = vpop.f32.mrf.mxu0 }
 0x203   :  { %v250_v27 = vadd.f32 %v249_v31, %v4336_v3 }
 0x204   :  { %v4339_v59 = vpop.f32.mrf.mxu0 }
 0x205   :  { %v770_v50 = vpack.c.bf16 %v250_v27, %v250_v27 }
 0x206   :  { %v252_v18 = vpop.f32.mrf.mxu0 }
 0x207   :  { %v253_v60 = vadd.f32 %v252_v18, %v4336_v3  ;;  %3017 = vmatmul.mubr.msk.bf16.vlgmr.msra.gmra.mxu0 %vm933_vm4, %v770_v50  ;;  %v1090_v50 = vsel %vm933_vm4, %v800_v21, 0  ;;  %v556_v18 = vmul.f32 %v3855_v32, %v4024_v35  ;;  %v554_v21 = vmul.f32 %v3881_v44, %v4024_v35 }
 0x208   :  { %3041 = vmatpush3.bf16.xpose.msra.mxu0 %v1093_v24  ;;  %3056 = vmatprep.mubr.msk.bf16.mxu0 %vm3550_vm5, %v5639_v23  ;;  %v808_v24 = vpack.c.bf16 %v575_v62, %v574_v17  ;;  %v555_v17 = vmul.f32 %v3890_v49, %v4028_v7 }
 0x209   :  { %v771_v31 = vpack.c.bf16 %v253_v60, %v253_v60  ;;  %3042 = vmatprep.subr.bf16.mxu0 %v5639_v23  ;;  %v799_v27 = vpack.c.bf16 %v557_v16, %v556_v18  ;;  %v481_v60 = vpop.f32.mrf.mxu1  ;;  %v570_v18 = vmul.f32 %v3881_v44, %v4030_v36  ;;  %v571_v16 = vmul.f32 %v3890_v49, %v4038_v39 }
 0x20a   :  { %v1157_v41 = vsel %vm933_vm4, %v808_v24, 0  ;;  %v798_v24 = vpack.c.bf16 %v555_v17, %v554_v21  ;;  %v4401_v17 = vmul.f32 %v3792_v19, %v481_v60 }
 0x20b   :  { %3037 = vmatmul.mubr.msk.bf16.vlgmr.msra.gmra.mxu1 %vm933_vm4, %v771_v31  ;;  %v807_v31 = vpack.c.bf16 %v573_v33, %v572_v4  ;;  %v4379_v62 = vpop.f32.mrf.mxu1  ;;  %v553_v4 = vmul.f32 %v3912_v2, %v4028_v7 }
 0x20c   :  { %3061 = vmatpush3.bf16.xpose.msra.mxu1 %v1160_v54  ;;  %3076 = vmatprep.mubr.msk.bf16.mxu1 %vm3550_vm5, %v5639_v23  ;;  %v1087_v54 = vsel %vm933_vm4, %v799_v27, 0  ;;  %v552_v27 = vmul.f32 %v3907_v1, %v4024_v35  ;;  %v1084_v33 = vsel %vm933_vm4, %v798_v24, 0  ;;  %5674 = vst [vmem:[#allocation60_spill] sm:$0xff] %v4401_v17  ;;  %v569_v24 = vmul.f32 %v3912_v2, %v4038_v39 }
 0x20d   :  { %3062 = vmatprep.subr.bf16.mxu1 %v5639_v23 }
 0x210   :  { %3043 = vmatpush3.bf16.xpose.msra.mxu0 %v1090_v50  ;;  %v1154_v50 = vsel %vm933_vm4, %v807_v31, 0  ;;  %v4394_v31 = vmul.f32 %v3776_v13, %v481_v60 }
 0x211   :  { %3044 = vmatprep.subr.bf16.mxu0 %v5639_v23 }
 0x212   :  { %5672 = vst [vmem:[#allocation58_spill] sm:$0xff] %v4394_v31  ;;  %v551_v31 = vmul.f32 %v3938_v40, %v4028_v7 }
 0x214   :  { %3063 = vmatpush3.bf16.xpose.msra.mxu1 %v1157_v41  ;;  %v485_v41 = vpop.f32.mrf.mxu1 }
 0x215   :  { %3064 = vmatprep.subr.bf16.mxu1 %v5639_v23  ;;  %v4397_v21 = vmul.f32 %v3783_v15, %v485_v41  ;;  %v4433_v17 = vmul.f32 %v3890_v49, %v485_v41 }
 0x217   :  { %5673 = vst [vmem:[#allocation59_spill] sm:$0xff] %v4397_v21  ;;  %5679 = vst [vmem:[#allocation65_spill] sm:$0xff] %v4433_v17  ;;  %v566_v21 = vmul.f32 %v3933_v26, %v4030_v36  ;;  %v4470_v17 = vmul.f32 %v3991_v61, %v485_v41 }
 0x218   :  { %3045 = vmatpush3.bf16.xpose.msra.mxu0 %v1087_v54  ;;  %v806_v54 = vpack.c.bf16 %v571_v16, %v570_v18  ;;  %v4411_v16 = vmul.f32 %v3797_v20, %v485_v41  ;;  %v550_v18 = vmul.f32 %v3933_v26, %v4024_v35 }
 0x219   :  { %3046 = vmatprep.subr.bf16.mxu0 %v5639_v23 }
 0x21a   :  { %v1151_v0 = vsel %vm933_vm4, %v806_v54, 0  ;;  %5675 = vst [vmem:[#allocation61_spill] sm:$0xff] %v4411_v16  ;;  %v4436_v16 = vmul.f32 %v3907_v1, %v481_v60 }
 0x21c   :  { %3065 = vmatpush3.bf16.xpose.msra.mxu1 %v1154_v50  ;;  %v797_v50 = vpack.c.bf16 %v553_v4, %v552_v27  ;;  %v4417_v4 = vmul.f32 %v3855_v32, %v481_v60  ;;  %v4430_v27 = vmul.f32 %v3881_v44, %v481_v60  ;;  %5680 = vst [vmem:[#allocation66_spill] sm:$0xff] %v4436_v16 }
 0x21d   :  { %3066 = vmatprep.subr.bf16.mxu1 %v5639_v23 }
 0x21e   :  { %5676 = vst [vmem:[#allocation62_spill] sm:$0xff] %v4417_v4  ;;  %v1081_v54 = vsel %vm933_vm4, %v797_v50, 0  ;;  %5678 = vst [vmem:[#allocation64_spill] sm:$0xff] %v4430_v27  ;;  %v4447_v4 = vmul.f32 %v3933_v26, %v481_v60  ;;  %v4458_v27 = vmul.f32 %v3966_v42, %v481_v60  ;;  %v548_v50 = vmul.f32 %v3966_v42, %v4024_v35 }
 0x220   :  { %3047 = vmatpush3.bf16.xpose.msra.mxu0 %v1084_v33  ;;  %v4420_v33 = vmul.f32 %v3860_v25, %v485_v41  ;;  %5682 = vst [vmem:[#allocation68_spill] sm:$0xff] %v4447_v4  ;;  %v549_v4 = vmul.f32 %v3971_v43, %v4028_v7 }
 0x221   :  { %3048 = vmatprep.subr.bf16.mxu0 %v5639_v23 }
 0x222   :  { %5677 = vst [vmem:[#allocation63_spill] sm:$0xff] %v4420_v33 }
 0x224   :  { %3067 = vmatpush3.bf16.xpose.msra.mxu1 %v1151_v0  ;;  %v805_v0 = vpack.c.bf16 %v569_v24, %v568_v53  ;;  %v4442_v53 = vmul.f32 %v3912_v2, %v485_v41  ;;  %v796_v24 = vpack.c.bf16 %v551_v31, %v550_v18  ;;  %v4463_v18 = vmul.f32 %v3971_v43, %v485_v41 }
 0x225   :  { %3068 = vmatprep.subr.bf16.mxu1 %v5639_v23  ;;  %v804_v31 = vpack.c.bf16 %v567_v29, %v566_v21 }
 0x226   :  { %5681 = vst [vmem:[#allocation67_spill] sm:$0xff] %v4442_v53  ;;  %v1148_v33 = vsel %vm933_vm4, %v805_v0, 0  ;;  %v4467_v0 = vmul.f32 %v3986_v46, %v481_v60  ;;  %v1078_v16 = vsel %vm933_vm4, %v796_v24, 0  ;;  %v564_v53 = vmul.f32 %v3966_v42, %v4030_v36 }
 0x227   :  { %v1145_v60 = vsel %vm933_vm4, %v804_v31, 0  ;;  %v547_v24 = vmul.f32 %v3991_v61, %v4028_v7  ;;  %v562_v31 = vmul.f32 %v3986_v46, %v4030_v36  ;;  %v608_v36 = vmul.f32 %v3776_v13, %v4178_v58 }
 0x228   :  { %3049 = vmatpush3.bf16.xpose.msra.mxu0 %v1081_v54  ;;  %v4450_v54 = vmul.f32 %v3938_v40, %v485_v41  ;;  %5684 = vst [vmem:[#allocation70_spill] sm:$0xff] %v4467_v0  ;;  %v795_v41 = vpack.c.bf16 %v549_v4, %v548_v50 }
 0x229   :  { %3050 = vmatprep.subr.bf16.mxu0 %v5639_v23 }
 0x22a   :  { %5683 = vst [vmem:[#allocation69_spill] sm:$0xff] %v4450_v54  ;;  %v1075_v29 = vsel %vm933_vm4, %v795_v41, 0 }
 0x22c   :  { %3069 = vmatpush3.bf16.xpose.msra.mxu1 %v1148_v33  ;;  %v565_v33 = vmul.f32 %v3971_v43, %v4038_v39 }
 0x22d   :  { %3070 = vmatprep.subr.bf16.mxu1 %v5639_v23 }
 0x22e   :  { %v803_v21 = vpack.c.bf16 %v565_v33, %v564_v53  ;;  %v592_v53 = vmul.f32 %v3776_v13, %v4162_v9  ;;  %v590_v13 = vmul.f32 %v3792_v19, %v4162_v9 }
 0x230   :  { %3051 = vmatpush3.bf16.xpose.msra.mxu0 %v1078_v16  ;;  %v546_v16 = vmul.f32 %v3986_v46, %v4024_v35  ;;  %v1142_v4 = vsel %vm933_vm4, %v803_v21, 0  ;;  %v593_v35 = vmul.f32 %v3783_v15, %v4167_v5 }
 0x231   :  { %3052 = vmatprep.subr.bf16.mxu0 %v5639_v23 }
 0x232   :  { %v794_v50 = vpack.c.bf16 %v547_v24, %v546_v16  ;;  %v817_v41 = vpack.c.bf16 %v593_v35, %v592_v53  ;;  %v607_v53 = vmul.f32 %v3797_v20, %v4193_v22 }
 0x234   :  { %3071 = vmatpush3.bf16.xpose.msra.mxu1 %v1145_v60  ;;  %v563_v60 = vmul.f32 %v3991_v61, %v4038_v39  ;;  %v1072_v7 = vsel %vm933_vm4, %v794_v50, 0  ;;  %v609_v39 = vmul.f32 %v3783_v15, %v4193_v22  ;;  %v1227_v16 = vsel %vm933_vm4, %v817_v41, 0 }
 0x235   :  { %3072 = vmatprep.subr.bf16.mxu1 %v5639_v23  ;;  %v261_v50 = vadd.f32 %v4339_v59, %v4336_v3  ;;  %v591_v15 = vmul.f32 %v3797_v20, %v4167_v5 }
 0x236   :  { %v802_v33 = vpack.c.bf16 %v563_v60, %v562_v31  ;;  %v825_v24 = vpack.c.bf16 %v609_v39, %v608_v36  ;;  %v606_v60 = vmul.f32 %v3792_v19, %v4178_v58  ;;  %v589_v19 = vmul.f32 %v3860_v25, %v4167_v5 }
 0x237   :  { %v773_v31 = vpack.c.bf16 %v261_v50, %v261_v50  ;;  %v816_v59 = vpack.c.bf16 %v591_v15, %v590_v13  ;;  %v604_v36 = vmul.f32 %v3855_v32, %v4178_v58  ;;  %v605_v39 = vmul.f32 %v3860_v25, %v4193_v22 }
 0x238   :  { %3053 = vmatpush3.bf16.xpose.msra.mxu0 %v1075_v29  ;;  %v258_v29 = vadd.f32 %v4329_v28, %v4336_v3  ;;  %v1139_v21 = vsel %vm933_vm4, %v802_v33, 0  ;;  %v1294_v28 = vsel %vm933_vm4, %v825_v24, 0  ;;  %v588_v33 = vmul.f32 %v3855_v32, %v4162_v9 }
 0x239   :  { %3054 = vmatprep.subr.bf16.mxu0 %v5639_v23  ;;  %v1224_v35 = vsel %vm933_vm4, %v816_v59, 0  ;;  %v587_v24 = vmul.f32 %v3890_v49, %v4167_v5  ;;  %v602_v25 = vmul.f32 %v3881_v44, %v4178_v58  ;;  %v603_v50 = vmul.f32 %v3890_v49, %v4193_v22 }
 0x23a   :  { %v815_v41 = vpack.c.bf16 %v589_v19, %v588_v33  ;;  %v600_v49 = vmul.f32 %v3907_v1, %v4178_v58  ;;  %v583_v33 = vmul.f32 %v3938_v40, %v4167_v5 }
 0x23b   :  { %v822_v15 = vpack.c.bf16 %v603_v50, %v602_v25  ;;  %v579_v25 = vmul.f32 %v3991_v61, %v4167_v5 }
 0x23c   :  { %3073 = vmatpush3.bf16.xpose.msra.mxu1 %v1142_v4  ;;  %v772_v4 = vpack.c.bf16 %v258_v29, %v258_v29  ;;  %v1221_v29 = vsel %vm933_vm4, %v815_v41, 0 }
 0x23d   :  { %3074 = vmatprep.subr.bf16.mxu1 %v5639_v23 }
 0x240   :  { %3055 = vmatpush3.bf16.xpose.msra.mxu0 %v1072_v7  ;;  %v824_v7 = vpack.c.bf16 %v607_v53, %v606_v60  ;;  %v601_v60 = vmul.f32 %v3912_v2, %v4193_v22 }
 0x241   :  { %3080 = vmatprep.subr.bf16.mxu0 %v5639_v23 }
 0x242   :  { %v1291_v20 = vsel %vm933_vm4, %v824_v7, 0  ;;  %v582_v7 = vmul.f32 %v3933_v26, %v4162_v9 }
 0x244   :  { %3075 = vmatpush3.bf16.xpose.msra.mxu1 %v1139_v21  ;;  %v823_v21 = vpack.c.bf16 %v605_v39, %v604_v36  ;;  %v812_v19 = vpack.c.bf16 %v583_v33, %v582_v7  ;;  %v580_v39 = vmul.f32 %v3966_v42, %v4162_v9 }
 0x245   :  { %3100 = vmatprep.subr.bf16.mxu1 %v5639_v23 }
 0x246   :  { %v1212_v41 = vsel %vm933_vm4, %v812_v19, 0 }
 0x247   :  { %3057 = vmatmul.mubr.msk.bf16.vlgmr.msra.gmra.mxu0 %vm933_vm4, %v772_v4  ;;  %v1288_v4 = vsel %vm933_vm4, %v823_v21, 0 }
 0x248   :  { %3081 = vmatpush3.bf16.xpose.msra.mxu0 %v1227_v16  ;;  %3096 = vmatprep.mubr.msk.bf16.mxu0 %vm3550_vm5, %v5639_v23  ;;  %v586_v16 = vmul.f32 %v3881_v44, %v4162_v9  ;;  %v1285_v44 = vsel %vm933_vm4, %v822_v15, 0 }
 0x249   :  { %3082 = vmatprep.subr.bf16.mxu0 %v5639_v23 }
 0x24a   :  { %v814_v32 = vpack.c.bf16 %v587_v24, %v586_v16  ;;  %v597_v16 = vmul.f32 %v3971_v43, %v4193_v22 }
 0x24b   :  { %3077 = vmatmul.mubr.msk.bf16.vlgmr.msra.gmra.mxu1 %vm933_vm4, %v773_v31  ;;  %v585_v31 = vmul.f32 %v3912_v2, %v4167_v5  ;;  %v598_v2 = vmul.f32 %v3933_v26, %v4178_v58 }
 0x24c   :  { %3101 = vmatpush3.bf16.xpose.msra.mxu1 %v1294_v28  ;;  %3116 = vmatprep.mubr.msk.bf16.mxu1 %vm3550_vm5, %v5639_v23  ;;  %v1218_v13 = vsel %vm933_vm4, %v814_v32, 0  ;;  %v584_v28 = vmul.f32 %v3907_v1, %v4162_v9  ;;  %v578_v32 = vmul.f32 %v3986_v46, %v4162_v9 }
 0x24d   :  { %3102 = vmatprep.subr.bf16.mxu1 %v5639_v23 }
 0x24e   :  { %v813_v59 = vpack.c.bf16 %v585_v31, %v584_v28  ;;  %v810_v50 = vpack.c.bf16 %v579_v25, %v578_v32  ;;  %v4610_v28 = vpop.f32.mrf.mxu1 }
 0x250   :  { %3083 = vmatpush3.bf16.xpose.msra.mxu0 %v1224_v35  ;;  %v1215_v53 = vsel %vm933_vm4, %v813_v59, 0  ;;  %v821_v35 = vpack.c.bf16 %v601_v60, %v600_v49  ;;  %v1206_v9 = vsel %vm933_vm4, %v810_v50, 0 }
 0x251   :  { %3084 = vmatprep.subr.bf16.mxu0 %v5639_v23 }
 0x252   :  { %v1282_v1 = vsel %vm933_vm4, %v821_v35, 0 }
 0x254   :  { %3103 = vmatpush3.bf16.xpose.msra.mxu1 %v1291_v20  ;;  %v599_v20 = vmul.f32 %v3938_v40, %v4193_v22  ;;  %v596_v40 = vmul.f32 %v3966_v42, %v4178_v58 }
 0x255   :  { %3104 = vmatprep.subr.bf16.mxu1 %v5639_v23 }
 0x256   :  { %v820_v36 = vpack.c.bf16 %v599_v20, %v598_v2  ;;  %v4642_v2 = vld [vmem:[%s5542_s5 + $0x60] sm:$0xff] }
 0x257   :  { %v622_v20 = vmul.f32 %v4642_v2, %v4365_v48 }
 0x258   :  { %3085 = vmatpush3.bf16.xpose.msra.mxu0 %v1221_v29  ;;  %v581_v29 = vmul.f32 %v3971_v43, %v4167_v5  ;;  %v1279_v26 = vsel %vm933_vm4, %v820_v36, 0  ;;  %v594_v43 = vmul.f32 %v3986_v46, %v4178_v58  ;;  %v4612_v46 = vpop.f32.mrf.mxu1 }
 0x259   :  { %3086 = vmatprep.subr.bf16.mxu0 %v5639_v23 }
 0x25a   :  { %v811_v21 = vpack.c.bf16 %v581_v29, %v580_v39  ;;  %v4630_v59 = vpop.f32.mrf.mxu1  ;;  %v4652_v29 = vld [vmem:[%s5542_s5 + $0x68] sm:$0xff] }
 0x25c   :  { %3105 = vmatpush3.bf16.xpose.msra.mxu1 %v1288_v4  ;;  %v1209_v24 = vsel %vm933_vm4, %v811_v21, 0  ;;  %v819_v4 = vpack.c.bf16 %v597_v16, %v596_v40 }
 0x25d   :  { %3106 = vmatprep.subr.bf16.mxu1 %v5639_v23 }
 0x25e   :  { %v1276_v42 = vsel %vm933_vm4, %v819_v4, 0  ;;  %v639_v4 = vmul.f32 %v4652_v29, %v4630_v59 }
 0x260   :  { %3087 = vmatpush3.bf16.xpose.msra.mxu0 %v1218_v13  ;;  %v595_v13 = vmul.f32 %v3991_v61, %v4193_v22  ;;  %v4617_v61 = vld [vmem:[%s5542_s5 + $0x70] sm:$0xff]  ;;  %v4624_v22 = vld [vmem:[%s5542_s5 + $0x78] sm:$0xff] }
 0x261   :  { %3088 = vmatprep.subr.bf16.mxu0 %v5639_v23  ;;  %v624_v58 = vmul.f32 %v4617_v61, %v4365_v48  ;;  %v625_v31 = vmul.f32 %v4624_v22, %v4379_v62  ;;  %v640_v35 = vmul.f32 %v4617_v61, %v4610_v28  ;;  %v641_v7 = vmul.f32 %v4624_v22, %v4630_v59 }
 0x262   :  { %v818_v15 = vpack.c.bf16 %v595_v13, %v594_v43  ;;  %v4679_v43 = vld [vmem:[%s5542_s5 + $0x58] sm:$0xff] }
 0x263   :  { %v841_v39 = vpack.c.bf16 %v641_v7, %v640_v35  ;;  %v621_v13 = vmul.f32 %v4679_v43, %v4379_v62 }
 0x264   :  { %3107 = vmatpush3.bf16.xpose.msra.mxu1 %v1285_v44  ;;  %v1273_v5 = vsel %vm933_vm4, %v818_v15, 0 }
 0x265   :  { %3108 = vmatprep.subr.bf16.mxu1 %v5639_v23  ;;  %v1428_v40 = vsel %vm933_vm4, %v841_v39, 0 }
 0x268   :  { %3089 = vmatpush3.bf16.xpose.msra.mxu0 %v1215_v53  ;;  %v833_v53 = vpack.c.bf16 %v625_v31, %v624_v58  ;;  %v637_v58 = vmul.f32 %v4679_v43, %v4630_v59  ;;  %v4693_v31 = vld [vmem:[%s5542_s5 + $0x40] sm:$0xff] }
 0x269   :  { %3090 = vmatprep.subr.bf16.mxu0 %v5639_v23 }
 0x26a   :  { %v1361_v36 = vsel %vm933_vm4, %v833_v53, 0 }
 0x26c   :  { %3109 = vmatpush3.bf16.xpose.msra.mxu1 %v1282_v1 }
 0x26d   :  { %3110 = vmatprep.subr.bf16.mxu1 %v5639_v23 }
 0x270   :  { %3091 = vmatpush3.bf16.xpose.msra.mxu0 %v1212_v41 }
 0x271   :  { %3092 = vmatprep.subr.bf16.mxu0 %v5639_v23 }
 0x274   :  { %3111 = vmatpush3.bf16.xpose.msra.mxu1 %v1279_v26  ;;  %v623_v26 = vmul.f32 %v4652_v29, %v4379_v62 }
 0x275   :  { %3112 = vmatprep.subr.bf16.mxu1 %v5639_v23 }
 0x276   :  { %v832_v16 = vpack.c.bf16 %v623_v26, %v622_v20 }
 0x278   :  { %3093 = vmatpush3.bf16.xpose.msra.mxu0 %v1209_v24  ;;  %v638_v24 = vmul.f32 %v4642_v2, %v4610_v28  ;;  %v1358_v32 = vsel %vm933_vm4, %v832_v16, 0  ;;  %v4722_v16 = vld [vmem:[%s5542_s5 + $0x38] sm:$0xff] }
 0x279   :  { %3094 = vmatprep.subr.bf16.mxu0 %v5639_v23 }
 0x27a   :  { %v840_v25 = vpack.c.bf16 %v639_v4, %v638_v24  ;;  %v617_v24 = vmul.f32 %v4722_v16, %v4379_v62 }
 0x27c   :  { %3113 = vmatpush3.bf16.xpose.msra.mxu1 %v1276_v42  ;;  %v4672_v42 = vld [vmem:[%s5542_s5 + $0x50] sm:$0xff] }
 0x27d   :  { %3114 = vmatprep.subr.bf16.mxu1 %v5639_v23  ;;  %v620_v50 = vmul.f32 %v4672_v42, %v4365_v48 }
 0x27f   :  { %v831_v15 = vpack.c.bf16 %v621_v13, %v620_v50  ;;  %v4733_v50 = vld [vmem:[%s5539_s2] sm:$0xff] }
 0x280   :  { %3095 = vmatpush3.bf16.xpose.msra.mxu0 %v1206_v9  ;;  %v1425_v9 = vsel %vm933_vm4, %v840_v25, 0 }
 0x281   :  { %3120 = vmatprep.subr.bf16.mxu0 %v5639_v23  ;;  %v1355_v35 = vsel %vm933_vm4, %v831_v15, 0 }
 0x284   :  { %3115 = vmatpush3.bf16.xpose.msra.mxu1 %v1273_v5  ;;  %v636_v5 = vmul.f32 %v4672_v42, %v4610_v28 }
 0x285   :  { %3140 = vmatprep.subr.bf16.mxu1 %v5639_v23 }
 0x286   :  { %v839_v7 = vpack.c.bf16 %v637_v58, %v636_v5  ;;  %v633_v5 = vmul.f32 %v4722_v16, %v4630_v59 }
 0x299   :  { %v4628_v44 = vpop.f32.mrf.mxu0 }
 0x29b   :  { %v265_v49 = vpop.f32.mrf.mxu0 }
 0x29c   :  { %v266_v60 = vadd.f32 %v265_v49, %v4336_v3  ;;  %v618_v49 = vmul.f32 %v4693_v31, %v4365_v48 }
 0x29d   :  { %v4637_v33 = vpop.f32.mrf.mxu0 }
 0x29e   :  { %v774_v1 = vpack.c.bf16 %v266_v60, %v266_v60  ;;  %v4700_v60 = vld [vmem:[%s5542_s5 + $0x48] sm:$0xff] }
 0x29f   :  { %v268_v19 = vpop.f32.mrf.mxu0  ;;  %v619_v53 = vmul.f32 %v4700_v60, %v4379_v62  ;;  %v635_v39 = vmul.f32 %v4700_v60, %v4630_v59 }
 0x2a0   :  { %v269_v41 = vadd.f32 %v268_v19, %v4336_v3  ;;  %3097 = vmatmul.mubr.msk.bf16.vlgmr.msra.gmra.mxu0 %vm933_vm4, %v774_v1  ;;  %v3551_v1 = vmov 1966171168  }
 0x2a1   :  { %3121 = vmatpush3.bf16.xpose.msra.mxu0 %v1361_v36  ;;  %3136 = vmatprep.mubr.msk.bf16.mxu0 %vm3550_vm5, %v5639_v23  ;;  %v846_v19 = vunpack.c.l.s4 %v3551_v1  ;;  %v830_v20 = vpack.c.bf16 %v619_v53, %v618_v49  ;;  %v634_v36 = vmul.f32 %v4693_v31, %v4610_v28  ;;  %v4747_v49 = vld [vmem:[%s5542_s5 + $0x20] sm:$0xff] }
 0x2a2   :  { %v775_v21 = vpack.c.bf16 %v269_v41, %v269_v41  ;;  %3122 = vmatprep.subr.bf16.mxu0 %v5639_v23  ;;  %v1422_v41 = vsel %vm933_vm4, %v839_v7, 0  ;;  %v614_v53 = vmul.f32 %v4747_v49, %v4365_v48 }
 0x2a3   :  { %v847_v26 = vunpack.c.0.s8 %v846_v19  ;;  %v1352_v4 = vsel %vm933_vm4, %v830_v20, 0 }
 0x2a4   :  { %3117 = vmatmul.mubr.msk.bf16.vlgmr.msra.gmra.mxu1 %vm933_vm4, %v775_v21  ;;  %v4715_v21 = vld [vmem:[%s5542_s5 + $0x30] sm:$0xff] }
 0x2a5   :  { %3141 = vmatpush3.bf16.xpose.msra.mxu1 %v1428_v40  ;;  %3156 = vmatprep.mubr.msk.bf16.mxu1 %vm3550_vm5, %v5639_v23  ;;  %v616_v40 = vmul.f32 %v4715_v21, %v4365_v48  ;;  %v4728_v25 = vsub.s32 %v847_v26, %v3807_v45  ;;  %v632_v15 = vmul.f32 %v4715_v21, %v4610_v28 }
 0x2a6   :  { %3142 = vmatprep.subr.bf16.mxu1 %v5639_v23 }
 0x2a7   :  { %v829_v13 = vpack.c.bf16 %v617_v24, %v616_v40  ;;  %v851_v58 = vrot.slane %v4733_v50, %v4728_v25  ;;  %v837_v19 = vpack.c.bf16 %v633_v5, %v632_v15  ;;  %v4784_v15 = vld [vmem:[%s5542_s5 + $0x18] sm:$0xff] }
 0x2a8   :  { %v613_v5 = vmul.f32 %v4784_v15, %v4379_v62 }
 0x2a9   :  { %3123 = vmatpush3.bf16.xpose.msra.mxu0 %v1358_v32  ;;  %v838_v32 = vpack.c.bf16 %v635_v39, %v634_v36  ;;  %v1349_v1 = vsel %vm933_vm4, %v829_v13, 0  ;;  %v4760_v20 = vrot.slane %v851_v58, %v4728_v25  ;;  %v630_v39 = vmul.f32 %v4747_v49, %v4610_v28  ;;  %v4777_v13 = vld [vmem:[%s5542_s5 + $0x10] sm:$0xff] }
 0x2aa   :  { %3124 = vmatprep.subr.bf16.mxu0 %v5639_v23  ;;  %v1416_v26 = vsel %vm933_vm4, %v837_v19, 0  ;;  %v4793_v19 = vpop.f32.mrf.mxu1 }
 0x2ab   :  { %v896_v40 = vrot.slane %v4760_v20, %v3815_v57 }
 0x2ad   :  { %3143 = vmatpush3.bf16.xpose.msra.mxu1 %v1425_v9  ;;  %v1419_v9 = vsel %vm933_vm4, %v838_v32, 0 }
 0x2ae   :  { %3144 = vmatprep.subr.bf16.mxu1 %v5639_v23 }
 0x2b1   :  { %3125 = vmatpush3.bf16.xpose.msra.mxu0 %v1355_v35  ;;  %v4754_v35 = vld [vmem:[%s5542_s5 + $0x28] sm:$0xff] }
 0x2b2   :  { %3126 = vmatprep.subr.bf16.mxu0 %v5639_v23  ;;  %v615_v7 = vmul.f32 %v4754_v35, %v4379_v62 }
 0x2b4   :  { %v828_v36 = vpack.c.bf16 %v615_v7, %v614_v53 }
 0x2b5   :  { %3145 = vmatpush3.bf16.xpose.msra.mxu1 %v1422_v41  ;;  %v859_v41 = vcombine.high %v851_v58, %v851_v58 }
 0x2b6   :  { %3146 = vmatprep.subr.bf16.mxu1 %v5639_v23  ;;  %v1346_v53 = vsel %vm933_vm4, %v828_v36, 0  ;;  %v628_v36 = vmul.f32 %v4777_v13, %v4610_v28 }
 0x2b7   :  { %v4769_v24 = vrot.slane %v859_v41, %v4728_v25 }
 0x2b9   :  { %3127 = vmatpush3.bf16.xpose.msra.mxu0 %v1352_v4  ;;  %v631_v4 = vmul.f32 %v4754_v35, %v4630_v59  ;;  %v900_v7 = vrot.slane %v4769_v24, %v3815_v57 }
 0x2ba   :  { %3128 = vmatprep.subr.bf16.mxu0 %v5639_v23 }
 0x2bd   :  { %3147 = vmatpush3.bf16.xpose.msra.mxu1 %v1419_v9  ;;  %v612_v9 = vmul.f32 %v4777_v13, %v4365_v48 }
 0x2be   :  { %3148 = vmatprep.subr.bf16.mxu1 %v5639_v23 }
 0x2bf   :  { %v827_v45 = vpack.c.bf16 %v613_v5, %v612_v9  ;;  %v4810_v5 = vld [vmem:[%s5542_s5] sm:$0xff] }
 0x2c1   :  { %3129 = vmatpush3.bf16.xpose.msra.mxu0 %v1349_v1  ;;  %v836_v1 = vpack.c.bf16 %v631_v4, %v630_v39  ;;  %v629_v39 = vmul.f32 %v4784_v15, %v4630_v59  ;;  %v1343_v9 = vsel %vm933_vm4, %v827_v45, 0 }
 0x2c2   :  { %3130 = vmatprep.subr.bf16.mxu0 %v5639_v23 }
 0x2c5   :  { %3149 = vmatpush3.bf16.xpose.msra.mxu1 %v1416_v26 }
 0x2c6   :  { %3150 = vmatprep.subr.bf16.mxu1 %v5639_v23 }
 0x2c7   :  { %v995_v32 = vpop.f32.mrf.mxu0 }
 0x2c8   :  { %v4788_v58 = vadd.f32 %v995_v32, %v896_v40  ;;  %v1413_v40 = vsel %vm933_vm4, %v836_v1, 0  ;;  %v4817_v1 = vld [vmem:[%s5542_s5 + $0x8] sm:$0xff] }
 0x2c9   :  { %3131 = vmatpush3.bf16.xpose.msra.mxu0 %v1346_v53  ;;  %v3018_v41 = vpop.f32.mrf.mxu0 }
 0x2ca   :  { %1470 = vmax.xlane.f32.xlu0 %v4788_v58  ;;  %3132 = vmatprep.subr.bf16.mxu0 %v5639_v23  ;;  %v611_v41 = vmul.f32 %v4817_v1, %v4379_v62  ;;  %v274_v62 = vadd.f32 %v4628_v44, %v4336_v3  ;;  %v654_v44 = vmul.f32 %v4642_v2, %v3763_v8 }
 0x2cb   :  { %v998_v26 = vpop.f32.mrf.mxu0  ;;  %v1062_v54 = vpop.f32.mrf.mxu1 }
 0x2cc   :  { %v4797_v0 = vadd.f32 %v1062_v54, %v900_v7  ;;  %v835_v54 = vpack.c.bf16 %v629_v39, %v628_v36  ;;  %v610_v7 = vmul.f32 %v4810_v5, %v4365_v48  ;;  %v626_v36 = vmul.f32 %v4810_v5, %v4610_v28 }
 0x2cd   :  { %3151 = vmatpush3.bf16.xpose.msra.mxu1 %v1413_v40  ;;  %v3019_v4 = vpop.f32.mrf.mxu0  ;;  %v3038_v32 = vpop.f32.mrf.mxu1  ;;  %v627_v48 = vmul.f32 %v4817_v1, %v4630_v59  ;;  %v277_v28 = vadd.f32 %v4637_v33, %v4336_v3  ;;  %v656_v59 = vmul.f32 %v4617_v61, %v3763_v8  ;;  %v652_v33 = vmul.f32 %v4672_v42, %v3763_v8 }
 0x2ce   :  { %1472 = vmax.xlane.f32.xlu1 %v4797_v0  ;;  %3152 = vmatprep.subr.bf16.mxu1 %v5639_v23  ;;  %v1410_v45 = vsel %vm933_vm4, %v835_v54, 0  ;;  %v826_v40 = vpack.c.bf16 %v611_v41, %v610_v7  ;;  %v655_v41 = vmul.f32 %v4652_v29, %v3767_v10 }
 0x2cf   :  { %v1065_v53 = vpop.f32.mrf.mxu1  ;;  %v834_v4 = vpack.c.bf16 %v627_v48, %v626_v36  ;;  %v777_v54 = vpack.c.bf16 %v277_v28, %v277_v28  ;;  %v651_v36 = vmul.f32 %v4700_v60, %v3767_v10  ;;  %v3416_v48 = vld [vmem:[%s5543_s6 + $0x38] sm:$0xff]  }
 0x2d0   :  { %v1340_v39 = vsel %vm933_vm4, %v826_v40, 0  ;;  %v776_v53 = vpack.c.bf16 %v274_v62, %v274_v62  ;;  %v1681_v3 = vpack.c.bf16 %v655_v41, %v654_v44  ;;  %v650_v40 = vmul.f32 %v4693_v31, %v3763_v8 }
 0x2d1   :  { %3133 = vmatpush3.bf16.xpose.msra.mxu0 %v1343_v9  ;;  %v3039_v26 = vpop.f32.mrf.mxu1  ;;  %v1407_v32 = vsel %vm933_vm4, %v834_v4, 0  ;;  %v657_v9 = vmul.f32 %v4624_v22, %v3767_v10  ;;  %v648_v62 = vmul.f32 %v4715_v21, %v3763_v8  ;;  %v645_v44 = vmul.f32 %v4784_v15, %v3767_v10 }
 0x2d2   :  { %3134 = vmatprep.subr.bf16.mxu0 %v5639_v23  ;;  %v653_v26 = vmul.f32 %v4679_v43, %v3767_v10  ;;  %v1679_v4 = vpack.c.bf16 %v651_v36, %v650_v40  ;;  %v891_v36 = vcombine.high %v4769_v24, %v4769_v24  ;;  %v3420_v24 = vld [vmem:[%s5543_s6 + $0x18] sm:$0xff]  }
 0x2d3   :  { %v1682_v7 = vpack.c.bf16 %v657_v9, %v656_v59  ;;  %v646_v59 = vmul.f32 %v4747_v49, %v3763_v8  ;;  %v647_v9 = vmul.f32 %v4754_v35, %v3767_v10 }
 0x2d5   :  { %3153 = vmatpush3.bf16.xpose.msra.mxu1 %v1410_v45  ;;  %v1680_v45 = vpack.c.bf16 %v653_v26, %v652_v33  ;;  %v643_v33 = vmul.f32 %v4817_v1, %v3767_v10 }
 0x2d6   :  { %3154 = vmatprep.subr.bf16.mxu1 %v5639_v23 }
 0x2d9   :  { %3135 = vmatpush3.bf16.xpose.msra.mxu0 %v1340_v39  ;;  %v3417_v39 = vld [vmem:[%s5543_s6 + $0x30] sm:$0xff]  }
 0x2da   :  { %3160 = vmatprep.subr.bf16.mxu0 %v3416_v48 }
 0x2dd   :  { %3155 = vmatpush3.bf16.xpose.msra.mxu1 %v1407_v32  ;;  %v649_v32 = vmul.f32 %v4722_v16, %v3767_v10 }
 0x2de   :  { %3184 = vmatprep.subr.bf16.mxu1 %v5639_v23 }
 0x2df   :  { %v1678_v28 = vpack.c.bf16 %v649_v32, %v648_v62 }
 0x2e0   :  { %3137 = vmatmul.mubr.msk.bf16.vlgmr.msra.gmra.mxu0 %vm933_vm4, %v776_v53  ;;  %v3418_v53 = vld [vmem:[%s5543_s6 + $0x28] sm:$0xff]  }
 0x2e1   :  { %3161 = vmatpush3.bf16.msra.mxu0 %v3416_v48 }
 0x2e2   :  { %3162 = vmatprep.subr.bf16.mxu0 %v3417_v39 }
 0x2e4   :  { %3157 = vmatmul.mubr.msk.bf16.vlgmr.msra.gmra.mxu1 %vm933_vm4, %v777_v54  ;;  %v1677_v54 = vpack.c.bf16 %v647_v9, %v646_v59  ;;  %v3419_v9 = vld [vmem:[%s5543_s6 + $0x20] sm:$0xff]  }
 0x2e5   :  { %3185 = vmatpush3.bf16.msra.mxu1 %v1682_v7  ;;  %3200 = vmatprep.mubr.msk.bf16.mxu1 %vm3550_vm5, %v5639_v23  ;;  %v644_v7 = vmul.f32 %v4777_v13, %v3763_v8 }
 0x2e6   :  { %3186 = vmatprep.subr.bf16.mxu1 %v5639_v23  ;;  %3163 = vmatpush3.bf16.msra.mxu0 %v3417_v39  ;;  %v908_v39 = vrot.slane %v891_v36, %v3815_v57 }
 0x2e7   :  { %3164 = vmatprep.subr.bf16.mxu0 %v3418_v53  ;;  %v1676_v41 = vpack.c.bf16 %v645_v44, %v644_v7  ;;  %v3422_v7 = vld [vmem:[%s5543_s6 + $0x8] sm:$0xff]   ;;  %v3423_v44 = vld [vmem:[%s5543_s6] sm:$0xff]  }
 0x2e9   :  { %3187 = vmatpush3.bf16.msra.mxu1 %v1681_v3  ;;  %v642_v3 = vmul.f32 %v4810_v5, %v3763_v8 }
 0x2ea   :  { %3188 = vmatprep.subr.bf16.mxu1 %v5639_v23  ;;  %3165 = vmatpush3.bf16.msra.mxu0 %v3418_v53 }
 0x2eb   :  { %v1675_v26 = vpack.c.bf16 %v643_v33, %v642_v3  ;;  %3166 = vmatprep.subr.bf16.mxu0 %v3419_v9 }
 0x2ed   :  { %3189 = vmatpush3.bf16.msra.mxu1 %v1680_v45  ;;  %v889_v45 = vcombine.high %v4760_v20, %v4760_v20 }
 0x2ee   :  { %3190 = vmatprep.subr.bf16.mxu1 %v5639_v23  ;;  %3167 = vmatpush3.bf16.msra.mxu0 %v3419_v9 }
 0x2ef   :  { %v904_v40 = vrot.slane %v889_v45, %v3815_v57  ;;  %3168 = vmatprep.subr.bf16.mxu0 %v3420_v24 }
 0x2f1   :  { %3191 = vmatpush3.bf16.msra.mxu1 %v1679_v4 }
 0x2f2   :  { %3192 = vmatprep.subr.bf16.mxu1 %v5639_v23  ;;  %3169 = vmatpush3.bf16.msra.mxu0 %v3420_v24 }
 0x2f5   :  { %3193 = vmatpush3.bf16.msra.mxu1 %v1678_v28 }
 0x2f6   :  { %3194 = vmatprep.subr.bf16.mxu1 %v5639_v23 }
 0x2f9   :  { %3195 = vmatpush3.bf16.msra.mxu1 %v1677_v54  ;;  %v3421_v54 = vld [vmem:[%s5543_s6 + $0x10] sm:$0xff]  }
 0x2fa   :  { %3196 = vmatprep.subr.bf16.mxu1 %v5639_v23  ;;  %3170 = vmatprep.subr.bf16.mxu0 %v3421_v54 }
 0x2fb   :  { %3171 = vmatpush3.bf16.msra.mxu0 %v3421_v54 }
 0x2fc   :  { %3172 = vmatprep.subr.bf16.mxu0 %v3422_v7 }
 0x2fd   :  { %3197 = vmatpush3.bf16.msra.mxu1 %v1676_v41  ;;  %v844_v41 = vcombine.high %v4733_v50, %v4733_v50 }
 0x2fe   :  { %3198 = vmatprep.subr.bf16.mxu1 %v5639_v23 }
 0x2ff   :  { %3173 = vmatpush3.bf16.msra.mxu0 %v3422_v7 }
 0x300   :  { %3174 = vmatprep.subr.bf16.mxu0 %v3423_v44 }
 0x301   :  { %3199 = vmatpush3.bf16.msra.mxu1 %v1675_v26  ;;  %v858_v26 = vrot.slane %v844_v41, %v4728_v25 }
 0x302   :  { %3224 = vmatprep.subr.bf16.mxu1 %v5639_v23 }
 0x303   :  { %3175 = vmatpush3.bf16.msra.mxu0 %v3423_v44 }
 0x304   :  { %3204 = vmatprep.subr.bf16.mxu0 %v5639_v23 }
 0x307   :  { %v1129_v48 = vpop.f32.mrf.mxu0 }
 0x308   :  { %v1130_v8 = vadd.f32 %v1129_v48, %v904_v40  ;;  %v874_v48 = vrot.slane %v858_v26, %v4728_v25 }
 0x309   :  { %v3058_v10 = vpop.f32.mrf.mxu0 }
 0x30a   :  { %1474 = vmax.xlane.f32.xlu0 %v1130_v8 }
 0x30b   :  { %v1132_v4 = vpop.f32.mrf.mxu0  ;;  %v1196_v62 = vpop.f32.mrf.mxu1 }
 0x30c   :  { %v1197_v32 = vadd.f32 %v1196_v62, %v908_v39  ;;  %v860_v39 = vcombine.high %v858_v26, %v858_v26  ;;  %v912_v4 = vrot.slane %v874_v48, %v3815_v57 }
 0x30d   :  { %v3059_v53 = vpop.f32.mrf.mxu0  ;;  %v3078_v28 = vpop.f32.mrf.mxu1 }
 0x30e   :  { %1476 = vmax.xlane.f32.xlu1 %v1197_v32  ;;  %v888_v62 = vrot.slane %v860_v39, %v4728_v25 }
 0x30f   :  { %v1199_v20 = vpop.f32.mrf.mxu1 }
 0x311   :  { %v3079_v59 = vpop.f32.mrf.mxu1 }
 0x353   :  { %v1471_v3 = vpop.xlane.xlu0 %1470 }
 0x354   :  { %v1486_v33 = vsub.f32 %v4788_v58, %v1471_v3  ;;  %v916_v58 = vrot.slane %v888_v62, %v3815_v57 }
 0x356   :  { %v1494_v45 = vmul.f32 1.442695, %v1486_v33 }
 0x357   :  { %v1473_v40 = vpop.xlane.xlu1 %1472 }
 0x358   :  { %v1487_v36 = vsub.f32 %v4797_v0, %v1473_v40  ;;  %3452 = vpow2.f32 %v1494_v45 }
 0x35a   :  { %v1496_v10 = vmul.f32 1.442695, %v1487_v36  ;;  %v890_v36 = vcombine.high %v874_v48, %v874_v48 }
 0x35c   :  { %3454 = vpow2.f32 %v1496_v10  ;;  %v920_v10 = vrot.slane %v890_v36, %v3815_v57  ;;  %v668_v36 = vmul.f32 %v4672_v42, %v3771_v12 }
 0x360   :  { %v1263_v50 = vpop.f32.mrf.mxu0 }
 0x361   :  { %v4918_v53 = vadd.f32 %v1263_v50, %v912_v4  ;;  %v892_v4 = vcombine.high %v888_v62, %v888_v62  ;;  %v673_v62 = vmul.f32 %v4624_v22, %v4022_v34 }
 0x362   :  { %v3098_v28 = vpop.f32.mrf.mxu0 }
 0x363   :  { %1478 = vmax.xlane.f32.xlu0 %v4918_v53  ;;  %v924_v28 = vrot.slane %v892_v4, %v3815_v57  ;;  %v666_v4 = vmul.f32 %v4693_v31, %v3771_v12 }
 0x364   :  { %v1266_v20 = vpop.f32.mrf.mxu0  ;;  %v1330_v0 = vpop.f32.mrf.mxu1 }
 0x365   :  { %v4922_v59 = vadd.f32 %v1330_v0, %v916_v58  ;;  %v4925_v54 = vpop.eup %3452 }
 0x366   :  { %v3099_v9 = vpop.f32.mrf.mxu0  ;;  %v3118_v24 = vpop.f32.mrf.mxu1 }
 0x367   :  { %1480 = vmax.xlane.f32.xlu1 %v4922_v59  ;;  %v672_v24 = vmul.f32 %v4617_v61, %v3771_v12 }
 0x368   :  { %v1333_v7 = vpop.f32.mrf.mxu1 }
 0x369   :  { %v4927_v25 = vpop.eup %3454 }
 0x36a   :  { %v3119_v44 = vpop.f32.mrf.mxu1  ;;  %v1526_v41 = vpack.c.bf16 %v4927_v25, %v4925_v54 }
 0x36c   :  { %3176 = vmatprep.mubr.bf16.mxu0 %v1526_v41 }
 0x393   :  { %v1475_v3 = vpop.xlane.xlu0 %1474 }
 0x394   :  { %v1488_v33 = vsub.f32 %v1130_v8, %v1475_v3 }
 0x396   :  { %v1498_v26 = vmul.f32 1.442695, %v1488_v33  ;;  %v1690_v33 = vpack.c.bf16 %v673_v62, %v672_v24  ;;  %v660_v62 = vmul.f32 %v4777_v13, %v3771_v12 }
 0x397   :  { %v1477_v45 = vpop.xlane.xlu1 %1476 }
 0x398   :  { %v1489_v40 = vsub.f32 %v1197_v32, %v1477_v45  ;;  %3456 = vpow2.f32 %v1498_v26  ;;  %v670_v26 = vmul.f32 %v4642_v2, %v3771_v12  ;;  %v671_v45 = vmul.f32 %v4652_v29, %v4022_v34 }
 0x39a   :  { %v1500_v39 = vmul.f32 1.442695, %v1489_v40  ;;  %v1689_v40 = vpack.c.bf16 %v671_v45, %v670_v26 }
 0x39c   :  { %3458 = vpow2.f32 %v1500_v39  ;;  %v669_v39 = vmul.f32 %v4679_v43, %v4022_v34 }
 0x3a0   :  { %v1397_v50 = vpop.f32.mrf.mxu0 }
 0x3a1   :  { %v4932_v58 = vadd.f32 %v1397_v50, %v920_v10  ;;  %v1688_v10 = vpack.c.bf16 %v669_v39, %v668_v36  ;;  %v667_v50 = vmul.f32 %v4700_v60, %v4022_v34 }
 0x3a2   :  { %v3138_v20 = vpop.f32.mrf.mxu0 }
 0x3a3   :  { %1482 = vmax.xlane.f32.xlu0 %v4932_v58  ;;  %v664_v20 = vmul.f32 %v4715_v21, %v3771_v12 }
 0x3a4   :  { %v1400_v0 = vpop.f32.mrf.mxu0  ;;  %v1464_v8 = vpop.f32.mrf.mxu1 }
 0x3a5   :  { %v4936_v9 = vadd.f32 %v1464_v8, %v924_v28  ;;  %v4943_v7 = vpop.eup %3456  ;;  %v1687_v28 = vpack.c.bf16 %v667_v50, %v666_v4  ;;  %v665_v0 = vmul.f32 %v4722_v16, %v4022_v34 }
 0x3a6   :  { %v3139_v32 = vpop.f32.mrf.mxu0  ;;  %v3158_v48 = vpop.f32.mrf.mxu1 }
 0x3a7   :  { %1484 = vmax.xlane.f32.xlu1 %v4936_v9  ;;  %v1686_v8 = vpack.c.bf16 %v665_v0, %v664_v20  ;;  %v662_v32 = vmul.f32 %v4747_v49, %v3771_v12  ;;  %v663_v48 = vmul.f32 %v4754_v35, %v4022_v34 }
 0x3a8   :  { %v1467_v57 = vpop.f32.mrf.mxu1 }
 0x3a9   :  { %v4945_v44 = vpop.eup %3458  ;;  %v1685_v24 = vpack.c.bf16 %v663_v48, %v662_v32  ;;  %v661_v57 = vmul.f32 %v4784_v15, %v4022_v34 }
 0x3aa   :  { %v3159_v41 = vpop.f32.mrf.mxu1  ;;  %v1527_v3 = vpack.c.bf16 %v4945_v44, %v4943_v7 }
 0x3ab   :  { %v1684_v41 = vpack.c.bf16 %v661_v57, %v660_v62 }
 0x3ac   :  { %3177 = vmatmul.mubr.bf16.vlgmr.msra.gmra.mxu0 %v1527_v3  ;;  %v658_v3 = vmul.f32 %v4810_v5, %v3771_v12 }
 0x3ad   :  { %3205 = vmatpush3.bf16.msra.mxu0 %v1690_v33  ;;  %v659_v33 = vmul.f32 %v4817_v1, %v4022_v34 }
 0x3ae   :  { %3206 = vmatprep.subr.bf16.mxu0 %v5639_v23 }
 0x3af   :  { %v1683_v26 = vpack.c.bf16 %v659_v33, %v658_v3 }
 0x3b1   :  { %3207 = vmatpush3.bf16.msra.mxu0 %v1689_v40 }
 0x3b2   :  { %3208 = vmatprep.subr.bf16.mxu0 %v5639_v23 }
 0x3b5   :  { %3209 = vmatpush3.bf16.msra.mxu0 %v1688_v10 }
 0x3b6   :  { %3210 = vmatprep.subr.bf16.mxu0 %v5639_v23 }
 0x3b9   :  { %3211 = vmatpush3.bf16.msra.mxu0 %v1687_v28 }
 0x3ba   :  { %3212 = vmatprep.subr.bf16.mxu0 %v5639_v23 }
 0x3bd   :  { %3213 = vmatpush3.bf16.msra.mxu0 %v1686_v8 }
 0x3be   :  { %3214 = vmatprep.subr.bf16.mxu0 %v5639_v23 }
 0x3c1   :  { %3215 = vmatpush3.bf16.msra.mxu0 %v1685_v24 }
 0x3c2   :  { %3216 = vmatprep.subr.bf16.mxu0 %v5639_v23 }
 0x3c5   :  { %3217 = vmatpush3.bf16.msra.mxu0 %v1684_v41 }
 0x3c6   :  { %3218 = vmatprep.subr.bf16.mxu0 %v5639_v23 }
 0x3c9   :  { %3219 = vmatpush3.bf16.msra.mxu0 %v1683_v26 }
 0x3ca   :  { %3244 = vmatprep.subr.bf16.mxu0 %v5639_v23 }
 0x3ec   :  { %v1479_v45 = vpop.xlane.xlu0 %1478 }
 0x3ed   :  { %v1490_v40 = vsub.f32 %v4918_v53, %v1479_v45 }
 0x3ef   :  { %v1502_v36 = vmul.f32 1.442695, %v1490_v40 }
 0x3f0   :  { %v1481_v39 = vpop.xlane.xlu1 %1480 }
 0x3f1   :  { %v1491_v10 = vsub.f32 %v4922_v59, %v1481_v39  ;;  %3460 = vpow2.f32 %v1502_v36  ;;  %v5685_v39 = vpack.c.bf16 %v4036_v38, %v4033_v37  ;;  %v5688_v37 = vpack.c.bf16 %v4052_v56, %v4049_v55  ;;  %v5695_v55 = vld [vmem:[#allocation10_spill] sm:$0xff]  ;;  %v5696_v56 = vld [vmem:[#allocation9_spill] sm:$0xff] }
 0x3f2   :  { %v5689_v38 = vpack.c.bf16 %v4070_v14, %v4067_v6  ;;  %v5697_v6 = vpack.c.bf16 %v5695_v55, %v5696_v56  ;;  %v5698_v14 = vld [vmem:[#allocation12_spill] sm:$0xff]  ;;  %v5727_v55 = vld [vmem:[#allocation31_spill] sm:$0xff]  ;;  %v5728_v56 = vld [vmem:[#allocation30_spill] sm:$0xff] }
 0x3f3   :  { %v1504_v4 = vmul.f32 1.442695, %v1491_v10 }
 0x3f5   :  { %3462 = vpow2.f32 %v1504_v4  ;;  %v5686_v4 = vpack.c.bf16 %v4046_v52, %v4043_v47  ;;  %v5690_v52 = vld [vmem:[#allocation6_spill] sm:$0xff] }
 0x3fe   :  { %v4987_v12 = vpop.eup %3460 }
 0x402   :  { %v4989_v34 = vpop.eup %3462 }
 0x403   :  { %v1528_v50 = vpack.c.bf16 %v4989_v34, %v4987_v12 }
 0x405   :  { %3180 = vmatprep.mubr.bf16.mxu0 %v1528_v50  ;;  %v5693_v50 = vld [vmem:[#allocation7_spill] sm:$0xff] }
 0x42c   :  { %v1483_v28 = vpop.xlane.xlu0 %1482 }
 0x42d   :  { %v1492_v20 = vsub.f32 %v4932_v58, %v1483_v28 }
 0x42f   :  { %v1506_v0 = vmul.f32 1.442695, %v1492_v20  ;;  %v5699_v20 = vld [vmem:[#allocation11_spill] sm:$0xff] }
 0x430   :  { %v1485_v53 = vpop.xlane.xlu1 %1484 }
 0x431   :  { %v1493_v8 = vsub.f32 %v4936_v9, %v1485_v53  ;;  %3464 = vpow2.f32 %v1506_v0  ;;  %v5700_v0 = vpack.c.bf16 %v5698_v14, %v5699_v20  ;;  %v5702_v53 = vld [vmem:[#allocation13_spill] sm:$0xff]  ;;  %v5731_v20 = vld [vmem:[#allocation32_spill] sm:$0xff] }
 0x432   :  { %v5730_v14 = vld [vmem:[#allocation33_spill] sm:$0xff] }
 0x433   :  { %v1508_v32 = vmul.f32 1.442695, %v1493_v8 }
 0x435   :  { %3466 = vpow2.f32 %v1508_v32  ;;  %v5704_v32 = vld [vmem:[#allocation16_spill] sm:$0xff] }
 0x43e   :  { %v4995_v59 = vpop.eup %3464 }
 0x442   :  { %v4997_v48 = vpop.eup %3466 }
 0x443   :  { %v1529_v24 = vpack.c.bf16 %v4997_v48, %v4995_v59 }
 0x445   :  { %3181 = vmatmul.mubr.bf16.gmra.mxu0 %v1529_v24  ;;  %v5705_v24 = vld [vmem:[#allocation15_spill] sm:$0xff] }
 0x446   :  { %3220 = vmatprep.mubr.msk.bf16.mxu0 %vm3550_vm5, %v5639_v23 }
 0x46c   :  { %v3178_v62 = vpop.f32.mrf.mxu0 }
 0x46e   :  { %v1612_v58 = vpop.f32.mrf.mxu0 }
 0x46f   :  { %v1643_v57 = vmax.f32 %v1612_v58, 1e-20 }
 0x470   :  { %v3179_v41 = vpop.f32.mrf.mxu0 }
 0x471   :  { %3468 = vrcp.f32 %v1643_v57  ;;  %v1646_v47 = vmax.f32 %v3179_v41, 1e-20  ;;  %v5707_v57 = vld [vmem:[#allocation18_spill] sm:$0xff]  ;;  %v5708_v41 = vld [vmem:[#allocation17_spill] sm:$0xff] }
 0x472   :  { %v1615_v9 = vpop.f32.mrf.mxu0 }
 0x473   :  { %v1644_v3 = vmax.f32 %v1615_v9, 1e-20  ;;  %v5709_v9 = vpack.c.bf16 %v5707_v57, %v5708_v41  ;;  %v5740_v57 = vld [vmem:[#allocation38_spill] sm:$0xff] }
 0x475   :  { %3470 = vrcp.f32 %v1644_v3  ;;  %v5710_v3 = vld [vmem:[#allocation20_spill] sm:$0xff] }
 0x47e   :  { %v3469_v33 = vpop.eup %3468 }
 0x47f   :  { %v1659_v26 = vmul.f32 %v3469_v33, %v4925_v54  ;;  %v5687_v54 = vpack.c.bf16 %v4060_v51, %v4057_v63  ;;  %v5691_v63 = vpack.c.bf16 %v4076_v11, %v5690_v52  ;;  %v5692_v51 = vld [vmem:[#allocation8_spill] sm:$0xff]  ;;  %v5701_v11 = vld [vmem:[#allocation14_spill] sm:$0xff]  ;;  %v5711_v33 = vld [vmem:[#allocation19_spill] sm:$0xff] }
 0x480   :  { %v5694_v28 = vpack.c.bf16 %v5692_v51, %v5693_v50  ;;  %v5703_v8 = vpack.c.bf16 %v5701_v11, %v5702_v53  ;;  %v5721_v52 = vld [vmem:[#allocation27_spill] sm:$0xff]  ;;  %v5724_v50 = vld [vmem:[#allocation29_spill] sm:$0xff]  ;;  %v5734_v53 = vld [vmem:[#allocation34_spill] sm:$0xff] }
 0x481   :  { %v1667_v45 = vpack.c.bf16 %v1659_v26, %v1659_v26  ;;  %v5712_v26 = vpack.c.bf16 %v5710_v3, %v5711_v33  ;;  %v5733_v11 = vld [vmem:[#allocation35_spill] sm:$0xff]  ;;  %v5743_v3 = vld [vmem:[#allocation40_spill] sm:$0xff] }
 0x482   :  { %v3471_v40 = vpop.eup %3470 }
 0x483   :  { %3201 = vmatmul.mubr.bf16.vlgmr.msra.gmra.mxu1 %v1667_v45  ;;  %v1660_v36 = vmul.f32 %v3471_v40, %v4927_v25  ;;  %v1645_v25 = vmax.f32 %v3178_v62, 1e-20  ;;  %v5706_v62 = vpack.c.bf16 %v5704_v32, %v5705_v24  ;;  %v5736_v32 = vld [vmem:[#allocation37_spill] sm:$0xff]  ;;  %v5737_v24 = vld [vmem:[#allocation36_spill] sm:$0xff] }
 0x484   :  { %3225 = vmatpush3.bf16.msra.mxu1 %v5685_v39  ;;  %3240 = vmatprep.mubr.msk.bf16.mxu1 %vm3550_vm5, %v5639_v23 }
 0x485   :  { %3226 = vmatprep.subr.bf16.mxu1 %v5639_v23  ;;  %v1668_v10 = vpack.c.bf16 %v1660_v36, %v1660_v36  ;;  %3472 = vrcp.f32 %v1645_v25  ;;  %v5713_v36 = vld [vmem:[#allocation21_spill] sm:$0xff] }
 0x486   :  { %3474 = vrcp.f32 %v1646_v47  ;;  %v5714_v39 = vpack.c.bf16 %v4140_v30, %v5713_v36  ;;  %v5719_v47 = vld [vmem:[#allocation24_spill] sm:$0xff]  ;;  %v5748_v36 = vld [vmem:[#allocation45_spill] sm:$0xff] }
 0x487   :  { %3221 = vmatmul.mubr.bf16.vlgmr.msra.gmra.mxu0 %v1668_v10  ;;  %v5715_v10 = vld [vmem:[#allocation23_spill] sm:$0xff] }
 0x488   :  { %3227 = vmatpush3.bf16.msra.mxu1 %v5686_v4  ;;  %3245 = vmatpush3.bf16.msra.mxu0 %v5687_v54  ;;  %v5716_v4 = vld [vmem:[#allocation22_spill] sm:$0xff] }
 0x489   :  { %3228 = vmatprep.subr.bf16.mxu1 %v5639_v23  ;;  %3246 = vmatprep.subr.bf16.mxu0 %v5639_v23  ;;  %v5717_v54 = vpack.c.bf16 %v5715_v10, %v5716_v4  ;;  %v5751_v4 = vld [vmem:[#allocation47_spill] sm:$0xff] }
 0x48a   :  { %3260 = vmatprep.mubr.msk.bf16.mxu0 %vm3550_vm5, %v5639_v23 }
 0x48c   :  { %3229 = vmatpush3.bf16.msra.mxu1 %v5688_v37  ;;  %3247 = vmatpush3.bf16.msra.mxu0 %v5689_v38  ;;  %v5718_v38 = vld [vmem:[#allocation25_spill] sm:$0xff] }
 0x48d   :  { %3230 = vmatprep.subr.bf16.mxu1 %v5639_v23  ;;  %3248 = vmatprep.subr.bf16.mxu0 %v5639_v23 }
 0x490   :  { %3231 = vmatpush3.bf16.msra.mxu1 %v5691_v63  ;;  %3249 = vmatpush3.bf16.msra.mxu0 %v5694_v28  ;;  %v5722_v63 = vld [vmem:[#allocation26_spill] sm:$0xff] }
 0x491   :  { %3232 = vmatprep.subr.bf16.mxu1 %v5639_v23  ;;  %3250 = vmatprep.subr.bf16.mxu0 %v5639_v23  ;;  %v5723_v30 = vpack.c.bf16 %v5721_v52, %v5722_v63  ;;  %v5758_v52 = vld [vmem:[#allocation50_spill] sm:$0xff] }
 0x492   :  { %v3473_v58 = vpop.eup %3472 }
 0x493   :  { %v1661_v45 = vmul.f32 %v3473_v58, %v4943_v7  ;;  %v3475_v40 = vpop.eup %3474  ;;  %v5720_v7 = vpack.c.bf16 %v5718_v38, %v5719_v47  ;;  %v5739_v58 = vld [vmem:[#allocation39_spill] sm:$0xff]  ;;  %v5755_v38 = vld [vmem:[#allocation48_spill] sm:$0xff] }
 0x494   :  { %3233 = vmatpush3.bf16.msra.mxu1 %v5697_v6  ;;  %3251 = vmatpush3.bf16.msra.mxu0 %v5700_v0  ;;  %v1662_v37 = vmul.f32 %v3475_v40, %v4945_v44  ;;  %v5725_v44 = vld [vmem:[#allocation28_spill] sm:$0xff]  ;;  %v5729_v6 = vpack.c.bf16 %v5727_v55, %v5728_v56  ;;  %v5732_v0 = vpack.c.bf16 %v5730_v14, %v5731_v20  ;;  %v5766_v56 = vld [vmem:[#allocation57_spill] sm:$0xff] }
 0x495   :  { %3234 = vmatprep.subr.bf16.mxu1 %v5639_v23  ;;  %3252 = vmatprep.subr.bf16.mxu0 %v5639_v23  ;;  %v1669_v25 = vpack.c.bf16 %v1661_v45, %v1661_v45  ;;  %v5726_v28 = vpack.c.bf16 %v5724_v50, %v5725_v44  ;;  %v5741_v41 = vpack.c.bf16 %v5739_v58, %v5740_v57  ;;  %v5746_v45 = vld [vmem:[#allocation42_spill] sm:$0xff]  ;;  %v5763_v44 = vld [vmem:[#allocation55_spill] sm:$0xff] }
 0x496   :  { %v1670_v51 = vpack.c.bf16 %v1662_v37, %v1662_v37  ;;  %v5754_v37 = vld [vmem:[#allocation49_spill] sm:$0xff] }
 0x497   :  { %v5756_v47 = vpack.c.bf16 %v5754_v37, %v5755_v38 }
 0x498   :  { %3235 = vmatpush3.bf16.msra.mxu1 %v5703_v8  ;;  %3253 = vmatpush3.bf16.msra.mxu0 %v5706_v62  ;;  %v5735_v8 = vpack.c.bf16 %v5733_v11, %v5734_v53  ;;  %v5738_v62 = vpack.c.bf16 %v5736_v32, %v5737_v24 }
 0x499   :  { %3236 = vmatprep.subr.bf16.mxu1 %v5639_v23  ;;  %3254 = vmatprep.subr.bf16.mxu0 %v5639_v23 }
 0x49c   :  { %3237 = vmatpush3.bf16.msra.mxu1 %v5709_v9  ;;  %3255 = vmatpush3.bf16.msra.mxu0 %v5712_v26  ;;  %v5742_v9 = vld [vmem:[#allocation41_spill] sm:$0xff]  ;;  %v5745_v26 = vld [vmem:[#allocation43_spill] sm:$0xff] }
 0x49d   :  { %3238 = vmatprep.subr.bf16.mxu1 %v5639_v23  ;;  %3256 = vmatprep.subr.bf16.mxu0 %v5639_v23  ;;  %v5744_v33 = vpack.c.bf16 %v5742_v9, %v5743_v3  ;;  %v5747_v40 = vpack.c.bf16 %v5745_v26, %v5746_v45  ;;  %v769_v9 = vmul.f32 %v4624_v22, %v4793_v19  ;;  %v5770_v26 = vld [vmem:[#allocation58_spill] sm:$0xff] }
 0x49e   :  { %v767_v22 = vmul.f32 %v4652_v29, %v4793_v19  ;;  %v5775_v29 = vld [vmem:[#allocation63_spill] sm:$0xff] }
 0x4a0   :  { %3239 = vmatpush3.bf16.msra.mxu1 %v5714_v39  ;;  %3257 = vmatpush3.bf16.msra.mxu0 %v5717_v54  ;;  %v5749_v39 = vld [vmem:[#allocation44_spill] sm:$0xff]  ;;  %v5752_v54 = vld [vmem:[#allocation46_spill] sm:$0xff] }
 0x4a1   :  { %3258 = vmatprep.subr.bf16.mxu0 %v5639_v23  ;;  %3264 = vmatprep.subr.bf16.mxu1 %v5639_v23  ;;  %v5750_v10 = vpack.c.bf16 %v5748_v36, %v5749_v39  ;;  %v5772_v36 = vld [vmem:[#allocation61_spill] sm:$0xff] }
 0x4a3   :  { %3241 = vmatmul.mubr.bf16.vlgmr.msra.gmra.mxu1 %v1669_v25  ;;  %v5753_v25 = vpack.c.bf16 %v5751_v4, %v5752_v54  ;;  %v764_v54 = vmul.f32 %v4672_v42, %v4612_v46  ;;  %v762_v42 = vmul.f32 %v4693_v31, %v4612_v46  ;;  %v761_v31 = vmul.f32 %v4722_v16, %v4793_v19 }
 0x4a4   :  { %3259 = vmatpush3.bf16.msra.mxu0 %v5720_v7  ;;  %3265 = vmatpush3.bf16.msra.mxu1 %v5723_v30  ;;  %v5757_v7 = vld [vmem:[#allocation51_spill] sm:$0xff]  ;;  %v5760_v30 = vld [vmem:[#allocation53_spill] sm:$0xff] }
 0x4a5   :  { %3266 = vmatprep.subr.bf16.mxu1 %v5639_v23  ;;  %3284 = vmatprep.subr.bf16.mxu0 %v5639_v23  ;;  %v5759_v63 = vpack.c.bf16 %v5757_v7, %v5758_v52  ;;  %v5778_v7 = vld [vmem:[#allocation65_spill] sm:$0xff]  ;;  %v5779_v52 = vld [vmem:[#allocation64_spill] sm:$0xff] }
 0x4a6   :  { %3280 = vmatprep.mubr.msk.bf16.mxu1 %vm3550_vm5, %v5639_v23 }
 0x4a7   :  { %3261 = vmatmul.mubr.bf16.vlgmr.msra.gmra.mxu0 %v1670_v51  ;;  %v5761_v51 = vld [vmem:[#allocation52_spill] sm:$0xff] }
 0x4a8   :  { %3267 = vmatpush3.bf16.msra.mxu1 %v5726_v28  ;;  %3285 = vmatpush3.bf16.msra.mxu0 %v5729_v6  ;;  %v5762_v50 = vpack.c.bf16 %v5760_v30, %v5761_v51  ;;  %v5764_v28 = vld [vmem:[#allocation54_spill] sm:$0xff]  ;;  %v5767_v6 = vld [vmem:[#allocation56_spill] sm:$0xff]  ;;  %v760_v51 = vmul.f32 %v4715_v21, %v4612_v46  ;;  %v5784_v21 = vld [vmem:[#allocation69_spill] sm:$0xff] }
 0x4a9   :  { %3268 = vmatprep.subr.bf16.mxu1 %v5639_v23  ;;  %3286 = vmatprep.subr.bf16.mxu0 %v5639_v23  ;;  %v5765_v55 = vpack.c.bf16 %v5763_v44, %v5764_v28  ;;  %v5768_v14 = vpack.c.bf16 %v5766_v56, %v5767_v6  ;;  %v5782_v44 = vld [vmem:[#allocation66_spill] sm:$0xff]  ;;  %v759_v56 = vmul.f32 %v4754_v35, %v4793_v19  ;;  %v5785_v6 = vld [vmem:[#allocation68_spill] sm:$0xff] }
 0x4aa   :  { %3300 = vmatprep.mubr.msk.bf16.mxu0 %vm3550_vm5, %v5639_v23  ;;  %v1734_v28 = vpack.c.bf16 %v761_v31, %v760_v51  ;;  %v5787_v35 = vpack.c.bf16 %v4463_v18, %v4458_v27  ;;  %v755_v27 = vmul.f32 %v4817_v1, %v4793_v19  ;;  %v5788_v18 = vld [vmem:[#allocation70_spill] sm:$0xff]  ;;  %v3428_v1 = vld [vmem:[%s5544_s7 + $0x8] sm:$0xff]  }
 0x4ac   :  { %3269 = vmatpush3.bf16.msra.mxu1 %v5732_v0  ;;  %3287 = vmatpush3.bf16.msra.mxu0 %v5735_v8 }
 0x4ad   :  { %3270 = vmatprep.subr.bf16.mxu1 %v5639_v23  ;;  %3288 = vmatprep.subr.bf16.mxu0 %v5639_v23 }
 0x4b0   :  { %3271 = vmatpush3.bf16.msra.mxu1 %v5738_v62  ;;  %3289 = vmatpush3.bf16.msra.mxu0 %v5741_v41  ;;  %v768_v41 = vmul.f32 %v4617_v61, %v4612_v46  ;;  %v766_v61 = vmul.f32 %v4642_v2, %v4612_v46  ;;  %v765_v2 = vmul.f32 %v4679_v43, %v4793_v19 }
 0x4b1   :  { %3272 = vmatprep.subr.bf16.mxu1 %v5639_v23  ;;  %3290 = vmatprep.subr.bf16.mxu0 %v5639_v23  ;;  %v763_v43 = vmul.f32 %v4700_v60, %v4793_v19 }
 0x4b2   :  { %v1737_v4 = vpack.c.bf16 %v767_v22, %v766_v61 }
 0x4b3   :  { %v1735_v30 = vpack.c.bf16 %v763_v43, %v762_v42 }
 0x4b4   :  { %3273 = vmatpush3.bf16.msra.mxu1 %v5744_v33  ;;  %3291 = vmatpush3.bf16.msra.mxu0 %v5747_v40  ;;  %v5769_v33 = vld [vmem:[#allocation59_spill] sm:$0xff]  ;;  %v1738_v40 = vpack.c.bf16 %v769_v9, %v768_v41 }
 0x4b5   :  { %3274 = vmatprep.subr.bf16.mxu1 %v5639_v23  ;;  %3292 = vmatprep.subr.bf16.mxu0 %v5639_v23  ;;  %v5771_v45 = vpack.c.bf16 %v5769_v33, %v5770_v26  ;;  %v3429_v33 = vld [vmem:[%s5544_s7] sm:$0xff]  }
 0x4b8   :  { %3275 = vmatpush3.bf16.msra.mxu1 %v5750_v10  ;;  %3293 = vmatpush3.bf16.msra.mxu0 %v5753_v25  ;;  %v5776_v25 = vld [vmem:[#allocation62_spill] sm:$0xff] }
 0x4b9   :  { %3276 = vmatprep.subr.bf16.mxu1 %v5639_v23  ;;  %3294 = vmatprep.subr.bf16.mxu0 %v5639_v23  ;;  %v5777_v37 = vpack.c.bf16 %v5775_v29, %v5776_v25 }
 0x4bc   :  { %3277 = vmatpush3.bf16.msra.mxu1 %v5756_v47  ;;  %3295 = vmatpush3.bf16.msra.mxu0 %v5759_v63  ;;  %v1736_v47 = vpack.c.bf16 %v765_v2, %v764_v54  ;;  %v5780_v63 = vpack.c.bf16 %v5778_v7, %v5779_v52 }
 0x4bd   :  { %3278 = vmatprep.subr.bf16.mxu1 %v5639_v23  ;;  %3296 = vmatprep.subr.bf16.mxu0 %v5639_v23 }
 0x4c0   :  { %3279 = vmatpush3.bf16.msra.mxu1 %v5762_v50  ;;  %3297 = vmatpush3.bf16.msra.mxu0 %v5765_v55  ;;  %v5781_v50 = vld [vmem:[#allocation67_spill] sm:$0xff]  ;;  %v758_v55 = vmul.f32 %v4747_v49, %v4612_v46  ;;  %v757_v49 = vmul.f32 %v4784_v15, %v4793_v19  ;;  %v754_v15 = vmul.f32 %v4810_v5, %v4612_v46 }
 0x4c1   :  { %3298 = vmatprep.subr.bf16.mxu0 %v5639_v23  ;;  %3304 = vmatprep.subr.bf16.mxu1 %v5639_v23  ;;  %v5783_v60 = vpack.c.bf16 %v5781_v50, %v5782_v44 }
 0x4c4   :  { %3299 = vmatpush3.bf16.msra.mxu0 %v5768_v14  ;;  %v5786_v14 = vpack.c.bf16 %v5784_v21, %v5785_v6 }
 0x4c5   :  { %3324 = vmatprep.subr.bf16.mxu0 %v5639_v23 }
 0x505   :  { %v3182_v20 = vpop.f32.mrf.mxu0 }
 0x506   :  { %v1649_v10 = vmax.f32 %v3182_v20, 1e-20  ;;  %v1733_v20 = vpack.c.bf16 %v759_v56, %v758_v55  ;;  %v5247_v56 = vld [vmem:[%s5547_s10] sm:$0xff]  ;;  %s3525_s10 = scalar_lea.vmem %s2733_s29, 256 }
 0x507   :  { %v1628_v0 = vpop.f32.mrf.mxu0  ;;  %p3526_p0 = scmp.ne.s32.totalorder %s2733_s29, %s3525_s10  ;;  %p3531_p2 = scmp.lt.s32.totalorder %s3525_s10, %s3525_s10 }
 0x508   :  { %v1647_v11 = vmax.f32 %v1628_v0, 1e-20  ;;  %v756_v0 = vmul.f32 %v4777_v13, %v4612_v46 }
 0x509   :  { %v3183_v53 = vpop.f32.mrf.mxu0  ;;  %p3532_p3 = por %p3531_p2, %p3530_p1 }
 0x50a   :  { %3476 = vrcp.f32 %v1647_v11  ;;  %v1650_v38 = vmax.f32 %v3183_v53, 1e-20  ;;  %v3424_v53 = vld [vmem:[%s5544_s7 + $0x28] sm:$0xff]   ;;  %v1732_v13 = vpack.c.bf16 %v757_v49, %v756_v0  ;;  %v3517_v49 = vld [vmem:[%s5537_s0] sm:$0xff] }
 0x50b   :  { %v1631_v8 = vpop.f32.mrf.mxu0  ;;  %p3533_p4 = pnand %p3532_p3, %p3526_p0 }
 0x50c   :  { %v1648_v32 = vmax.f32 %v1631_v8, 1e-20 }
 0x50e   :  { %3478 = vrcp.f32 %v1648_v32  ;;  %v5789_v32 = vpack.c.bf16 %v4470_v17, %v5788_v18  ;;  %v3426_v17 = vld [vmem:[%s5544_s7 + $0x18] sm:$0xff]   ;;  %v3519_v18 = vld [vmem:[%s5537_s0 + $0x8] sm:$0xff] }
 0x50f   :  { %3480 = vrcp.f32 %v1649_v10 }
 0x510   :  { %3482 = vrcp.f32 %v1650_v38 }
 0x517   :  { %v3477_v24 = vpop.eup %3476 }
 0x518   :  { %v1663_v62 = vmul.f32 %v3477_v24, %v4987_v12 }
 0x51a   :  { %v1671_v58 = vpack.c.bf16 %v1663_v62, %v1663_v62  ;;  %v3425_v62 = vld [vmem:[%s5544_s7 + $0x20] sm:$0xff]  }
 0x51b   :  { %v3479_v57 = vpop.eup %3478 }
 0x51c   :  { %3281 = vmatmul.mubr.bf16.vlgmr.msra.gmra.mxu1 %v1671_v58  ;;  %v1664_v3 = vmul.f32 %v3479_v57, %v4989_v34  ;;  %v5773_v34 = vld [vmem:[#allocation60_spill] sm:$0xff]  ;;  %v3481_v16 = vpop.eup %3480  ;;  %v1731_v58 = vpack.c.bf16 %v755_v27, %v754_v15  ;;  %v3518_v15 = vld [vmem:[%s5537_s0 + $0x10] sm:$0xff] }
 0x51d   :  { %3305 = vmatpush3.bf16.msra.mxu1 %v5771_v45  ;;  %3320 = vmatprep.mubr.msk.bf16.mxu1 %vm3550_vm5, %v5639_v23  ;;  %v5774_v39 = vpack.c.bf16 %v5772_v36, %v5773_v34  ;;  %v1665_v11 = vmul.f32 %v3481_v16, %v4995_v59  ;;  %v3483_v8 = vpop.eup %3482 }
 0x51e   :  { %3306 = vmatprep.subr.bf16.mxu1 %v5639_v23  ;;  %v1672_v12 = vpack.c.bf16 %v1664_v3, %v1664_v3  ;;  %v1666_v59 = vmul.f32 %v3483_v8, %v4997_v48 }
 0x51f   :  { %v1673_v24 = vpack.c.bf16 %v1665_v11, %v1665_v11 }
 0x520   :  { %3301 = vmatmul.mubr.bf16.vlgmr.msra.gmra.mxu0 %v1672_v12  ;;  %v1674_v46 = vpack.c.bf16 %v1666_v59, %v1666_v59 }
 0x521   :  { %3307 = vmatpush3.bf16.msra.mxu1 %v5774_v39  ;;  %3325 = vmatpush3.bf16.msra.mxu0 %v1738_v40 }
 0x522   :  { %3308 = vmatprep.subr.bf16.mxu1 %v5639_v23  ;;  %3326 = vmatprep.subr.bf16.mxu0 %v5639_v23 }
 0x523   :  { %3340 = vmatprep.mubr.msk.bf16.mxu0 %vm3550_vm5, %v5639_v23 }
 0x525   :  { %3309 = vmatpush3.bf16.msra.mxu1 %v5777_v37  ;;  %3327 = vmatpush3.bf16.msra.mxu0 %v1737_v4 }
 0x526   :  { %3310 = vmatprep.subr.bf16.mxu1 %v5639_v23  ;;  %3328 = vmatprep.subr.bf16.mxu0 %v5639_v23 }
 0x529   :  { %3311 = vmatpush3.bf16.msra.mxu1 %v5780_v63  ;;  %3329 = vmatpush3.bf16.msra.mxu0 %v1736_v47 }
 0x52a   :  { %3312 = vmatprep.subr.bf16.mxu1 %v5639_v23  ;;  %3330 = vmatprep.subr.bf16.mxu0 %v5639_v23 }
 0x52d   :  { %3313 = vmatpush3.bf16.msra.mxu1 %v5783_v60  ;;  %3331 = vmatpush3.bf16.msra.mxu0 %v1735_v30 }
 0x52e   :  { %3314 = vmatprep.subr.bf16.mxu1 %v5639_v23  ;;  %3332 = vmatprep.subr.bf16.mxu0 %v5639_v23 }
 0x531   :  { %3315 = vmatpush3.bf16.msra.mxu1 %v5786_v14  ;;  %3333 = vmatpush3.bf16.msra.mxu0 %v1734_v28  ;;  %v5790_v28 = vld [vmem:[#allocation5_spill] sm:$0xff] }
 0x532   :  { %3316 = vmatprep.subr.bf16.mxu1 %v5639_v23  ;;  %3334 = vmatprep.subr.bf16.mxu0 %v5639_v23  ;;  %v2077_v55 = vsub.s32 5, %v5790_v28 }
 0x534   :  { %v2078_v21 = vrot.slane %v5247_v56, %v2077_v55  ;;  %v3430_v55 = vld [vmem:[%s5545_s8 + $0x8] sm:$0xff]  }
 0x535   :  { %3317 = vmatpush3.bf16.msra.mxu1 %v5787_v35  ;;  %3335 = vmatpush3.bf16.msra.mxu0 %v1733_v20 }
 0x536   :  { %3318 = vmatprep.subr.bf16.mxu1 %v5639_v23  ;;  %3336 = vmatprep.subr.bf16.mxu0 %v5639_v23 }
 0x539   :  { %3319 = vmatpush3.bf16.msra.mxu1 %v5789_v32  ;;  %3337 = vmatpush3.bf16.msra.mxu0 %v1732_v13 }
 0x53a   :  { %3338 = vmatprep.subr.bf16.mxu0 %v5639_v23  ;;  %3344 = vmatprep.subr.bf16.mxu1 %v3424_v53  ;;  %v3427_v23 = vld [vmem:[%s5544_s7 + $0x10] sm:$0xff]  }
 0x53c   :  { %3321 = vmatmul.mubr.bf16.vlgmr.msra.gmra.mxu1 %v1673_v24 }
 0x53d   :  { %3339 = vmatpush3.bf16.msra.mxu0 %v1731_v58  ;;  %3345 = vmatpush3.bf16.msra.mxu1 %v3424_v53 }
 0x53e   :  { %3346 = vmatprep.subr.bf16.mxu1 %v3425_v62  ;;  %3364 = vmatprep.subr.bf16.mxu0 %v3430_v55 }
 0x540   :  { %3341 = vmatmul.mubr.bf16.vlgmr.msra.gmra.mxu0 %v1674_v46 }
 0x541   :  { %3347 = vmatpush3.bf16.msra.mxu1 %v3425_v62  ;;  %v3520_v62 = vld [vmem:[%s5537_s0 + $0x18] sm:$0xff]  ;;  %3365 = vmatpush3.bf16.msra.mxu0 %v3430_v55 }
 0x542   :  { %3348 = vmatprep.subr.bf16.mxu1 %v3426_v17 }
 0x543   :  { %v1773_v19 = vpop.f32.mrf.mxu1 }
 0x545   :  { %v3202_v5 = vpop.f32.mrf.mxu1  ;;  %3349 = vmatpush3.bf16.msra.mxu1 %v3426_v17 }
 0x546   :  { %3350 = vmatprep.subr.bf16.mxu1 %v3427_v23 }
 0x547   :  { %v1776_v48 = vpop.f32.mrf.mxu1  ;;  %v1813_v57 = vpop.f32.mrf.mxu0 }
 0x548   :  { %v2071_v41 = vpack.c.bf16 %v1813_v57, %v1773_v19 }
 0x549   :  { %v3203_v9 = vpop.f32.mrf.mxu1  ;;  %v3222_v3 = vpop.f32.mrf.mxu0  ;;  %3351 = vmatpush3.bf16.msra.mxu1 %v3427_v23 }
 0x54a   :  { %3356 = vmatprep.mubr.msk.bf16.mxu1 %vm933_vm4, %v2071_v41  ;;  %3352 = vmatprep.subr.bf16.mxu1 %v3428_v1  ;;  %v3521_v3 = vld [vmem:[%s5537_s0 + $0x20] sm:$0xff] }
 0x54b   :  { %v1816_v26 = vpop.f32.mrf.mxu0 }
 0x54d   :  { %v3223_v45 = vpop.f32.mrf.mxu0  ;;  %3353 = vmatpush3.bf16.msra.mxu1 %v3428_v1 }
 0x54e   :  { %3354 = vmatprep.subr.bf16.mxu1 %v3429_v33 }
 0x551   :  { %3355 = vmatpush3.bf16.msra.mxu1 %v3429_v33 }
 0x563   :  { %v1853_v12 = vpop.f32.mrf.mxu1 }
 0x565   :  { %v3242_v40 = vpop.f32.mrf.mxu1 }
 0x567   :  { %v1856_v61 = vpop.f32.mrf.mxu1  ;;  %v1893_v22 = vpop.f32.mrf.mxu0 }
 0x568   :  { %v2072_v36 = vpack.c.bf16 %v1893_v22, %v1853_v12 }
 0x569   :  { %v3243_v34 = vpop.f32.mrf.mxu1  ;;  %v3262_v39 = vpop.f32.mrf.mxu0 }
 0x56a   :  { %3357 = vmatmul.mubr.msk.bf16.vlgmr.msra.gmra.mxu1 %vm933_vm4, %v2072_v36  ;;  %v3522_v34 = vld [vmem:[%s5537_s0 + $0x30] sm:$0xff] }
 0x56b   :  { %v1896_v10 = vpop.f32.mrf.mxu0 }
 0x56d   :  { %v3263_v4 = vpop.f32.mrf.mxu0 }
 0x56e   :  { %v3523_v4 = vld [vmem:[%s5537_s0 + $0x28] sm:$0xff] }
 0x5dc   :  { %v1933_v54 = vpop.f32.mrf.mxu1 }
 0x5de   :  { %v3282_v2 = vpop.f32.mrf.mxu1 }
 0x5e0   :  { %v1936_v29 = vpop.f32.mrf.mxu1  ;;  %v1973_v25 = vpop.f32.mrf.mxu0 }
 0x5e1   :  { %v2073_v37 = vpack.c.bf16 %v1973_v25, %v1933_v54 }
 0x5e2   :  { %v3283_v38 = vpop.f32.mrf.mxu1  ;;  %v3302_v47 = vpop.f32.mrf.mxu0 }
 0x5e3   :  { %3360 = vmatprep.mubr.msk.bf16.mxu1 %vm933_vm4, %v2073_v37 }
 0x5e4   :  { %v1976_v42 = vpop.f32.mrf.mxu0 }
 0x5e5   :  { %v3524_v42 = vld [vmem:[%s5537_s0 + $0x38] sm:$0xff] }
 0x5e6   :  { %v3303_v43 = vpop.f32.mrf.mxu0 }
 0x5fc   :  { %v2013_v7 = vpop.f32.mrf.mxu1 }
 0x5fe   :  { %v3322_v52 = vpop.f32.mrf.mxu1 }
 0x600   :  { %v2016_v63 = vpop.f32.mrf.mxu1  ;;  %v2053_v30 = vpop.f32.mrf.mxu0 }
 0x601   :  { %v2074_v51 = vpack.c.bf16 %v2053_v30, %v2013_v7 }
 0x602   :  { %v3323_v31 = vpop.f32.mrf.mxu1  ;;  %v3342_v50 = vpop.f32.mrf.mxu0 }
 0x603   :  { %3361 = vmatmul.mubr.msk.bf16.gmra.mxu1 %vm933_vm4, %v2074_v51 }
 0x604   :  { %v2056_v44 = vpop.f32.mrf.mxu0 }
 0x606   :  { %v3343_v60 = vpop.f32.mrf.mxu0 }
 0x62a   :  { %v3358_v6 = vpop.f32.mrf.mxu1 }
 0x62b   :  { %v2170_v16 = vadd.f32 %v3358_v6, %v2078_v21 }
 0x62c   :  { %v2161_v14 = vpop.f32.mrf.mxu1 }
 0x62d   :  { %v2162_v20 = vadd.f32 %v2161_v14, %v2078_v21  ;;  %v2194_v27 = vadd.f32 %v3518_v15, %v2170_v16 }
 0x62e   :  { %v3359_v0 = vpop.f32.mrf.mxu1 }
 0x62f   :  { %v2192_v35 = vadd.f32 %v3517_v49, %v2162_v20  ;;  %v2173_v53 = vadd.f32 %v3359_v0, %v2078_v21  ;;  %v2206_v59 = vsel %vm49_vm0, %v2194_v27, 0.0 }
 0x630   :  { %v2164_v11 = vpop.f32.mrf.mxu1 }
 0x631   :  { %v2165_v8 = vadd.f32 %v2164_v11, %v2078_v21  ;;  %v2200_v13 = vsel %vm49_vm0, %v2192_v35, 0.0  ;;  %v2195_v58 = vadd.f32 %v3520_v62, %v2173_v53 }
 0x632   :  { %2201 = vadd.xlane.f32.xlu0 %v2200_v13 }
 0x633   :  { %v2193_v32 = vadd.f32 %v3519_v18, %v2165_v8  ;;  %v2209_v46 = vsel %vm49_vm0, %v2195_v58, 0.0 }
 0x635   :  { %v2203_v24 = vsel %vm49_vm0, %v2193_v32, 0.0 }
 0x636   :  { %2204 = vadd.xlane.f32.xlu1 %v2203_v24  ;;  %2207 = vadd.xlane.f32.xlu0 %v2206_v59 }
 0x63a   :  { %2210 = vadd.xlane.f32.xlu1 %v2209_v46 }
 0x6bb   :  { %v2202_v17 = vpop.xlane.xlu0 %2201 }
 0x6bc   :  { %v2224_v19 = vmul.f32 0.03125, %v2202_v17 }
 0x6be   :  { %v5269_v26 = vsub.f32 %v2192_v35, %v2224_v19 }
 0x6bf   :  { %v2205_v5 = vpop.xlane.xlu1 %2204  ;;  %v2208_v48 = vpop.xlane.xlu0 %2207 }
 0x6c0   :  { %v2225_v45 = vmul.f32 0.03125, %v2205_v5  ;;  %v2226_v12 = vmul.f32 0.03125, %v2208_v48  ;;  %v2240_v25 = vmul.f32 %v5269_v26, %v5269_v26 }
 0x6c2   :  { %v5278_v2 = vsub.f32 %v2193_v32, %v2225_v45  ;;  %v5280_v29 = vsub.f32 %v2194_v27, %v2226_v12  ;;  %v2248_v7 = vsel %vm49_vm0, %v2240_v25, 0.0  ;;  %v2306_v12 = vsub.s32 2, %v5790_v28 }
 0x6c3   :  { %v3362_v23 = vpop.f32.mrf.mxu1  ;;  %v2211_v10 = vpop.xlane.xlu1 %2210 }
 0x6c4   :  { %v2186_v57 = vadd.f32 %v3362_v23, %v2078_v21  ;;  %v2227_v37 = vmul.f32 0.03125, %v2211_v10  ;;  %v2241_v30 = vmul.f32 %v5278_v2, %v5278_v2  ;;  %v2242_v51 = vmul.f32 %v5280_v29, %v5280_v29 }
 0x6c5   :  { %v2177_v1 = vpop.f32.mrf.mxu1 }
 0x6c6   :  { %v2178_v41 = vadd.f32 %v2177_v1, %v2078_v21  ;;  %v2198_v39 = vadd.f32 %v3522_v34, %v2186_v57  ;;  %v5290_v52 = vsub.f32 %v2195_v58, %v2227_v37  ;;  %v2251_v31 = vsel %vm49_vm0, %v2241_v30, 0.0  ;;  %v3432_v30 = vld [vmem:[%s5546_s9 + $0x18] sm:$0xff]  }
 0x6c7   :  { %v3363_v9 = vpop.f32.mrf.mxu1  ;;  %v2254_v50 = vsel %vm49_vm0, %v2242_v51, 0.0  ;;  %3376 = vmatprep.subr.bf16.mxu1 %v3432_v30  ;;  %v3433_v51 = vld [vmem:[%s5546_s9 + $0x10] sm:$0xff]  }
 0x6c8   :  { %v2196_v33 = vadd.f32 %v3521_v3, %v2178_v41  ;;  %v2189_v61 = vadd.f32 %v3363_v9, %v2078_v21  ;;  %v2218_v47 = vsel %vm49_vm0, %v2198_v39, 0.0  ;;  %v2243_v44 = vmul.f32 %v5290_v52, %v5290_v52  ;;  %3377 = vmatpush3.bf16.msra.mxu1 %v3432_v30 }
 0x6c9   :  { %v2180_v40 = vpop.f32.mrf.mxu1  ;;  %3378 = vmatprep.subr.bf16.mxu1 %v3433_v51 }
 0x6ca   :  { %v2181_v22 = vadd.f32 %v2180_v40, %v2078_v21  ;;  %v2212_v36 = vsel %vm49_vm0, %v2196_v33, 0.0  ;;  %v2199_v43 = vadd.f32 %v3524_v42, %v2189_v61  ;;  %v2257_v60 = vsel %vm49_vm0, %v2243_v44, 0.0  ;;  %v3431_v21 = vld [vmem:[%s5545_s8] sm:$0xff]  }
 0x6cb   :  { %2213 = vadd.xlane.f32.xlu0 %v2212_v36  ;;  %3366 = vmatprep.subr.bf16.mxu0 %v3431_v21  ;;  %v2318_v36 = vsub.s32 3, %v5790_v28 }
 0x6cc   :  { %v2197_v54 = vadd.f32 %v3523_v4, %v2181_v22  ;;  %v2221_v63 = vsel %vm49_vm0, %v2199_v43, 0.0  ;;  %3367 = vmatpush3.bf16.msra.mxu0 %v3431_v21  ;;  %v5331_v22 = vrot.slane %v5247_v56, %v2306_v12  ;;  %3379 = vmatpush3.bf16.msra.mxu1 %v3433_v51 }
 0x6ce   :  { %v2215_v38 = vsel %vm49_vm0, %v2197_v54, 0.0 }
 0x6cf   :  { %2216 = vadd.xlane.f32.xlu1 %v2215_v38  ;;  %2219 = vadd.xlane.f32.xlu0 %v2218_v47 }
 0x6d3   :  { %2222 = vadd.xlane.f32.xlu1 %v2221_v63  ;;  %2249 = vadd.xlane.f32.xlu0 %v2248_v7 }
 0x6d7   :  { %2252 = vadd.xlane.f32.xlu1 %v2251_v31  ;;  %2255 = vadd.xlane.f32.xlu0 %v2254_v50  ;;  %v3434_v31 = vld [vmem:[%s5546_s9 + $0x8] sm:$0xff]   ;;  %v3435_v50 = vld [vmem:[%s5546_s9] sm:$0xff]   ;;  %s3552_s9 = smov 32  }
 0x6d8   :  { %3380 = vmatprep.subr.bf16.mxu1 %v3434_v31 }
 0x6d9   :  { %3381 = vmatpush3.bf16.msra.mxu1 %v3434_v31 }
 0x6da   :  { %3382 = vmatprep.subr.bf16.mxu1 %v3435_v50 }
 0x6db   :  { %2258 = vadd.xlane.f32.xlu1 %v2257_v60 }
 0x6dd   :  { %3383 = vmatpush3.bf16.msra.mxu1 %v3435_v50 }
 0x754   :  { %v2214_v6 = vpop.xlane.xlu0 %2213 }
 0x755   :  { %v2228_v14 = vmul.f32 0.03125, %v2214_v6 }
 0x757   :  { %v5308_v16 = vsub.f32 %v2196_v33, %v2228_v14 }
 0x758   :  { %v2217_v20 = vpop.xlane.xlu1 %2216  ;;  %v2220_v0 = vpop.xlane.xlu0 %2219 }
 0x759   :  { %v2229_v49 = vmul.f32 0.03125, %v2217_v20  ;;  %v2230_v35 = vmul.f32 0.03125, %v2220_v0  ;;  %v2244_v11 = vmul.f32 %v5308_v16, %v5308_v16 }
 0x75b   :  { %v5312_v53 = vsub.f32 %v2197_v54, %v2229_v49  ;;  %v5314_v8 = vsub.f32 %v2198_v39, %v2230_v35  ;;  %v2260_v13 = vsel %vm49_vm0, %v2244_v11, 0.0  ;;  %v2319_v54 = vrot.slane %v5247_v56, %v2318_v36 }
 0x75c   :  { %v2223_v15 = vpop.xlane.xlu1 %2222  ;;  %2261 = vadd.xlane.f32.xlu0 %v2260_v13  ;;  %v2250_v27 = vpop.xlane.xlu0 %2249 }
 0x75d   :  { %v2231_v18 = vmul.f32 0.03125, %v2223_v15  ;;  %v2272_v32 = vmul.f32 0.03125, %v2250_v27  ;;  %v2245_v24 = vmul.f32 %v5312_v53, %v5312_v53  ;;  %v2246_v59 = vmul.f32 %v5314_v8, %v5314_v8 }
 0x75f   :  { %v5321_v62 = vsub.f32 %v2199_v43, %v2231_v18  ;;  %v2280_v58 = vadd.f32 1e-05, %v2272_v32  ;;  %v2263_v46 = vsel %vm49_vm0, %v2245_v24, 0.0  ;;  %v2266_v17 = vsel %vm49_vm0, %v2246_v59, 0.0 }
 0x760   :  { %2264 = vadd.xlane.f32.xlu1 %v2263_v46  ;;  %v2253_v23 = vpop.xlane.xlu1 %2252  ;;  %2267 = vadd.xlane.f32.xlu0 %v2266_v17  ;;  %v2256_v19 = vpop.xlane.xlu0 %2255 }
 0x761   :  { %3484 = vrsqrt.f32 %v2280_v58  ;;  %v2273_v5 = vmul.f32 0.03125, %v2253_v23  ;;  %v2274_v1 = vmul.f32 0.03125, %v2256_v19  ;;  %v2247_v48 = vmul.f32 %v5321_v62, %v5321_v62 }
 0x763   :  { %v2281_v57 = vadd.f32 1e-05, %v2273_v5  ;;  %v2282_v41 = vadd.f32 1e-05, %v2274_v1  ;;  %v2269_v9 = vsel %vm49_vm0, %v2247_v48, 0.0 }
 0x764   :  { %2270 = vadd.xlane.f32.xlu1 %v2269_v9  ;;  %v2259_v3 = vpop.xlane.xlu1 %2258 }
 0x765   :  { %3486 = vrsqrt.f32 %v2281_v57  ;;  %v2275_v33 = vmul.f32 0.03125, %v2259_v3 }
 0x766   :  { %3488 = vrsqrt.f32 %v2282_v41 }
 0x767   :  { %v2283_v45 = vadd.f32 1e-05, %v2275_v33 }
 0x769   :  { %3490 = vrsqrt.f32 %v2283_v45 }
 0x76e   :  { %v3485_v40 = vpop.eup %3484 }
 0x76f   :  { %v2296_v61 = vmul.f32 %v3485_v40, %v5269_v26 }
 0x771   :  { %v2308_v4 = vmul.f32 %v5331_v22, %v2296_v61 }
 0x772   :  { %v3487_v34 = vpop.eup %3486 }
 0x773   :  { %v3489_v39 = vpop.eup %3488  ;;  %v2297_v10 = vmul.f32 %v3487_v34, %v5278_v2  ;;  %v5340_v47 = vadd.f32 %v2319_v54, %v2308_v4 }
 0x774   :  { %v2298_v25 = vmul.f32 %v3489_v39, %v5280_v29 }
 0x775   :  { %v2309_v37 = vmul.f32 %v5331_v22, %v2297_v10 }
 0x776   :  { %v3491_v38 = vpop.eup %3490  ;;  %v2310_v43 = vmul.f32 %v5331_v22, %v2298_v25 }
 0x777   :  { %v2299_v26 = vmul.f32 %v3491_v38, %v5290_v52  ;;  %v5342_v42 = vadd.f32 %v2319_v54, %v2309_v37 }
 0x778   :  { %v5349_v63 = vadd.f32 %v2319_v54, %v2310_v43 }
 0x779   :  { %v2332_v2 = vpack.c.bf16 %v5342_v42, %v5340_v47  ;;  %v2311_v7 = vmul.f32 %v5331_v22, %v2299_v26 }
 0x77b   :  { %3368 = vmatprep.mubr.msk.bf16.mxu0 %vm49_vm0, %v2332_v2  ;;  %v5351_v29 = vadd.f32 %v2319_v54, %v2311_v7 }
 0x77d   :  { %v2333_v52 = vpack.c.bf16 %v5351_v29, %v5349_v63 }
 0x77f   :  { %3369 = vmatmul.mubr.msk.bf16.vlgmr.msra.gmra.mxu0 %vm49_vm0, %v2333_v52 }
 0x7e5   :  { %v2262_v44 = vpop.xlane.xlu0 %2261 }
 0x7e6   :  { %v2276_v60 = vmul.f32 0.03125, %v2262_v44 }
 0x7e8   :  { %v2284_v55 = vadd.f32 1e-05, %v2276_v60 }
 0x7e9   :  { %v2265_v21 = vpop.xlane.xlu1 %2264  ;;  %v2268_v6 = vpop.xlane.xlu0 %2267 }
 0x7ea   :  { %3492 = vrsqrt.f32 %v2284_v55  ;;  %v2277_v14 = vmul.f32 0.03125, %v2265_v21  ;;  %v2278_v20 = vmul.f32 0.03125, %v2268_v6  ;;  %v2561_v6 = vsub.s32 7, %v5790_v28 }
 0x7ec   :  { %v2285_v0 = vadd.f32 1e-05, %v2277_v14  ;;  %v2286_v49 = vadd.f32 1e-05, %v2278_v20 }
 0x7ed   :  { %v2271_v35 = vpop.xlane.xlu1 %2270 }
 0x7ee   :  { %3494 = vrsqrt.f32 %v2285_v0  ;;  %v2279_v11 = vmul.f32 0.03125, %v2271_v35  ;;  %v5400_v35 = vrot.slane %v5247_v56, %v2561_v6 }
 0x7ef   :  { %3496 = vrsqrt.f32 %v2286_v49 }
 0x7f0   :  { %v2287_v13 = vadd.f32 1e-05, %v2279_v11 }
 0x7f2   :  { %3498 = vrsqrt.f32 %v2287_v13 }
 0x7f7   :  { %v3493_v15 = vpop.eup %3492 }
 0x7f8   :  { %v2300_v27 = vmul.f32 %v3493_v15, %v5308_v16 }
 0x7fa   :  { %v2312_v59 = vmul.f32 %v5331_v22, %v2300_v27 }
 0x7fb   :  { %v3495_v18 = vpop.eup %3494 }
 0x7fc   :  { %v3497_v32 = vpop.eup %3496  ;;  %v2301_v24 = vmul.f32 %v3495_v18, %v5312_v53  ;;  %v5373_v23 = vadd.f32 %v2319_v54, %v2312_v59 }
 0x7fd   :  { %v2302_v58 = vmul.f32 %v3497_v32, %v5314_v8 }
 0x7fe   :  { %v2313_v46 = vmul.f32 %v5331_v22, %v2301_v24 }
 0x7ff   :  { %v3499_v17 = vpop.eup %3498  ;;  %v2314_v1 = vmul.f32 %v5331_v22, %v2302_v58 }
 0x800   :  { %v5375_v19 = vadd.f32 %v2319_v54, %v2313_v46  ;;  %v2303_v5 = vmul.f32 %v3499_v17, %v5321_v62  ;;  %v2338_v62 = vsub.s32 6, %v5790_v28 }
 0x801   :  { %v5383_v48 = vadd.f32 %v2319_v54, %v2314_v1 }
 0x802   :  { %v2334_v16 = vpack.c.bf16 %v5375_v19, %v5373_v23  ;;  %v2315_v53 = vmul.f32 %v5331_v22, %v2303_v5  ;;  %v2339_v9 = vrot.slane %v5247_v56, %v2338_v62 }
 0x804   :  { %3372 = vmatprep.mubr.msk.bf16.mxu0 %vm49_vm0, %v2334_v16  ;;  %v5385_v8 = vadd.f32 %v2319_v54, %v2315_v53 }
 0x806   :  { %v2335_v57 = vpack.c.bf16 %v5385_v8, %v5383_v48 }
 0x808   :  { %3373 = vmatmul.mubr.msk.bf16.gmra.mxu0 %vm49_vm0, %v2335_v57 }
 0x83f   :  { %v3370_v41 = vpop.f32.mrf.mxu0 }
 0x840   :  { %v2407_v40 = vadd.f32 %v3370_v41, %v2339_v9 }
 0x841   :  { %v2398_v3 = vpop.f32.mrf.mxu0 }
 0x842   :  { %v2399_v45 = vadd.f32 %v2398_v3, %v2339_v9  ;;  %v2431_v10 = vmax.f32 %v2407_v40, 0.0 }
 0x843   :  { %v3371_v33 = vpop.f32.mrf.mxu0 }
 0x844   :  { %v2410_v12 = vadd.f32 %v3371_v33, %v2339_v9  ;;  %v2429_v34 = vmax.f32 %v2399_v45, 0.0 }
 0x845   :  { %v2401_v61 = vpop.f32.mrf.mxu0 }
 0x846   :  { %v2402_v22 = vadd.f32 %v2401_v61, %v2339_v9  ;;  %v2432_v36 = vmax.f32 %v2410_v12, 0.0 }
 0x848   :  { %v2430_v39 = vmax.f32 %v2402_v22, 0.0  ;;  %v2446_v54 = vpack.c.bf16 %v2432_v36, %v2431_v10 }
 0x84a   :  { %v2445_v4 = vpack.c.bf16 %v2430_v39, %v2429_v34 }
 0x84c   :  { %3384 = vmatprep.mubr.msk.bf16.mxu1 %vm2473_vm6, %v2445_v4 }
 0x84d   :  { %3385 = vmatmul.mubr.msk.bf16.vlgmr.msra.gmra.mxu1 %vm2473_vm6, %v2446_v54 }
 0x8c8   :  { %v3374_v25 = vpop.f32.mrf.mxu0 }
 0x8c9   :  { %v2423_v2 = vadd.f32 %v3374_v25, %v2339_v9 }
 0x8ca   :  { %v2414_v37 = vpop.f32.mrf.mxu0 }
 0x8cb   :  { %v2415_v26 = vadd.f32 %v2414_v37, %v2339_v9  ;;  %v2435_v50 = vmax.f32 %v2423_v2, 0.0 }
 0x8cc   :  { %v3375_v38 = vpop.f32.mrf.mxu0 }
 0x8cd   :  { %v2426_v43 = vadd.f32 %v3375_v38, %v2339_v9  ;;  %v2433_v51 = vmax.f32 %v2415_v26, 0.0 }
 0x8ce   :  { %v2417_v7 = vpop.f32.mrf.mxu0 }
 0x8cf   :  { %v2418_v52 = vadd.f32 %v2417_v7, %v2339_v9  ;;  %v2436_v30 = vmax.f32 %v2426_v43, 0.0 }
 0x8d1   :  { %v2434_v31 = vmax.f32 %v2418_v52, 0.0  ;;  %v2448_v60 = vpack.c.bf16 %v2436_v30, %v2435_v50 }
 0x8d3   :  { %v2447_v44 = vpack.c.bf16 %v2434_v31, %v2433_v51 }
 0x8d5   :  { %3388 = vmatprep.mubr.msk.bf16.mxu1 %vm2473_vm6, %v2447_v44 }
 0x8d6   :  { %3389 = vmatmul.mubr.msk.bf16.gmra.mxu1 %vm2473_vm6, %v2448_v60 }
 0x90d   :  { %v3386_v55 = vpop.f32.mrf.mxu1 }
 0x90e   :  { %v2553_v49 = vadd.f32 %v3386_v55, %v5349_v63 }
 0x90f   :  { %v2520_v21 = vpop.f32.mrf.mxu1 }
 0x910   :  { %v2551_v20 = vadd.f32 %v2520_v21, %v5340_v47  ;;  %v5407_v18 = vadd.f32 %v5400_v35, %v2553_v49 }
 0x911   :  { %v3387_v14 = vpop.f32.mrf.mxu1 }
 0x912   :  { %v2554_v13 = vadd.f32 %v3387_v14, %v5351_v29  ;;  %v2563_v27 = vadd.f32 %v5400_v35, %v2551_v20  ;;  %v2655_v56 = vrot.slane %v5407_v18, 2  ;;  %v2582_v59 = vrot.slane %v5407_v18, 6 }
 0x913   :  { %v2523_v0 = vpop.f32.mrf.mxu1  ;;  %v2603_v61 = vrot.slane %v5407_v18, 7  ;;  %v2670_v34 = vrot.slane %v5407_v18, 3  ;;  %v2638_v10 = vrot.slane %v5407_v18, 1  ;;  %v2687_v37 = vrot.slane %v5407_v18, 4 }
 0x914   :  { %v2552_v11 = vadd.f32 %v2523_v0, %v5342_v42  ;;  %v5410_v47 = vadd.f32 %v5400_v35, %v2554_v13  ;;  %v2652_v32 = vrot.slane %v2563_v27, 4  ;;  %v2601_v57 = vrot.slane %v2563_v27, 1 }
 0x915   :  { %v2667_v9 = vrot.slane %v2563_v27, 5  ;;  %v2618_v3 = vrot.slane %v2563_v27, 2  ;;  %v2635_v45 = vrot.slane %v2563_v27, 3  ;;  %v2684_v12 = vrot.slane %v2563_v27, 6 }
 0x916   :  { %v2564_v15 = vadd.f32 %v5400_v35, %v2552_v11  ;;  %v2657_v29 = vrot.slane %v5410_v47, 1  ;;  %v2585_v17 = vrot.slane %v5410_v47, 5  ;;  %v2672_v54 = vrot.slane %v5410_v47, 2 }
 0x917   :  { %v2701_v38 = vrot.slane %v2563_v27, 7  ;;  %v2605_v2 = vrot.slane %v5410_v47, 6  ;;  %v2622_v52 = vrot.slane %v5410_v47, 7  ;;  %v2689_v55 = vrot.slane %v5410_v47, 3 }
 0x918   :  { %v2653_v28 = vrot.slane %v2564_v15, 3  ;;  %v2579_v24 = vrot.slane %v2564_v15, 7  ;;  %v2668_v16 = vrot.slane %v2564_v15, 4  ;;  %v2619_v53 = vrot.slane %v2564_v15, 1 }
 0x919   :  { %v2636_v62 = vrot.slane %v2564_v15, 2  ;;  %v2685_v41 = vrot.slane %v2564_v15, 5  ;;  %v2602_v33 = vsel %vm2580_vm7, %v2564_v15, %v2601_v57  ;;  %v2702_v36 = vrot.slane %v2564_v15, 6 }
 0x91a   :  { %v2654_v42 = vsel %vm2580_vm7, %v2653_v28, %v2652_v32  ;;  %v2581_v46 = vsel %vm2580_vm7, %v2579_v24, %v2563_v27  ;;  %v2669_v40 = vsel %vm2580_vm7, %v2668_v16, %v2667_v9  ;;  %v2620_v22 = vsel %vm2580_vm7, %v2619_v53, %v2618_v3 }
 0x91b   :  { %v2656_v63 = vsel %vm2583_vm8, %v2655_v56, %v2654_v42  ;;  %v2584_v5 = vsel %vm2583_vm8, %v2582_v59, %v2581_v46  ;;  %v2637_v39 = vsel %vm2580_vm7, %v2636_v62, %v2635_v45  ;;  %v2686_v4 = vsel %vm2580_vm7, %v2685_v41, %v2684_v12 }
 0x91c   :  { %v5418_v58 = vsel %vm2586_vm9, %v2657_v29, %v2656_v63  ;;  %v5424_v1 = vsel %vm2586_vm9, %v2585_v17, %v2584_v5  ;;  %v2604_v25 = vsel %vm2583_vm8, %v2603_v61, %v2602_v33  ;;  %v2671_v43 = vsel %vm2583_vm8, %v2670_v34, %v2669_v40 }
 0x91d   :  { %v2621_v7 = vsel %vm2583_vm8, %v5407_v18, %v2620_v22  ;;  %v2639_v51 = vsel %vm2583_vm8, %v2638_v10, %v2637_v39  ;;  %v2688_v31 = vsel %vm2583_vm8, %v2687_v37, %v2686_v4  ;;  %v2703_v50 = vsel %vm2580_vm7, %v2702_v36, %v2701_v38 }
 0x91e   :  { %v2606_v60 = vsel %vm2586_vm9, %v2605_v2, %v2604_v25  ;;  %v2704_v21 = vrot.slane %v5407_v18, 5  ;;  %v2706_v6 = vrot.slane %v5410_v47, 4  ;;  %v2673_v20 = vsel %vm2586_vm9, %v2672_v54, %v2671_v43 }
 0x91f   :  { %v2623_v0 = vsel %vm2586_vm9, %v2622_v52, %v2621_v7  ;;  %v2640_v11 = vsel %vm2586_vm9, %v5410_v47, %v2639_v51  ;;  %v2690_v13 = vsel %vm2586_vm9, %v2689_v55, %v2688_v31 }
 0x920   :  { %v2705_v15 = vsel %vm2583_vm8, %v2704_v21, %v2703_v50 }
 0x996   :  { %v3390_v26 = vpop.f32.mrf.mxu1 }
 0x997   :  { %v2557_v30 = vadd.f32 %v3390_v26, %v5383_v48  ;;  %v2707_v26 = vsel %vm2586_vm9, %v2706_v6, %v2705_v15 }
 0x998   :  { %v2536_v44 = vpop.f32.mrf.mxu1 }
 0x999   :  { %v5451_v14 = vadd.f32 %v5400_v35, %v2557_v30  ;;  %v2555_v48 = vadd.f32 %v2536_v44, %v5373_v23 }
 0x99a   :  { %v3391_v49 = vpop.f32.mrf.mxu1 }
 0x99b   :  { %v5461_v27 = vadd.f32 %v5400_v35, %v2555_v48  ;;  %v2558_v18 = vadd.f32 %v3391_v49, %v5385_v8  ;;  %v2677_v28 = vrot.slane %v5451_v14, 7  ;;  %v2611_v32 = vrot.slane %v5451_v14, 3 }
 0x99c   :  { %v2539_v23 = vpop.f32.mrf.mxu1  ;;  %v2628_v56 = vrot.slane %v5451_v14, 4  ;;  %v2645_v59 = vrot.slane %v5451_v14, 5  ;;  %v2662_v52 = vrot.slane %v5451_v14, 6 }
 0x99d   :  { %v5468_v47 = vadd.f32 %v5400_v35, %v2558_v18  ;;  %v2556_v42 = vadd.f32 %v2539_v23, %v5375_v19  ;;  %v2674_v63 = vrot.slane %v5461_v27, 1  ;;  %v2607_v29 = vrot.slane %v5461_v27, 5 }
 0x99e   :  { %v2624_v8 = vrot.slane %v5461_v27, 6  ;;  %v2641_v24 = vrot.slane %v5461_v27, 7  ;;  %v2691_v46 = vrot.slane %v5461_v27, 2  ;;  %v2708_v19 = vrot.slane %v5461_v27, 3 }
 0x99f   :  { %v2568_v17 = vadd.f32 %v5400_v35, %v2556_v42  ;;  %v2675_v5 = vsel %vm2589_vm10, %v2674_v63, %v2673_v20  ;;  %v2679_v16 = vrot.slane %v5468_v47, 6  ;;  %v2608_v53 = vsel %vm2589_vm10, %v2607_v29, %v2606_v60 }
 0x9a0   :  { %v2613_v57 = vrot.slane %v5468_v47, 2  ;;  %v2625_v62 = vsel %vm2589_vm10, %v2624_v8, %v2623_v0  ;;  %v2630_v41 = vrot.slane %v5468_v47, 3  ;;  %v2642_v12 = vsel %vm2589_vm10, %v2641_v24, %v2640_v11 }
 0x9a1   :  { %v2676_v9 = vsel %vm2592_vm11, %v2568_v17, %v2675_v5  ;;  %v2609_v3 = vrot.slane %v2568_v17, 4  ;;  %v2626_v33 = vrot.slane %v2568_v17, 5  ;;  %v2643_v45 = vrot.slane %v2568_v17, 6 }
 0x9a2   :  { %v2678_v35 = vsel %vm2595_vm12, %v2677_v28, %v2676_v9  ;;  %v2692_v40 = vsel %vm2589_vm10, %v2691_v46, %v2690_v13  ;;  %v2693_v61 = vrot.slane %v2568_v17, 1  ;;  %v2647_v38 = vrot.slane %v5468_v47, 4 }
 0x9a3   :  { %v2680_v22 = vsel %vm2598_vm13, %v2679_v16, %v2678_v35  ;;  %v2610_v36 = vsel %vm2592_vm11, %v2609_v3, %v2608_v53  ;;  %v2627_v34 = vsel %vm2592_vm11, %v2626_v33, %v2625_v62  ;;  %v2644_v39 = vsel %vm2592_vm11, %v2643_v45, %v2642_v12 }
 0x9a4   :  { %2681 = vrot.lane.b32.xlu1 %v2680_v22, %s3552_s9  ;;  %v2612_v10 = vsel %vm2595_vm12, %v2611_v32, %v2610_v36  ;;  %v2629_v4 = vsel %vm2595_vm12, %v2628_v56, %v2627_v34  ;;  %v2646_v54 = vsel %vm2595_vm12, %v2645_v59, %v2644_v39  ;;  %v2694_v25 = vsel %vm2592_vm11, %v2693_v61, %v2692_v40 }
 0x9a5   :  { %v2614_v37 = vsel %vm2598_vm13, %v2613_v57, %v2612_v10  ;;  %v2631_v43 = vsel %vm2598_vm13, %v2630_v41, %v2629_v4  ;;  %v2710_v2 = vrot.slane %v2568_v17, 2  ;;  %v2659_v7 = vsel %vm2589_vm10, %v5461_v27, %v5418_v58 }
 0x9a6   :  { %2615 = vrot.lane.b32.xlu0 %v2614_v37, %s3552_s9  ;;  %v2648_v30 = vsel %vm2598_vm13, %v2647_v38, %v2646_v54  ;;  %v2695_v51 = vsel %vm2595_vm12, %v5451_v14, %v2694_v25  ;;  %v2660_v31 = vrot.slane %v2568_v17, 7  ;;  %v2588_v50 = vrot.slane %v5461_v27, 4 }
 0x9a7   :  { %v2696_v44 = vrot.slane %v5468_v47, 7  ;;  %v2709_v60 = vsel %vm2589_vm10, %v2708_v19, %v2707_v26  ;;  %v2664_v55 = vrot.slane %v5468_v47, 5  ;;  %v2591_v21 = vrot.slane %v2568_v17, 3 }
 0x9a8   :  { %2632 = vrot.lane.b32.xlu1 %v2631_v43, %s3553_s28  ;;  %v2711_v58 = vsel %vm2592_vm11, %v2710_v2, %v2709_v60  ;;  %v2661_v6 = vsel %vm2592_vm11, %v2660_v31, %v2659_v7  ;;  %v2590_v48 = vsel %vm2589_vm10, %v2588_v50, %v5424_v1  ;;  %v2594_v20 = vrot.slane %v5451_v14, 2 }
 0x9a9   :  { %v2712_v0 = vrot.slane %v5451_v14, 1  ;;  %v2663_v49 = vsel %vm2595_vm12, %v2662_v52, %v2661_v6  ;;  %v2597_v11 = vrot.slane %v5468_v47, 1  ;;  %v2593_v13 = vsel %vm2592_vm11, %v2591_v21, %v2590_v48 }
 0x9aa   :  { %2649 = vrot.lane.b32.xlu0 %v2648_v30, %s3554_s1  ;;  %v2697_v15 = vsel %vm2598_vm13, %v2696_v44, %v2695_v51  ;;  %v2665_v27 = vsel %vm2598_vm13, %v2664_v55, %v2663_v49  ;;  %v2596_v18 = vsel %vm2595_vm12, %v2594_v20, %v2593_v13 }
 0x9ab   :  { %v2713_v1 = vsel %vm2595_vm12, %v2712_v0, %v2711_v58  ;;  %v2599_v23 = vsel %vm2598_vm13, %v2597_v11, %v2596_v18 }
 0x9ac   :  { %2698 = vrot.lane.b32.xlu1 %v2697_v15, %s3553_s28  ;;  %v2714_v14 = vsel %vm2598_vm13, %v5468_v47, %v2713_v1 }
 0x9b0   :  { %2715 = vrot.lane.b32.xlu1 %v2714_v14, %s3554_s1 }
 0xa16   :  { %v2682_v28 = vpop.permute.xlu1 %2681 }
 0xa17   :  { %v2721_v59 = vsel %vm49_vm0, %v2665_v27, %v2682_v28 }
 0xa18   :  { %v2616_v32 = vpop.permute.xlu0 %2615 }
 0xa19   :  { %v2718_v56 = vsel %vm49_vm0, %v2599_v23, %v2616_v32 }
 0xa1a   :  { %v2633_v42 = vpop.permute.xlu1 %2632 }
 0xa1b   :  { %v2719_v63 = vsel %vm2473_vm6, %v2718_v56, %v2633_v42 }
 0xa1c   :  { %v2650_v29 = vpop.permute.xlu0 %2649 }
 0xa1d   :  { %v2720_v8 = vsel %vm933_vm4, %v2719_v63, %v2650_v29 }
 0xa1e   :  { %2724 = vst [vmem:[#allocation2] sm:$0xff] %v2720_v8  ;;  %v2699_v24 = vpop.permute.xlu1 %2698 }
 0xa1f   :  { %v2722_v46 = vsel %vm2473_vm6, %v2721_v59, %v2699_v24 }
 0xa22   :  { %v2716_v47 = vpop.permute.xlu1 %2715 }
 0xa23   :  { %v2723_v17 = vsel %vm933_vm4, %v2722_v46, %v2716_v47 }
 0xa24   :  { %2725 = vst [vmem:[#allocation2 + $0x8] sm:$0xff] %v2723_v17 }
 0xa25   :  { %3536 = shalt.err (!%p3533_p4)
}
 0xa26   :  { %2735 = dma.vmem_to_hbm [thread:$0]  %s2733_s29, 256, %s5548_s11, [#allocation3]  }
 0xa27   :  { %3545 = dma.done.wait [#allocation3], 256  }
 0xa28   :  { %3546 = vsyncadd [#allocation3], 4294967040 }
 0xa29   :  { %2739 = vsyncpa [#allocation3], 1 }

</bundles_post_ra>
